<compile_context>
chip_gen: v5e
topology: v5e:2x2
jax: 0.10.0
libtpu: 0.0.40
codegen_flags: <defaults>
</compile_context>

<pallas_src>
import math
from functools import partial

import numpy as np
import jax
import jax.numpy as jnp
from jax.experimental import pallas as pl
from jax.experimental.pallas import tpu as pltpu


def _round_up(x, m):
    return ((x + m - 1) // m) * m


# ---------------------------------------------------------------------------
# In-kernel helpers (activations live as (C, H*W) values, H*W on the lane axis).
# ---------------------------------------------------------------------------

def _conv3x3_taps(scratch_ref, cin, w, hw, g, mask_l, mask_r):
    """Build the (9*cin, hw) im2col matrix of a 3x3 SAME conv from the guard-banded
    scratch (activation parked at lane offset g, >= w+1 zero lanes on each side).

    Flat-offset reads that run off the top/bottom of the image land in the zero guard
    bands, so only the column-wrap taps (dx = +-1) need masking: 6 selects per conv,
    with the masks computed once per kernel invocation."""
    parts = []
    for dy in (-1, 0, 1):
        for dx in (-1, 0, 1):
            # tap[ci, p] = act[ci, p + dy*w + dx]  (static lane offset, aligned-ish load)
            tap = scratch_ref[pl.ds(0, cin), pl.ds(g + dy * w + dx, hw)]
            if dx == -1:
                tap = jnp.where(mask_l, tap, 0.0)
            elif dx == 1:
                tap = jnp.where(mask_r, tap, 0.0)
            parts.append(tap)
    return jnp.concatenate(parts, axis=0)


def _level_kernel(*refs, n_convs, h, w, g, relus, has_out, fuse_up, mxu_dtype):
    """One decoder level, fully fused:
       [nearest x2 upsample (MXU selection matmul) + skip concat] ->
       n_convs x (3x3 SAME conv as one GEMM + bias [+ ReLU]) -> [fused 1x1 out conv].
    refs = (inputs..., out_ref, scratch_ref)."""
    o_ref, scratch_ref = refs[-2], refs[-1]
    hw = h * w

    if fuse_up:
        dec_ref, enc_ref, up_ref = refs[0], refs[1], refs[2]
        params = refs[3:-2]
        # Nearest x2 upsample as (C_dec, hw_lo) @ (hw_lo, hw) 0/1 selection matrix.
        up = jnp.dot(dec_ref[0].astype(mxu_dtype), up_ref[...].astype(mxu_dtype),
                     preferred_element_type=jnp.float32)
        feats = jnp.concatenate([up, enc_ref[0].astype(jnp.float32)], axis=0)
    else:
        params = refs[1:-2]
        feats = refs[0][0].astype(jnp.float32)

    if n_convs:
        # Zero once: the guard bands act as SAME-conv zero padding for every conv layer
        # (only the [g, g+hw) window is ever overwritten afterwards).
        scratch_ref[...] = jnp.zeros(scratch_ref.shape, jnp.float32)
        # Column-boundary masks, hoisted out of the conv loop (shared by all convs).
        col = jax.lax.broadcasted_iota(jnp.int32, (1, hw), 1) % w
        mask_l = col >= 1
        mask_r = col <= w - 2

    pi = 0
    for i in range(n_convs):
        w_ref, b_ref = params[pi], params[pi + 1]
        pi += 2
        cin = feats.shape[0]
        # Park the current activation in the guard-banded scratch (aligned store).
        scratch_ref[pl.ds(0, cin), pl.ds(g, hw)] = feats
        taps = _conv3x3_taps(scratch_ref, cin, w, hw, g, mask_l, mask_r)  # (9*cin, hw)
        y = jnp.dot(w_ref[...].astype(mxu_dtype), taps.astype(mxu_dtype),
                    preferred_element_type=jnp.float32)                   # (cout, hw)
        y = y + b_ref[...]                                                # lane broadcast
        if relus[i]:
            y = jnp.maximum(y, 0.0)
        feats = y

    if has_out:                                                           # fused 1x1 conv
        w_ref, b_ref = params[pi], params[pi + 1]
        feats = jnp.dot(w_ref[...].astype(mxu_dtype), feats.astype(mxu_dtype),
                        preferred_element_type=jnp.float32) + b_ref[...]

    o_ref[0] = feats.astype(o_ref.dtype)


# ---------------------------------------------------------------------------
# Host-side wrapper: one pallas_call per decoder level.
# ---------------------------------------------------------------------------

def _upsample_matrix(h_lo, w_lo):
    """(h_lo*w_lo, 4*h_lo*w_lo) 0/1 matrix implementing nearest x2 upsampling of a
    row-major flattened image: out[:, p] = in[:, (y//2)*w_lo + (x//2)]."""
    h_hi, w_hi = 2 * h_lo, 2 * w_lo
    p = np.arange(h_hi * w_hi)
    src = (p // w_hi // 2) * w_lo + (p % w_hi) // 2
    u = np.zeros((h_lo * w_lo, h_hi * w_hi), np.float32)
    u[src, p] = 1.0
    return jnp.asarray(u)


def fused_level_pallas(dec_feats, enc_feats, convs, relus, out_conv=None,
                       mxu_dtype=jnp.float32):
    """One decoder level as a single pallas_call.

    dec_feats: (N, Cd, h, w) NCHW.  enc_feats: (N, Ce, 2h, 2w) NCHW or None (no
    upsample/concat; conv chain applied to dec_feats directly).  convs: list of
    (weight OIHW (Cout,Cin,3,3), bias (Cout,)).  out_conv: optional 1x1 (w, b)."""
    assert len(convs) == len(relus)
    N = dec_feats.shape[0]
    fuse_up = enc_feats is not None

    if fuse_up:
        _, cd, h_lo, w_lo = dec_feats.shape
        _, ce, H, W = enc_feats.shape
        assert (H, W) == (2 * h_lo, 2 * w_lo), (dec_feats.shape, enc_feats.shape)
        hw_lo, hw = h_lo * w_lo, H * W
        u = _upsample_matrix(h_lo, w_lo)
        args = [dec_feats.reshape(N, cd, hw_lo), enc_feats.reshape(N, ce, hw), u]
        in_specs = [
            pl.BlockSpec((1, cd, hw_lo), lambda n: (n, 0, 0)),
            pl.BlockSpec((1, ce, hw), lambda n: (n, 0, 0)),
            pl.BlockSpec((hw_lo, hw), lambda n: (0, 0)),   # constant -> VMEM-resident
        ]
        flops = 2 * N * cd * hw_lo * hw
        cur_c = cd + ce
    else:
        _, cur_c, H, W = dec_feats.shape
        hw = H * W
        args = [dec_feats.reshape(N, cur_c, hw)]
        in_specs = [pl.BlockSpec((1, cur_c, hw), lambda n: (n, 0, 0))]
        flops = 0

    for wt, bt in convs:                    # wt: (Cout, Cin, 3, 3) PyTorch OIHW
        cout, cin = wt.shape[0], wt.shape[1]
        # (Cout, Cin, 3, 3) -> (Cout, ky, kx, Cin) -> (Cout, 9*Cin); matches the tap
        # stacking order (ky, kx) major / channel minor used in _conv3x3_taps.
        wflat = jnp.transpose(wt, (0, 2, 3, 1)).reshape(cout, 9 * cin)
        args += [wflat, bt.reshape(cout, 1)]
        in_specs += [pl.BlockSpec((cout, 9 * cin), lambda n: (0, 0)),
                     pl.BlockSpec((cout, 1), lambda n: (0, 0))]
        flops += 2 * N * hw * 9 * cin * cout
        cur_c = cout

    has_out = out_conv is not None
    if has_out:
        wo, bo = out_conv                   # wo: (Cls, C, 1, 1)
        cls, cinn = wo.shape[0], wo.shape[1]
        args += [wo.reshape(cls, cinn), bo.reshape(cls, 1)]
        in_specs += [pl.BlockSpec((cls, cinn), lambda n: (0, 0)),
                     pl.BlockSpec((cls, 1), lambda n: (0, 0))]
        flops += 2 * N * hw * cinn * cls
        cur_c = cls

    # Guard-banded scratch: current activation lives at lane offset g, with >= (W+1)
    # zeros on each side so every 3x3 tap is a plain static-offset load.
    g = _round_up(W + 1, 128)
    c_max = max([wt.shape[1] for wt, _ in convs] + [8])
    scratch = pltpu.VMEM((c_max, 2 * g + hw), jnp.float32)

    itemsize = np.dtype(dec_feats.dtype).itemsize
    bytes_accessed = int(sum(int(a.size) * a.dtype.itemsize for a in args)
                         + N * cur_c * hw * itemsize)

    kern = partial(_level_kernel, n_convs=len(convs), h=H, w=W, g=g,
                   relus=tuple(relus), has_out=has_out, fuse_up=fuse_up,
                   mxu_dtype=mxu_dtype)
    out = pl.pallas_call(
        kern,
        out_shape=jax.ShapeDtypeStruct((N, cur_c, hw), dec_feats.dtype),
        grid=(N,),
        in_specs=in_specs,
        out_specs=pl.BlockSpec((1, cur_c, hw), lambda n: (n, 0, 0)),
        scratch_shapes=[scratch],
        compiler_params=pltpu.CompilerParams(
            dimension_semantics=("parallel",)),
        cost_estimate=pl.CostEstimate(flops=int(flops), transcendentals=0,
                                      bytes_accessed=bytes_accessed),
    )(*args)
    return out.reshape(N, cur_c, H, W)


# ---------------------------------------------------------------------------
# Pure-JAX reference (NCHW) and parameter init.
# ---------------------------------------------------------------------------

def _conv_ref(x, w, b, relu):
    out = jax.lax.conv_general_dilated(
        x, w, window_strides=(1, 1), padding="SAME",
        dimension_numbers=("NCHW", "OIHW", "NCHW"))
    out = out + b[None, :, None, None]
    if relu:
        out = jnp.maximum(out, 0.0)
    return out


def _init_conv(key, cin, cout, k):
    """PyTorch nn.Conv2d default init; weight kept in OIHW layout."""
    kw, kb = jax.random.split(key)
    fan_in = cin * k * k
    bound = 1.0 / math.sqrt(fan_in)
    w = jax.random.uniform(kw, (cout, cin, k, k), jnp.float32, -bound, bound)
    b = jax.random.uniform(kb, (cout,), jnp.float32, -bound, bound)
    return w, b


class StitchingDecoder:
    """JAX/Pallas port of _StitchingDecoder.

    NOTE: the PyTorch reference re-creates (randomly initialises) the res_block conv
    weights on every forward call; here all conv weights are initialised once,
    deterministically, by mirroring the forward channel flow."""

    def __init__(self, key, latent_dims, channels_per_block, num_classes,
                 dec_channels, enc_channels, down_channels_per_block=None,
                 convs_per_block=3, blocks_per_level=3, mxu_dtype=jnp.float32):
        self.latent_dims = latent_dims
        self.channels_per_block = channels_per_block
        self.num_classes = num_classes
        self.down_channels_per_block = down_channels_per_block or channels_per_block
        self.convs_per_block = convs_per_block
        self.blocks_per_level = blocks_per_level
        self.mxu_dtype = mxu_dtype   # jnp.bfloat16 for full-rate MXU on v6e/v7x

        start_level = len(latent_dims) + 1
        num_levels = len(channels_per_block)
        c = dec_channels
        self.conv_params = []
        for lvl in range(start_level, num_levels):
            c = c + enc_channels[-1 - lvl]                      # after skip concat
            for _ in range(blocks_per_level):
                out_ch = channels_per_block[-1 - lvl]
                down_ch = self.down_channels_per_block[-1 - lvl]
                chain = [down_ch] * (convs_per_block - 1) + [out_ch]
                cin = c
                for cout in chain:
                    key, sub = jax.random.split(key)
                    self.conv_params.append(_init_conv(sub, cin, cout, 3))
                    cin = cout
                c = out_ch
        key, sub = jax.random.split(key)
        self.out_conv_params = _init_conv(sub, channels_per_block[0], num_classes, 1)

    # ---- fused Pallas forward (one pallas_call per decoder level) ------------
    def __call__(self, encoder_features, decoder_features):
        start_level = len(self.latent_dims) + 1
        num_levels = len(self.channels_per_block)
        levels = list(range(start_level, num_levels))
        n_per_level = self.blocks_per_level * self.convs_per_block
        relus = ([True] * (self.convs_per_block - 1) + [False]) * self.blocks_per_level

        feats = decoder_features                                  # NCHW throughout
        for i, lvl in enumerate(levels):
            convs = self.conv_params[i * n_per_level:(i + 1) * n_per_level]
            last = i == len(levels) - 1
            feats = fused_level_pallas(
                feats, encoder_features[-1 - lvl], convs, relus,
                out_conv=self.out_conv_params if last else None,
                mxu_dtype=self.mxu_dtype)
        if not levels:                      # degenerate config: only the 1x1 out conv
            feats = fused_level_pallas(feats, None, [], [],
                                       out_conv=self.out_conv_params,
                                       mxu_dtype=self.mxu_dtype)
        return feats

    # ---- pure-JAX reference ---------------------------------------------------
    def reference(self, encoder_features, decoder_features):
        feats = decoder_features
        start_level = len(self.latent_dims) + 1
        num_levels = len(self.channels_per_block)
        idx = 0
        for lvl in range(start_level, num_levels):
            feats = jnp.repeat(jnp.repeat(feats, 2, axis=2), 2, axis=3)
            feats = jnp.concatenate([feats, encoder_features[-1 - lvl]], axis=1)
            for _ in range(self.blocks_per_level):
                for ci in range(self.convs_per_block):
                    w, b = self.conv_params[idx]
                    idx += 1
                    feats = _conv_ref(feats, w, b,
                                      relu=(ci < self.convs_per_block - 1))
        wo, bo = self.out_conv_params
        return _conv_ref(feats, wo, bo, relu=False)


if __name__ == "__main__":
    key = jax.random.PRNGKey(0)

    latent_dims = (4,)                     # start_level = 2
    channels_per_block = (8, 16, 24)       # num_levels = 3  -> one stitched level
    num_classes = 3
    N, H = 2, 16                           # full output resolution 16x16

    k_e0, k_e1, k_e2, k_dec, k_params = jax.random.split(key, 5)
    encoder_features = [
        jax.random.normal(k_e0, (N, channels_per_block[0], H, H), jnp.float32),
        jax.random.normal(k_e1, (N, channels_per_block[1], H // 2, H // 2), jnp.float32),
        jax.random.normal(k_e2, (N, channels_per_block[2], H // 4, H // 4), jnp.float32),
    ]
    decoder_features = jax.random.normal(k_dec, (N, 16, H // 2, H // 2), jnp.float32)

    model = StitchingDecoder(
        k_params, latent_dims, channels_per_block, num_classes,
        dec_channels=decoder_features.shape[1],
        enc_channels=[e.shape[1] for e in encoder_features])

    fwd = jax.jit(model.__call__)
    out = jax.block_until_ready(fwd(encoder_features, decoder_features))
    assert out.shape == (N, num_classes, H, H), out.shape

    ref = jax.block_until_ready(model.reference(encoder_features, decoder_features))
    max_err = float(jnp.max(jnp.abs(out - ref)))
    assert jnp.allclose(out, ref, atol=1e-4, rtol=1e-4), max_err

    print("KERNEL_OK")
</pallas_src>

<mosaic_0001>
module attributes {stable_mosaic.version = 11 : i64} {
  func.func @_level_kernel(%arg0: i32, %arg1: memref<1x16x64xf32, #tpu.memory_space<vmem>>, %arg2: memref<1x8x256xf32, #tpu.memory_space<vmem>>, %arg3: memref<64x256xf32, #tpu.memory_space<vmem>>, %arg4: memref<8x216xf32, #tpu.memory_space<vmem>>, %arg5: memref<8x1xf32, #tpu.memory_space<vmem>>, %arg6: memref<8x72xf32, #tpu.memory_space<vmem>>, %arg7: memref<8x1xf32, #tpu.memory_space<vmem>>, %arg8: memref<8x72xf32, #tpu.memory_space<vmem>>, %arg9: memref<8x1xf32, #tpu.memory_space<vmem>>, %arg10: memref<8x72xf32, #tpu.memory_space<vmem>>, %arg11: memref<8x1xf32, #tpu.memory_space<vmem>>, %arg12: memref<8x72xf32, #tpu.memory_space<vmem>>, %arg13: memref<8x1xf32, #tpu.memory_space<vmem>>, %arg14: memref<8x72xf32, #tpu.memory_space<vmem>>, %arg15: memref<8x1xf32, #tpu.memory_space<vmem>>, %arg16: memref<8x72xf32, #tpu.memory_space<vmem>>, %arg17: memref<8x1xf32, #tpu.memory_space<vmem>>, %arg18: memref<8x72xf32, #tpu.memory_space<vmem>>, %arg19: memref<8x1xf32, #tpu.memory_space<vmem>>, %arg20: memref<8x72xf32, #tpu.memory_space<vmem>>, %arg21: memref<8x1xf32, #tpu.memory_space<vmem>>, %arg22: memref<3x8xf32, #tpu.memory_space<vmem>>, %arg23: memref<3x1xf32, #tpu.memory_space<vmem>>, %arg24: memref<1x3x256xf32, #tpu.memory_space<vmem>>, %arg25: memref<24x512xf32, #tpu.memory_space<vmem>>) attributes {dimension_semantics = [#tpu.dimension_semantics<parallel>], iteration_bounds = array<i64: 2>, scalar_prefetch = 0 : i64, scratch_operands = 1 : i64, tpu.core_type = #tpu.core_type<tc>, window_params = [{transform_indices = @transform_0, window_bounds = array<i64: 1, 16, 64>}, {transform_indices = @transform_1, window_bounds = array<i64: 1, 8, 256>}, {pipeline_mode = #tpu.pipeline_mode<synchronous>, transform_indices = @transform_2, window_bounds = array<i64: 64, 256>}, {pipeline_mode = #tpu.pipeline_mode<synchronous>, transform_indices = @transform_3, window_bounds = array<i64: 8, 216>}, {pipeline_mode = #tpu.pipeline_mode<synchronous>, transform_indices = @transform_4, window_bounds = array<i64: 8, 1>}, {pipeline_mode = #tpu.pipeline_mode<synchronous>, transform_indices = @transform_5, window_bounds = array<i64: 8, 72>}, {pipeline_mode = #tpu.pipeline_mode<synchronous>, transform_indices = @transform_6, window_bounds = array<i64: 8, 1>}, {pipeline_mode = #tpu.pipeline_mode<synchronous>, transform_indices = @transform_7, window_bounds = array<i64: 8, 72>}, {pipeline_mode = #tpu.pipeline_mode<synchronous>, transform_indices = @transform_8, window_bounds = array<i64: 8, 1>}, {pipeline_mode = #tpu.pipeline_mode<synchronous>, transform_indices = @transform_9, window_bounds = array<i64: 8, 72>}, {pipeline_mode = #tpu.pipeline_mode<synchronous>, transform_indices = @transform_10, window_bounds = array<i64: 8, 1>}, {pipeline_mode = #tpu.pipeline_mode<synchronous>, transform_indices = @transform_11, window_bounds = array<i64: 8, 72>}, {pipeline_mode = #tpu.pipeline_mode<synchronous>, transform_indices = @transform_12, window_bounds = array<i64: 8, 1>}, {pipeline_mode = #tpu.pipeline_mode<synchronous>, transform_indices = @transform_13, window_bounds = array<i64: 8, 72>}, {pipeline_mode = #tpu.pipeline_mode<synchronous>, transform_indices = @transform_14, window_bounds = array<i64: 8, 1>}, {pipeline_mode = #tpu.pipeline_mode<synchronous>, transform_indices = @transform_15, window_bounds = array<i64: 8, 72>}, {pipeline_mode = #tpu.pipeline_mode<synchronous>, transform_indices = @transform_16, window_bounds = array<i64: 8, 1>}, {pipeline_mode = #tpu.pipeline_mode<synchronous>, transform_indices = @transform_17, window_bounds = array<i64: 8, 72>}, {pipeline_mode = #tpu.pipeline_mode<synchronous>, transform_indices = @transform_18, window_bounds = array<i64: 8, 1>}, {pipeline_mode = #tpu.pipeline_mode<synchronous>, transform_indices = @transform_19, window_bounds = array<i64: 8, 72>}, {pipeline_mode = #tpu.pipeline_mode<synchronous>, transform_indices = @transform_20, window_bounds = array<i64: 8, 1>}, {pipeline_mode = #tpu.pipeline_mode<synchronous>, transform_indices = @transform_21, window_bounds = array<i64: 3, 8>}, {pipeline_mode = #tpu.pipeline_mode<synchronous>, transform_indices = @transform_22, window_bounds = array<i64: 3, 1>}, {transform_indices = @transform_23, window_bounds = array<i64: 1, 3, 256>}]} {
    %c0 = arith.constant 0 : index
    %c0_0 = arith.constant 0 : index
    %c0_1 = arith.constant 0 : index
    %0 = vector.load %arg1[%c0, %c0_0, %c0_1] : memref<1x16x64xf32, #tpu.memory_space<vmem>>, vector<1x16x64xf32>
    %1 = vector.shape_cast %0 : vector<1x16x64xf32> to vector<16x64xf32>
    %c0_2 = arith.constant 0 : index
    %c0_3 = arith.constant 0 : index
    %2 = vector.load %arg3[%c0_2, %c0_3] : memref<64x256xf32, #tpu.memory_space<vmem>>, vector<64x256xf32>
    %cst = arith.constant dense<0.000000e+00> : vector<16x256xf32>
    %3 = tpu.matmul %1, %2, %cst {dimension_numbers = #tpu.dot_dimension_numbers<[1], [0], [0], [1], [0, 0, 1, 1], [], []>} : vector<16x64xf32>, vector<64x256xf32>, vector<16x256xf32> -> vector<16x256xf32>
    %c0_4 = arith.constant 0 : index
    %c0_5 = arith.constant 0 : index
    %c0_6 = arith.constant 0 : index
    %4 = vector.load %arg2[%c0_4, %c0_5, %c0_6] : memref<1x8x256xf32, #tpu.memory_space<vmem>>, vector<1x8x256xf32>
    %5 = vector.shape_cast %4 : vector<1x8x256xf32> to vector<8x256xf32>
    %6 = tpu.concatenate %3, %5 in 0 : vector<16x256xf32>, vector<8x256xf32> -> vector<24x256xf32>
    %cst_7 = arith.constant 0.000000e+00 : f32
    %7 = vector.broadcast %cst_7 : f32 to vector<24x512xf32>
    %c0_8 = arith.constant 0 : index
    %c0_9 = arith.constant 0 : index
    %8 = vector.load %arg25[%c0_8, %c0_9] : memref<24x512xf32, #tpu.memory_space<vmem>>, vector<24x512xf32>
    tpu.vector_store %arg25[%c0_8, %c0_9], %7 {strides = array<i32>} : memref<24x512xf32, #tpu.memory_space<vmem>>, vector<24x512xf32>,
    %9 = tpu.iota {dimensions = array<i32: 1>} : vector<1x256xi32>
    %c16_i32 = arith.constant 16 : i32
    %c0_i32 = arith.constant 0 : i32
    %10 = arith.cmpi eq, %c16_i32, %c0_i32 : i32
    %c1_i32 = arith.constant 1 : i32
    %11 = arith.select %10, %c1_i32, %c16_i32 : i32
    %12 = vector.broadcast %11 : i32 to vector<1x256xi32>
    %13 = arith.remsi %9, %12 : vector<1x256xi32>
    %c0_i32_10 = arith.constant 0 : i32
    %14 = vector.broadcast %c0_i32_10 : i32 to vector<1x256xi32>
    %15 = arith.cmpi ne, %13, %14 : vector<1x256xi32>
    %c0_i32_11 = arith.constant 0 : i32
    %16 = vector.broadcast %c0_i32_11 : i32 to vector<1x256xi32>
    %17 = arith.cmpi slt, %13, %16 : vector<1x256xi32>
    %c0_i32_12 = arith.constant 0 : i32
    %18 = arith.cmpi slt, %11, %c0_i32_12 : i32
    %19 = vector.broadcast %18 : i1 to vector<1x256xi1>
    %20 = vector.broadcast %19 : vector<1x256xi1> to vector<1x256xi1>
    %21 = arith.xori %17, %20 : vector<1x256xi1>
    %22 = arith.andi %21, %15 : vector<1x256xi1>
    %23 = vector.broadcast %11 : i32 to vector<1x256xi32>
    %24 = arith.addi %13, %23 : vector<1x256xi32>
    %25 = arith.select %22, %24, %13 : vector<1x256xi1>, vector<1x256xi32>
    %c1_i32_13 = arith.constant 1 : i32
    %26 = vector.broadcast %c1_i32_13 : i32 to vector<1x256xi32>
    %27 = arith.cmpi sge, %25, %26 : vector<1x256xi32>
    %c14_i32 = arith.constant 14 : i32
    %28 = vector.broadcast %c14_i32 : i32 to vector<1x256xi32>
    %29 = arith.cmpi sle, %25, %28 : vector<1x256xi32>
    %c0_14 = arith.constant 0 : index
    %c128 = arith.constant 128 : index
    %30 = vector.load %arg25[%c0_14, %c128] : memref<24x512xf32, #tpu.memory_space<vmem>>, vector<24x256xf32>
    tpu.vector_store %arg25[%c0_14, %c128], %6 {strides = array<i32>} : memref<24x512xf32, #tpu.memory_space<vmem>>, vector<24x256xf32>,
    %c0_15 = arith.constant 0 : index
    %c111 = arith.constant 111 : index
    %31 = vector.load %arg25[%c0_15, %c111] : memref<24x512xf32, #tpu.memory_space<vmem>>, vector<24x256xf32>
    %cst_16 = arith.constant 0.000000e+00 : f32
    %32 = vector.shape_cast %27 : vector<1x256xi1> to vector<1x256xi1>
    %33 = vector.broadcast %32 : vector<1x256xi1> to vector<24x256xi1>
    %34 = vector.broadcast %cst_16 : f32 to vector<24x256xf32>
    %35 = arith.select %33, %31, %34 : vector<24x256xi1>, vector<24x256xf32>
    %c0_17 = arith.constant 0 : index
    %c112 = arith.constant 112 : index
    %36 = vector.load %arg25[%c0_17, %c112] : memref<24x512xf32, #tpu.memory_space<vmem>>, vector<24x256xf32>
    %c0_18 = arith.constant 0 : index
    %c113 = arith.constant 113 : index
    %37 = vector.load %arg25[%c0_18, %c113] : memref<24x512xf32, #tpu.memory_space<vmem>>, vector<24x256xf32>
    %cst_19 = arith.constant 0.000000e+00 : f32
    %38 = vector.shape_cast %29 : vector<1x256xi1> to vector<1x256xi1>
    %39 = vector.broadcast %38 : vector<1x256xi1> to vector<24x256xi1>
    %40 = vector.broadcast %cst_19 : f32 to vector<24x256xf32>
    %41 = arith.select %39, %37, %40 : vector<24x256xi1>, vector<24x256xf32>
    %c0_20 = arith.constant 0 : index
    %c127 = arith.constant 127 : index
    %42 = vector.load %arg25[%c0_20, %c127] : memref<24x512xf32, #tpu.memory_space<vmem>>, vector<24x256xf32>
    %cst_21 = arith.constant 0.000000e+00 : f32
    %43 = vector.shape_cast %27 : vector<1x256xi1> to vector<1x256xi1>
    %44 = vector.broadcast %43 : vector<1x256xi1> to vector<24x256xi1>
    %45 = vector.broadcast %cst_21 : f32 to vector<24x256xf32>
    %46 = arith.select %44, %42, %45 : vector<24x256xi1>, vector<24x256xf32>
    %c0_22 = arith.constant 0 : index
    %c128_23 = arith.constant 128 : index
    %47 = vector.load %arg25[%c0_22, %c128_23] : memref<24x512xf32, #tpu.memory_space<vmem>>, vector<24x256xf32>
    %c0_24 = arith.constant 0 : index
    %c129 = arith.constant 129 : index
    %48 = vector.load %arg25[%c0_24, %c129] : memref<24x512xf32, #tpu.memory_space<vmem>>, vector<24x256xf32>
    %cst_25 = arith.constant 0.000000e+00 : f32
    %49 = vector.shape_cast %29 : vector<1x256xi1> to vector<1x256xi1>
    %50 = vector.broadcast %49 : vector<1x256xi1> to vector<24x256xi1>
    %51 = vector.broadcast %cst_25 : f32 to vector<24x256xf32>
    %52 = arith.select %50, %48, %51 : vector<24x256xi1>, vector<24x256xf32>
    %c0_26 = arith.constant 0 : index
    %c143 = arith.constant 143 : index
    %53 = vector.load %arg25[%c0_26, %c143] : memref<24x512xf32, #tpu.memory_space<vmem>>, vector<24x256xf32>
    %cst_27 = arith.constant 0.000000e+00 : f32
    %54 = vector.shape_cast %27 : vector<1x256xi1> to vector<1x256xi1>
    %55 = vector.broadcast %54 : vector<1x256xi1> to vector<24x256xi1>
    %56 = vector.broadcast %cst_27 : f32 to vector<24x256xf32>
    %57 = arith.select %55, %53, %56 : vector<24x256xi1>, vector<24x256xf32>
    %c0_28 = arith.constant 0 : index
    %c144 = arith.constant 144 : index
    %58 = vector.load %arg25[%c0_28, %c144] : memref<24x512xf32, #tpu.memory_space<vmem>>, vector<24x256xf32>
    %c0_29 = arith.constant 0 : index
    %c145 = arith.constant 145 : index
    %59 = vector.load %arg25[%c0_29, %c145] : memref<24x512xf32, #tpu.memory_space<vmem>>, vector<24x256xf32>
    %cst_30 = arith.constant 0.000000e+00 : f32
    %60 = vector.shape_cast %29 : vector<1x256xi1> to vector<1x256xi1>
    %61 = vector.broadcast %60 : vector<1x256xi1> to vector<24x256xi1>
    %62 = vector.broadcast %cst_30 : f32 to vector<24x256xf32>
    %63 = arith.select %61, %59, %62 : vector<24x256xi1>, vector<24x256xf32>
    %64 = tpu.concatenate %35, %36, %41, %46, %47, %52, %57, %58, %63 in 0 : vector<24x256xf32>, vector<24x256xf32>, vector<24x256xf32>, vector<24x256xf32>, vector<24x256xf32>, vector<24x256xf32>, vector<24x256xf32>, vector<24x256xf32>, vector<24x256xf32> -> vector<216x256xf32>
    %c0_31 = arith.constant 0 : index
    %c0_32 = arith.constant 0 : index
    %65 = vector.load %arg4[%c0_31, %c0_32] : memref<8x216xf32, #tpu.memory_space<vmem>>, vector<8x216xf32>
    %cst_33 = arith.constant dense<0.000000e+00> : vector<8x256xf32>
    %66 = tpu.matmul %65, %64, %cst_33 {dimension_numbers = #tpu.dot_dimension_numbers<[1], [0], [0], [1], [0, 0, 1, 1], [], []>} : vector<8x216xf32>, vector<216x256xf32>, vector<8x256xf32> -> vector<8x256xf32>
    %c0_34 = arith.constant 0 : index
    %c0_35 = arith.constant 0 : index
    %67 = vector.load %arg5[%c0_34, %c0_35] : memref<8x1xf32, #tpu.memory_space<vmem>>, vector<8x1xf32>
    %68 = vector.broadcast %67 : vector<8x1xf32> to vector<8x256xf32>
    %69 = arith.addf %66, %68 : vector<8x256xf32>
    %cst_36 = arith.constant 0.000000e+00 : f32
    %70 = vector.broadcast %cst_36 : f32 to vector<8x256xf32>
    %71 = arith.maximumf %69, %70 : vector<8x256xf32>
    %c0_37 = arith.constant 0 : index
    %c128_38 = arith.constant 128 : index
    %72 = vector.load %arg25[%c0_37, %c128_38] : memref<24x512xf32, #tpu.memory_space<vmem>>, vector<8x256xf32>
    tpu.vector_store %arg25[%c0_37, %c128_38], %71 {strides = array<i32>} : memref<24x512xf32, #tpu.memory_space<vmem>>, vector<8x256xf32>,
    %c0_39 = arith.constant 0 : index
    %c111_40 = arith.constant 111 : index
    %73 = vector.load %arg25[%c0_39, %c111_40] : memref<24x512xf32, #tpu.memory_space<vmem>>, vector<8x256xf32>
    %cst_41 = arith.constant 0.000000e+00 : f32
    %74 = vector.shape_cast %27 : vector<1x256xi1> to vector<1x256xi1>
    %75 = vector.broadcast %74 : vector<1x256xi1> to vector<8x256xi1>
    %76 = vector.broadcast %cst_41 : f32 to vector<8x256xf32>
    %77 = arith.select %75, %73, %76 : vector<8x256xi1>, vector<8x256xf32>
    %c0_42 = arith.constant 0 : index
    %c112_43 = arith.constant 112 : index
    %78 = vector.load %arg25[%c0_42, %c112_43] : memref<24x512xf32, #tpu.memory_space<vmem>>, vector<8x256xf32>
    %c0_44 = arith.constant 0 : index
    %c113_45 = arith.constant 113 : index
    %79 = vector.load %arg25[%c0_44, %c113_45] : memref<24x512xf32, #tpu.memory_space<vmem>>, vector<8x256xf32>
    %cst_46 = arith.constant 0.000000e+00 : f32
    %80 = vector.shape_cast %29 : vector<1x256xi1> to vector<1x256xi1>
    %81 = vector.broadcast %80 : vector<1x256xi1> to vector<8x256xi1>
    %82 = vector.broadcast %cst_46 : f32 to vector<8x256xf32>
    %83 = arith.select %81, %79, %82 : vector<8x256xi1>, vector<8x256xf32>
    %c0_47 = arith.constant 0 : index
    %c127_48 = arith.constant 127 : index
    %84 = vector.load %arg25[%c0_47, %c127_48] : memref<24x512xf32, #tpu.memory_space<vmem>>, vector<8x256xf32>
    %cst_49 = arith.constant 0.000000e+00 : f32
    %85 = vector.shape_cast %27 : vector<1x256xi1> to vector<1x256xi1>
    %86 = vector.broadcast %85 : vector<1x256xi1> to vector<8x256xi1>
    %87 = vector.broadcast %cst_49 : f32 to vector<8x256xf32>
    %88 = arith.select %86, %84, %87 : vector<8x256xi1>, vector<8x256xf32>
    %c0_50 = arith.constant 0 : index
    %c128_51 = arith.constant 128 : index
    %89 = vector.load %arg25[%c0_50, %c128_51] : memref<24x512xf32, #tpu.memory_space<vmem>>, vector<8x256xf32>
    %c0_52 = arith.constant 0 : index
    %c129_53 = arith.constant 129 : index
    %90 = vector.load %arg25[%c0_52, %c129_53] : memref<24x512xf32, #tpu.memory_space<vmem>>, vector<8x256xf32>
    %cst_54 = arith.constant 0.000000e+00 : f32
    %91 = vector.shape_cast %29 : vector<1x256xi1> to vector<1x256xi1>
    %92 = vector.broadcast %91 : vector<1x256xi1> to vector<8x256xi1>
    %93 = vector.broadcast %cst_54 : f32 to vector<8x256xf32>
    %94 = arith.select %92, %90, %93 : vector<8x256xi1>, vector<8x256xf32>
    %c0_55 = arith.constant 0 : index
    %c143_56 = arith.constant 143 : index
    %95 = vector.load %arg25[%c0_55, %c143_56] : memref<24x512xf32, #tpu.memory_space<vmem>>, vector<8x256xf32>
    %cst_57 = arith.constant 0.000000e+00 : f32
    %96 = vector.shape_cast %27 : vector<1x256xi1> to vector<1x256xi1>
    %97 = vector.broadcast %96 : vector<1x256xi1> to vector<8x256xi1>
    %98 = vector.broadcast %cst_57 : f32 to vector<8x256xf32>
    %99 = arith.select %97, %95, %98 : vector<8x256xi1>, vector<8x256xf32>
    %c0_58 = arith.constant 0 : index
    %c144_59 = arith.constant 144 : index
    %100 = vector.load %arg25[%c0_58, %c144_59] : memref<24x512xf32, #tpu.memory_space<vmem>>, vector<8x256xf32>
    %c0_60 = arith.constant 0 : index
    %c145_61 = arith.constant 145 : index
    %101 = vector.load %arg25[%c0_60, %c145_61] : memref<24x512xf32, #tpu.memory_space<vmem>>, vector<8x256xf32>
    %cst_62 = arith.constant 0.000000e+00 : f32
    %102 = vector.shape_cast %29 : vector<1x256xi1> to vector<1x256xi1>
    %103 = vector.broadcast %102 : vector<1x256xi1> to vector<8x256xi1>
    %104 = vector.broadcast %cst_62 : f32 to vector<8x256xf32>
    %105 = arith.select %103, %101, %104 : vector<8x256xi1>, vector<8x256xf32>
    %106 = tpu.concatenate %77, %78, %83, %88, %89, %94, %99, %100, %105 in 0 : vector<8x256xf32>, vector<8x256xf32>, vector<8x256xf32>, vector<8x256xf32>, vector<8x256xf32>, vector<8x256xf32>, vector<8x256xf32>, vector<8x256xf32>, vector<8x256xf32> -> vector<72x256xf32>
    %c0_63 = arith.constant 0 : index
    %c0_64 = arith.constant 0 : index
    %107 = vector.load %arg6[%c0_63, %c0_64] : memref<8x72xf32, #tpu.memory_space<vmem>>, vector<8x72xf32>
    %cst_65 = arith.constant dense<0.000000e+00> : vector<8x256xf32>
    %108 = tpu.matmul %107, %106, %cst_65 {dimension_numbers = #tpu.dot_dimension_numbers<[1], [0], [0], [1], [0, 0, 1, 1], [], []>} : vector<8x72xf32>, vector<72x256xf32>, vector<8x256xf32> -> vector<8x256xf32>
    %c0_66 = arith.constant 0 : index
    %c0_67 = arith.constant 0 : index
    %109 = vector.load %arg7[%c0_66, %c0_67] : memref<8x1xf32, #tpu.memory_space<vmem>>, vector<8x1xf32>
    %110 = vector.broadcast %109 : vector<8x1xf32> to vector<8x256xf32>
    %111 = arith.addf %108, %110 : vector<8x256xf32>
    %cst_68 = arith.constant 0.000000e+00 : f32
    %112 = vector.broadcast %cst_68 : f32 to vector<8x256xf32>
    %113 = arith.maximumf %111, %112 : vector<8x256xf32>
    %c0_69 = arith.constant 0 : index
    %c128_70 = arith.constant 128 : index
    %114 = vector.load %arg25[%c0_69, %c128_70] : memref<24x512xf32, #tpu.memory_space<vmem>>, vector<8x256xf32>
    tpu.vector_store %arg25[%c0_69, %c128_70], %113 {strides = array<i32>} : memref<24x512xf32, #tpu.memory_space<vmem>>, vector<8x256xf32>,
    %c0_71 = arith.constant 0 : index
    %c111_72 = arith.constant 111 : index
    %115 = vector.load %arg25[%c0_71, %c111_72] : memref<24x512xf32, #tpu.memory_space<vmem>>, vector<8x256xf32>
    %cst_73 = arith.constant 0.000000e+00 : f32
    %116 = vector.shape_cast %27 : vector<1x256xi1> to vector<1x256xi1>
    %117 = vector.broadcast %116 : vector<1x256xi1> to vector<8x256xi1>
    %118 = vector.broadcast %cst_73 : f32 to vector<8x256xf32>
    %119 = arith.select %117, %115, %118 : vector<8x256xi1>, vector<8x256xf32>
    %c0_74 = arith.constant 0 : index
    %c112_75 = arith.constant 112 : index
    %120 = vector.load %arg25[%c0_74, %c112_75] : memref<24x512xf32, #tpu.memory_space<vmem>>, vector<8x256xf32>
    %c0_76 = arith.constant 0 : index
    %c113_77 = arith.constant 113 : index
    %121 = vector.load %arg25[%c0_76, %c113_77] : memref<24x512xf32, #tpu.memory_space<vmem>>, vector<8x256xf32>
    %cst_78 = arith.constant 0.000000e+00 : f32
    %122 = vector.shape_cast %29 : vector<1x256xi1> to vector<1x256xi1>
    %123 = vector.broadcast %122 : vector<1x256xi1> to vector<8x256xi1>
    %124 = vector.broadcast %cst_78 : f32 to vector<8x256xf32>
    %125 = arith.select %123, %121, %124 : vector<8x256xi1>, vector<8x256xf32>
    %c0_79 = arith.constant 0 : index
    %c127_80 = arith.constant 127 : index
    %126 = vector.load %arg25[%c0_79, %c127_80] : memref<24x512xf32, #tpu.memory_space<vmem>>, vector<8x256xf32>
    %cst_81 = arith.constant 0.000000e+00 : f32
    %127 = vector.shape_cast %27 : vector<1x256xi1> to vector<1x256xi1>
    %128 = vector.broadcast %127 : vector<1x256xi1> to vector<8x256xi1>
    %129 = vector.broadcast %cst_81 : f32 to vector<8x256xf32>
    %130 = arith.select %128, %126, %129 : vector<8x256xi1>, vector<8x256xf32>
    %c0_82 = arith.constant 0 : index
    %c128_83 = arith.constant 128 : index
    %131 = vector.load %arg25[%c0_82, %c128_83] : memref<24x512xf32, #tpu.memory_space<vmem>>, vector<8x256xf32>
    %c0_84 = arith.constant 0 : index
    %c129_85 = arith.constant 129 : index
    %132 = vector.load %arg25[%c0_84, %c129_85] : memref<24x512xf32, #tpu.memory_space<vmem>>, vector<8x256xf32>
    %cst_86 = arith.constant 0.000000e+00 : f32
    %133 = vector.shape_cast %29 : vector<1x256xi1> to vector<1x256xi1>
    %134 = vector.broadcast %133 : vector<1x256xi1> to vector<8x256xi1>
    %135 = vector.broadcast %cst_86 : f32 to vector<8x256xf32>
    %136 = arith.select %134, %132, %135 : vector<8x256xi1>, vector<8x256xf32>
    %c0_87 = arith.constant 0 : index
    %c143_88 = arith.constant 143 : index
    %137 = vector.load %arg25[%c0_87, %c143_88] : memref<24x512xf32, #tpu.memory_space<vmem>>, vector<8x256xf32>
    %cst_89 = arith.constant 0.000000e+00 : f32
    %138 = vector.shape_cast %27 : vector<1x256xi1> to vector<1x256xi1>
    %139 = vector.broadcast %138 : vector<1x256xi1> to vector<8x256xi1>
    %140 = vector.broadcast %cst_89 : f32 to vector<8x256xf32>
    %141 = arith.select %139, %137, %140 : vector<8x256xi1>, vector<8x256xf32>
    %c0_90 = arith.constant 0 : index
    %c144_91 = arith.constant 144 : index
    %142 = vector.load %arg25[%c0_90, %c144_91] : memref<24x512xf32, #tpu.memory_space<vmem>>, vector<8x256xf32>
    %c0_92 = arith.constant 0 : index
    %c145_93 = arith.constant 145 : index
    %143 = vector.load %arg25[%c0_92, %c145_93] : memref<24x512xf32, #tpu.memory_space<vmem>>, vector<8x256xf32>
    %cst_94 = arith.constant 0.000000e+00 : f32
    %144 = vector.shape_cast %29 : vector<1x256xi1> to vector<1x256xi1>
    %145 = vector.broadcast %144 : vector<1x256xi1> to vector<8x256xi1>
    %146 = vector.broadcast %cst_94 : f32 to vector<8x256xf32>
    %147 = arith.select %145, %143, %146 : vector<8x256xi1>, vector<8x256xf32>
    %148 = tpu.concatenate %119, %120, %125, %130, %131, %136, %141, %142, %147 in 0 : vector<8x256xf32>, vector<8x256xf32>, vector<8x256xf32>, vector<8x256xf32>, vector<8x256xf32>, vector<8x256xf32>, vector<8x256xf32>, vector<8x256xf32>, vector<8x256xf32> -> vector<72x256xf32>
    %c0_95 = arith.constant 0 : index
    %c0_96 = arith.constant 0 : index
    %149 = vector.load %arg8[%c0_95, %c0_96] : memref<8x72xf32, #tpu.memory_space<vmem>>, vector<8x72xf32>
    %cst_97 = arith.constant dense<0.000000e+00> : vector<8x256xf32>
    %150 = tpu.matmul %149, %148, %cst_97 {dimension_numbers = #tpu.dot_dimension_numbers<[1], [0], [0], [1], [0, 0, 1, 1], [], []>} : vector<8x72xf32>, vector<72x256xf32>, vector<8x256xf32> -> vector<8x256xf32>
    %c0_98 = arith.constant 0 : index
    %c0_99 = arith.constant 0 : index
    %151 = vector.load %arg9[%c0_98, %c0_99] : memref<8x1xf32, #tpu.memory_space<vmem>>, vector<8x1xf32>
    %152 = vector.broadcast %151 : vector<8x1xf32> to vector<8x256xf32>
    %153 = arith.addf %150, %152 : vector<8x256xf32>
    %c0_100 = arith.constant 0 : index
    %c128_101 = arith.constant 128 : index
    %154 = vector.load %arg25[%c0_100, %c128_101] : memref<24x512xf32, #tpu.memory_space<vmem>>, vector<8x256xf32>
    tpu.vector_store %arg25[%c0_100, %c128_101], %153 {strides = array<i32>} : memref<24x512xf32, #tpu.memory_space<vmem>>, vector<8x256xf32>,
    %c0_102 = arith.constant 0 : index
    %c111_103 = arith.constant 111 : index
    %155 = vector.load %arg25[%c0_102, %c111_103] : memref<24x512xf32, #tpu.memory_space<vmem>>, vector<8x256xf32>
    %cst_104 = arith.constant 0.000000e+00 : f32
    %156 = vector.shape_cast %27 : vector<1x256xi1> to vector<1x256xi1>
    %157 = vector.broadcast %156 : vector<1x256xi1> to vector<8x256xi1>
    %158 = vector.broadcast %cst_104 : f32 to vector<8x256xf32>
    %159 = arith.select %157, %155, %158 : vector<8x256xi1>, vector<8x256xf32>
    %c0_105 = arith.constant 0 : index
    %c112_106 = arith.constant 112 : index
    %160 = vector.load %arg25[%c0_105, %c112_106] : memref<24x512xf32, #tpu.memory_space<vmem>>, vector<8x256xf32>
    %c0_107 = arith.constant 0 : index
    %c113_108 = arith.constant 113 : index
    %161 = vector.load %arg25[%c0_107, %c113_108] : memref<24x512xf32, #tpu.memory_space<vmem>>, vector<8x256xf32>
    %cst_109 = arith.constant 0.000000e+00 : f32
    %162 = vector.shape_cast %29 : vector<1x256xi1> to vector<1x256xi1>
    %163 = vector.broadcast %162 : vector<1x256xi1> to vector<8x256xi1>
    %164 = vector.broadcast %cst_109 : f32 to vector<8x256xf32>
    %165 = arith.select %163, %161, %164 : vector<8x256xi1>, vector<8x256xf32>
    %c0_110 = arith.constant 0 : index
    %c127_111 = arith.constant 127 : index
    %166 = vector.load %arg25[%c0_110, %c127_111] : memref<24x512xf32, #tpu.memory_space<vmem>>, vector<8x256xf32>
    %cst_112 = arith.constant 0.000000e+00 : f32
    %167 = vector.shape_cast %27 : vector<1x256xi1> to vector<1x256xi1>
    %168 = vector.broadcast %167 : vector<1x256xi1> to vector<8x256xi1>
    %169 = vector.broadcast %cst_112 : f32 to vector<8x256xf32>
    %170 = arith.select %168, %166, %169 : vector<8x256xi1>, vector<8x256xf32>
    %c0_113 = arith.constant 0 : index
    %c128_114 = arith.constant 128 : index
    %171 = vector.load %arg25[%c0_113, %c128_114] : memref<24x512xf32, #tpu.memory_space<vmem>>, vector<8x256xf32>
    %c0_115 = arith.constant 0 : index
    %c129_116 = arith.constant 129 : index
    %172 = vector.load %arg25[%c0_115, %c129_116] : memref<24x512xf32, #tpu.memory_space<vmem>>, vector<8x256xf32>
    %cst_117 = arith.constant 0.000000e+00 : f32
    %173 = vector.shape_cast %29 : vector<1x256xi1> to vector<1x256xi1>
    %174 = vector.broadcast %173 : vector<1x256xi1> to vector<8x256xi1>
    %175 = vector.broadcast %cst_117 : f32 to vector<8x256xf32>
    %176 = arith.select %174, %172, %175 : vector<8x256xi1>, vector<8x256xf32>
    %c0_118 = arith.constant 0 : index
    %c143_119 = arith.constant 143 : index
    %177 = vector.load %arg25[%c0_118, %c143_119] : memref<24x512xf32, #tpu.memory_space<vmem>>, vector<8x256xf32>
    %cst_120 = arith.constant 0.000000e+00 : f32
    %178 = vector.shape_cast %27 : vector<1x256xi1> to vector<1x256xi1>
    %179 = vector.broadcast %178 : vector<1x256xi1> to vector<8x256xi1>
    %180 = vector.broadcast %cst_120 : f32 to vector<8x256xf32>
    %181 = arith.select %179, %177, %180 : vector<8x256xi1>, vector<8x256xf32>
    %c0_121 = arith.constant 0 : index
    %c144_122 = arith.constant 144 : index
    %182 = vector.load %arg25[%c0_121, %c144_122] : memref<24x512xf32, #tpu.memory_space<vmem>>, vector<8x256xf32>
    %c0_123 = arith.constant 0 : index
    %c145_124 = arith.constant 145 : index
    %183 = vector.load %arg25[%c0_123, %c145_124] : memref<24x512xf32, #tpu.memory_space<vmem>>, vector<8x256xf32>
    %cst_125 = arith.constant 0.000000e+00 : f32
    %184 = vector.shape_cast %29 : vector<1x256xi1> to vector<1x256xi1>
    %185 = vector.broadcast %184 : vector<1x256xi1> to vector<8x256xi1>
    %186 = vector.broadcast %cst_125 : f32 to vector<8x256xf32>
    %187 = arith.select %185, %183, %186 : vector<8x256xi1>, vector<8x256xf32>
    %188 = tpu.concatenate %159, %160, %165, %170, %171, %176, %181, %182, %187 in 0 : vector<8x256xf32>, vector<8x256xf32>, vector<8x256xf32>, vector<8x256xf32>, vector<8x256xf32>, vector<8x256xf32>, vector<8x256xf32>, vector<8x256xf32>, vector<8x256xf32> -> vector<72x256xf32>
    %c0_126 = arith.constant 0 : index
    %c0_127 = arith.constant 0 : index
    %189 = vector.load %arg10[%c0_126, %c0_127] : memref<8x72xf32, #tpu.memory_space<vmem>>, vector<8x72xf32>
    %cst_128 = arith.constant dense<0.000000e+00> : vector<8x256xf32>
    %190 = tpu.matmul %189, %188, %cst_128 {dimension_numbers = #tpu.dot_dimension_numbers<[1], [0], [0], [1], [0, 0, 1, 1], [], []>} : vector<8x72xf32>, vector<72x256xf32>, vector<8x256xf32> -> vector<8x256xf32>
    %c0_129 = arith.constant 0 : index
    %c0_130 = arith.constant 0 : index
    %191 = vector.load %arg11[%c0_129, %c0_130] : memref<8x1xf32, #tpu.memory_space<vmem>>, vector<8x1xf32>
    %192 = vector.broadcast %191 : vector<8x1xf32> to vector<8x256xf32>
    %193 = arith.addf %190, %192 : vector<8x256xf32>
    %cst_131 = arith.constant 0.000000e+00 : f32
    %194 = vector.broadcast %cst_131 : f32 to vector<8x256xf32>
    %195 = arith.maximumf %193, %194 : vector<8x256xf32>
    %c0_132 = arith.constant 0 : index
    %c128_133 = arith.constant 128 : index
    %196 = vector.load %arg25[%c0_132, %c128_133] : memref<24x512xf32, #tpu.memory_space<vmem>>, vector<8x256xf32>
    tpu.vector_store %arg25[%c0_132, %c128_133], %195 {strides = array<i32>} : memref<24x512xf32, #tpu.memory_space<vmem>>, vector<8x256xf32>,
    %c0_134 = arith.constant 0 : index
    %c111_135 = arith.constant 111 : index
    %197 = vector.load %arg25[%c0_134, %c111_135] : memref<24x512xf32, #tpu.memory_space<vmem>>, vector<8x256xf32>
    %cst_136 = arith.constant 0.000000e+00 : f32
    %198 = vector.shape_cast %27 : vector<1x256xi1> to vector<1x256xi1>
    %199 = vector.broadcast %198 : vector<1x256xi1> to vector<8x256xi1>
    %200 = vector.broadcast %cst_136 : f32 to vector<8x256xf32>
    %201 = arith.select %199, %197, %200 : vector<8x256xi1>, vector<8x256xf32>
    %c0_137 = arith.constant 0 : index
    %c112_138 = arith.constant 112 : index
    %202 = vector.load %arg25[%c0_137, %c112_138] : memref<24x512xf32, #tpu.memory_space<vmem>>, vector<8x256xf32>
    %c0_139 = arith.constant 0 : index
    %c113_140 = arith.constant 113 : index
    %203 = vector.load %arg25[%c0_139, %c113_140] : memref<24x512xf32, #tpu.memory_space<vmem>>, vector<8x256xf32>
    %cst_141 = arith.constant 0.000000e+00 : f32
    %204 = vector.shape_cast %29 : vector<1x256xi1> to vector<1x256xi1>
    %205 = vector.broadcast %204 : vector<1x256xi1> to vector<8x256xi1>
    %206 = vector.broadcast %cst_141 : f32 to vector<8x256xf32>
    %207 = arith.select %205, %203, %206 : vector<8x256xi1>, vector<8x256xf32>
    %c0_142 = arith.constant 0 : index
    %c127_143 = arith.constant 127 : index
    %208 = vector.load %arg25[%c0_142, %c127_143] : memref<24x512xf32, #tpu.memory_space<vmem>>, vector<8x256xf32>
    %cst_144 = arith.constant 0.000000e+00 : f32
    %209 = vector.shape_cast %27 : vector<1x256xi1> to vector<1x256xi1>
    %210 = vector.broadcast %209 : vector<1x256xi1> to vector<8x256xi1>
    %211 = vector.broadcast %cst_144 : f32 to vector<8x256xf32>
    %212 = arith.select %210, %208, %211 : vector<8x256xi1>, vector<8x256xf32>
    %c0_145 = arith.constant 0 : index
    %c128_146 = arith.constant 128 : index
    %213 = vector.load %arg25[%c0_145, %c128_146] : memref<24x512xf32, #tpu.memory_space<vmem>>, vector<8x256xf32>
    %c0_147 = arith.constant 0 : index
    %c129_148 = arith.constant 129 : index
    %214 = vector.load %arg25[%c0_147, %c129_148] : memref<24x512xf32, #tpu.memory_space<vmem>>, vector<8x256xf32>
    %cst_149 = arith.constant 0.000000e+00 : f32
    %215 = vector.shape_cast %29 : vector<1x256xi1> to vector<1x256xi1>
    %216 = vector.broadcast %215 : vector<1x256xi1> to vector<8x256xi1>
    %217 = vector.broadcast %cst_149 : f32 to vector<8x256xf32>
    %218 = arith.select %216, %214, %217 : vector<8x256xi1>, vector<8x256xf32>
    %c0_150 = arith.constant 0 : index
    %c143_151 = arith.constant 143 : index
    %219 = vector.load %arg25[%c0_150, %c143_151] : memref<24x512xf32, #tpu.memory_space<vmem>>, vector<8x256xf32>
    %cst_152 = arith.constant 0.000000e+00 : f32
    %220 = vector.shape_cast %27 : vector<1x256xi1> to vector<1x256xi1>
    %221 = vector.broadcast %220 : vector<1x256xi1> to vector<8x256xi1>
    %222 = vector.broadcast %cst_152 : f32 to vector<8x256xf32>
    %223 = arith.select %221, %219, %222 : vector<8x256xi1>, vector<8x256xf32>
    %c0_153 = arith.constant 0 : index
    %c144_154 = arith.constant 144 : index
    %224 = vector.load %arg25[%c0_153, %c144_154] : memref<24x512xf32, #tpu.memory_space<vmem>>, vector<8x256xf32>
    %c0_155 = arith.constant 0 : index
    %c145_156 = arith.constant 145 : index
    %225 = vector.load %arg25[%c0_155, %c145_156] : memref<24x512xf32, #tpu.memory_space<vmem>>, vector<8x256xf32>
    %cst_157 = arith.constant 0.000000e+00 : f32
    %226 = vector.shape_cast %29 : vector<1x256xi1> to vector<1x256xi1>
    %227 = vector.broadcast %226 : vector<1x256xi1> to vector<8x256xi1>
    %228 = vector.broadcast %cst_157 : f32 to vector<8x256xf32>
    %229 = arith.select %227, %225, %228 : vector<8x256xi1>, vector<8x256xf32>
    %230 = tpu.concatenate %201, %202, %207, %212, %213, %218, %223, %224, %229 in 0 : vector<8x256xf32>, vector<8x256xf32>, vector<8x256xf32>, vector<8x256xf32>, vector<8x256xf32>, vector<8x256xf32>, vector<8x256xf32>, vector<8x256xf32>, vector<8x256xf32> -> vector<72x256xf32>
    %c0_158 = arith.constant 0 : index
    %c0_159 = arith.constant 0 : index
    %231 = vector.load %arg12[%c0_158, %c0_159] : memref<8x72xf32, #tpu.memory_space<vmem>>, vector<8x72xf32>
    %cst_160 = arith.constant dense<0.000000e+00> : vector<8x256xf32>
    %232 = tpu.matmul %231, %230, %cst_160 {dimension_numbers = #tpu.dot_dimension_numbers<[1], [0], [0], [1], [0, 0, 1, 1], [], []>} : vector<8x72xf32>, vector<72x256xf32>, vector<8x256xf32> -> vector<8x256xf32>
    %c0_161 = arith.constant 0 : index
    %c0_162 = arith.constant 0 : index
    %233 = vector.load %arg13[%c0_161, %c0_162] : memref<8x1xf32, #tpu.memory_space<vmem>>, vector<8x1xf32>
    %234 = vector.broadcast %233 : vector<8x1xf32> to vector<8x256xf32>
    %235 = arith.addf %232, %234 : vector<8x256xf32>
    %cst_163 = arith.constant 0.000000e+00 : f32
    %236 = vector.broadcast %cst_163 : f32 to vector<8x256xf32>
    %237 = arith.maximumf %235, %236 : vector<8x256xf32>
    %c0_164 = arith.constant 0 : index
    %c128_165 = arith.constant 128 : index
    %238 = vector.load %arg25[%c0_164, %c128_165] : memref<24x512xf32, #tpu.memory_space<vmem>>, vector<8x256xf32>
    tpu.vector_store %arg25[%c0_164, %c128_165], %237 {strides = array<i32>} : memref<24x512xf32, #tpu.memory_space<vmem>>, vector<8x256xf32>,
    %c0_166 = arith.constant 0 : index
    %c111_167 = arith.constant 111 : index
    %239 = vector.load %arg25[%c0_166, %c111_167] : memref<24x512xf32, #tpu.memory_space<vmem>>, vector<8x256xf32>
    %cst_168 = arith.constant 0.000000e+00 : f32
    %240 = vector.shape_cast %27 : vector<1x256xi1> to vector<1x256xi1>
    %241 = vector.broadcast %240 : vector<1x256xi1> to vector<8x256xi1>
    %242 = vector.broadcast %cst_168 : f32 to vector<8x256xf32>
    %243 = arith.select %241, %239, %242 : vector<8x256xi1>, vector<8x256xf32>
    %c0_169 = arith.constant 0 : index
    %c112_170 = arith.constant 112 : index
    %244 = vector.load %arg25[%c0_169, %c112_170] : memref<24x512xf32, #tpu.memory_space<vmem>>, vector<8x256xf32>
    %c0_171 = arith.constant 0 : index
    %c113_172 = arith.constant 113 : index
    %245 = vector.load %arg25[%c0_171, %c113_172] : memref<24x512xf32, #tpu.memory_space<vmem>>, vector<8x256xf32>
    %cst_173 = arith.constant 0.000000e+00 : f32
    %246 = vector.shape_cast %29 : vector<1x256xi1> to vector<1x256xi1>
    %247 = vector.broadcast %246 : vector<1x256xi1> to vector<8x256xi1>
    %248 = vector.broadcast %cst_173 : f32 to vector<8x256xf32>
    %249 = arith.select %247, %245, %248 : vector<8x256xi1>, vector<8x256xf32>
    %c0_174 = arith.constant 0 : index
    %c127_175 = arith.constant 127 : index
    %250 = vector.load %arg25[%c0_174, %c127_175] : memref<24x512xf32, #tpu.memory_space<vmem>>, vector<8x256xf32>
    %cst_176 = arith.constant 0.000000e+00 : f32
    %251 = vector.shape_cast %27 : vector<1x256xi1> to vector<1x256xi1>
    %252 = vector.broadcast %251 : vector<1x256xi1> to vector<8x256xi1>
    %253 = vector.broadcast %cst_176 : f32 to vector<8x256xf32>
    %254 = arith.select %252, %250, %253 : vector<8x256xi1>, vector<8x256xf32>
    %c0_177 = arith.constant 0 : index
    %c128_178 = arith.constant 128 : index
    %255 = vector.load %arg25[%c0_177, %c128_178] : memref<24x512xf32, #tpu.memory_space<vmem>>, vector<8x256xf32>
    %c0_179 = arith.constant 0 : index
    %c129_180 = arith.constant 129 : index
    %256 = vector.load %arg25[%c0_179, %c129_180] : memref<24x512xf32, #tpu.memory_space<vmem>>, vector<8x256xf32>
    %cst_181 = arith.constant 0.000000e+00 : f32
    %257 = vector.shape_cast %29 : vector<1x256xi1> to vector<1x256xi1>
    %258 = vector.broadcast %257 : vector<1x256xi1> to vector<8x256xi1>
    %259 = vector.broadcast %cst_181 : f32 to vector<8x256xf32>
    %260 = arith.select %258, %256, %259 : vector<8x256xi1>, vector<8x256xf32>
    %c0_182 = arith.constant 0 : index
    %c143_183 = arith.constant 143 : index
    %261 = vector.load %arg25[%c0_182, %c143_183] : memref<24x512xf32, #tpu.memory_space<vmem>>, vector<8x256xf32>
    %cst_184 = arith.constant 0.000000e+00 : f32
    %262 = vector.shape_cast %27 : vector<1x256xi1> to vector<1x256xi1>
    %263 = vector.broadcast %262 : vector<1x256xi1> to vector<8x256xi1>
    %264 = vector.broadcast %cst_184 : f32 to vector<8x256xf32>
    %265 = arith.select %263, %261, %264 : vector<8x256xi1>, vector<8x256xf32>
    %c0_185 = arith.constant 0 : index
    %c144_186 = arith.constant 144 : index
    %266 = vector.load %arg25[%c0_185, %c144_186] : memref<24x512xf32, #tpu.memory_space<vmem>>, vector<8x256xf32>
    %c0_187 = arith.constant 0 : index
    %c145_188 = arith.constant 145 : index
    %267 = vector.load %arg25[%c0_187, %c145_188] : memref<24x512xf32, #tpu.memory_space<vmem>>, vector<8x256xf32>
    %cst_189 = arith.constant 0.000000e+00 : f32
    %268 = vector.shape_cast %29 : vector<1x256xi1> to vector<1x256xi1>
    %269 = vector.broadcast %268 : vector<1x256xi1> to vector<8x256xi1>
    %270 = vector.broadcast %cst_189 : f32 to vector<8x256xf32>
    %271 = arith.select %269, %267, %270 : vector<8x256xi1>, vector<8x256xf32>
    %272 = tpu.concatenate %243, %244, %249, %254, %255, %260, %265, %266, %271 in 0 : vector<8x256xf32>, vector<8x256xf32>, vector<8x256xf32>, vector<8x256xf32>, vector<8x256xf32>, vector<8x256xf32>, vector<8x256xf32>, vector<8x256xf32>, vector<8x256xf32> -> vector<72x256xf32>
    %c0_190 = arith.constant 0 : index
    %c0_191 = arith.constant 0 : index
    %273 = vector.load %arg14[%c0_190, %c0_191] : memref<8x72xf32, #tpu.memory_space<vmem>>, vector<8x72xf32>
    %cst_192 = arith.constant dense<0.000000e+00> : vector<8x256xf32>
    %274 = tpu.matmul %273, %272, %cst_192 {dimension_numbers = #tpu.dot_dimension_numbers<[1], [0], [0], [1], [0, 0, 1, 1], [], []>} : vector<8x72xf32>, vector<72x256xf32>, vector<8x256xf32> -> vector<8x256xf32>
    %c0_193 = arith.constant 0 : index
    %c0_194 = arith.constant 0 : index
    %275 = vector.load %arg15[%c0_193, %c0_194] : memref<8x1xf32, #tpu.memory_space<vmem>>, vector<8x1xf32>
    %276 = vector.broadcast %275 : vector<8x1xf32> to vector<8x256xf32>
    %277 = arith.addf %274, %276 : vector<8x256xf32>
    %c0_195 = arith.constant 0 : index
    %c128_196 = arith.constant 128 : index
    %278 = vector.load %arg25[%c0_195, %c128_196] : memref<24x512xf32, #tpu.memory_space<vmem>>, vector<8x256xf32>
    tpu.vector_store %arg25[%c0_195, %c128_196], %277 {strides = array<i32>} : memref<24x512xf32, #tpu.memory_space<vmem>>, vector<8x256xf32>,
    %c0_197 = arith.constant 0 : index
    %c111_198 = arith.constant 111 : index
    %279 = vector.load %arg25[%c0_197, %c111_198] : memref<24x512xf32, #tpu.memory_space<vmem>>, vector<8x256xf32>
    %cst_199 = arith.constant 0.000000e+00 : f32
    %280 = vector.shape_cast %27 : vector<1x256xi1> to vector<1x256xi1>
    %281 = vector.broadcast %280 : vector<1x256xi1> to vector<8x256xi1>
    %282 = vector.broadcast %cst_199 : f32 to vector<8x256xf32>
    %283 = arith.select %281, %279, %282 : vector<8x256xi1>, vector<8x256xf32>
    %c0_200 = arith.constant 0 : index
    %c112_201 = arith.constant 112 : index
    %284 = vector.load %arg25[%c0_200, %c112_201] : memref<24x512xf32, #tpu.memory_space<vmem>>, vector<8x256xf32>
    %c0_202 = arith.constant 0 : index
    %c113_203 = arith.constant 113 : index
    %285 = vector.load %arg25[%c0_202, %c113_203] : memref<24x512xf32, #tpu.memory_space<vmem>>, vector<8x256xf32>
    %cst_204 = arith.constant 0.000000e+00 : f32
    %286 = vector.shape_cast %29 : vector<1x256xi1> to vector<1x256xi1>
    %287 = vector.broadcast %286 : vector<1x256xi1> to vector<8x256xi1>
    %288 = vector.broadcast %cst_204 : f32 to vector<8x256xf32>
    %289 = arith.select %287, %285, %288 : vector<8x256xi1>, vector<8x256xf32>
    %c0_205 = arith.constant 0 : index
    %c127_206 = arith.constant 127 : index
    %290 = vector.load %arg25[%c0_205, %c127_206] : memref<24x512xf32, #tpu.memory_space<vmem>>, vector<8x256xf32>
    %cst_207 = arith.constant 0.000000e+00 : f32
    %291 = vector.shape_cast %27 : vector<1x256xi1> to vector<1x256xi1>
    %292 = vector.broadcast %291 : vector<1x256xi1> to vector<8x256xi1>
    %293 = vector.broadcast %cst_207 : f32 to vector<8x256xf32>
    %294 = arith.select %292, %290, %293 : vector<8x256xi1>, vector<8x256xf32>
    %c0_208 = arith.constant 0 : index
    %c128_209 = arith.constant 128 : index
    %295 = vector.load %arg25[%c0_208, %c128_209] : memref<24x512xf32, #tpu.memory_space<vmem>>, vector<8x256xf32>
    %c0_210 = arith.constant 0 : index
    %c129_211 = arith.constant 129 : index
    %296 = vector.load %arg25[%c0_210, %c129_211] : memref<24x512xf32, #tpu.memory_space<vmem>>, vector<8x256xf32>
    %cst_212 = arith.constant 0.000000e+00 : f32
    %297 = vector.shape_cast %29 : vector<1x256xi1> to vector<1x256xi1>
    %298 = vector.broadcast %297 : vector<1x256xi1> to vector<8x256xi1>
    %299 = vector.broadcast %cst_212 : f32 to vector<8x256xf32>
    %300 = arith.select %298, %296, %299 : vector<8x256xi1>, vector<8x256xf32>
    %c0_213 = arith.constant 0 : index
    %c143_214 = arith.constant 143 : index
    %301 = vector.load %arg25[%c0_213, %c143_214] : memref<24x512xf32, #tpu.memory_space<vmem>>, vector<8x256xf32>
    %cst_215 = arith.constant 0.000000e+00 : f32
    %302 = vector.shape_cast %27 : vector<1x256xi1> to vector<1x256xi1>
    %303 = vector.broadcast %302 : vector<1x256xi1> to vector<8x256xi1>
    %304 = vector.broadcast %cst_215 : f32 to vector<8x256xf32>
    %305 = arith.select %303, %301, %304 : vector<8x256xi1>, vector<8x256xf32>
    %c0_216 = arith.constant 0 : index
    %c144_217 = arith.constant 144 : index
    %306 = vector.load %arg25[%c0_216, %c144_217] : memref<24x512xf32, #tpu.memory_space<vmem>>, vector<8x256xf32>
    %c0_218 = arith.constant 0 : index
    %c145_219 = arith.constant 145 : index
    %307 = vector.load %arg25[%c0_218, %c145_219] : memref<24x512xf32, #tpu.memory_space<vmem>>, vector<8x256xf32>
    %cst_220 = arith.constant 0.000000e+00 : f32
    %308 = vector.shape_cast %29 : vector<1x256xi1> to vector<1x256xi1>
    %309 = vector.broadcast %308 : vector<1x256xi1> to vector<8x256xi1>
    %310 = vector.broadcast %cst_220 : f32 to vector<8x256xf32>
    %311 = arith.select %309, %307, %310 : vector<8x256xi1>, vector<8x256xf32>
    %312 = tpu.concatenate %283, %284, %289, %294, %295, %300, %305, %306, %311 in 0 : vector<8x256xf32>, vector<8x256xf32>, vector<8x256xf32>, vector<8x256xf32>, vector<8x256xf32>, vector<8x256xf32>, vector<8x256xf32>, vector<8x256xf32>, vector<8x256xf32> -> vector<72x256xf32>
    %c0_221 = arith.constant 0 : index
    %c0_222 = arith.constant 0 : index
    %313 = vector.load %arg16[%c0_221, %c0_222] : memref<8x72xf32, #tpu.memory_space<vmem>>, vector<8x72xf32>
    %cst_223 = arith.constant dense<0.000000e+00> : vector<8x256xf32>
    %314 = tpu.matmul %313, %312, %cst_223 {dimension_numbers = #tpu.dot_dimension_numbers<[1], [0], [0], [1], [0, 0, 1, 1], [], []>} : vector<8x72xf32>, vector<72x256xf32>, vector<8x256xf32> -> vector<8x256xf32>
    %c0_224 = arith.constant 0 : index
    %c0_225 = arith.constant 0 : index
    %315 = vector.load %arg17[%c0_224, %c0_225] : memref<8x1xf32, #tpu.memory_space<vmem>>, vector<8x1xf32>
    %316 = vector.broadcast %315 : vector<8x1xf32> to vector<8x256xf32>
    %317 = arith.addf %314, %316 : vector<8x256xf32>
    %cst_226 = arith.constant 0.000000e+00 : f32
    %318 = vector.broadcast %cst_226 : f32 to vector<8x256xf32>
    %319 = arith.maximumf %317, %318 : vector<8x256xf32>
    %c0_227 = arith.constant 0 : index
    %c128_228 = arith.constant 128 : index
    %320 = vector.load %arg25[%c0_227, %c128_228] : memref<24x512xf32, #tpu.memory_space<vmem>>, vector<8x256xf32>
    tpu.vector_store %arg25[%c0_227, %c128_228], %319 {strides = array<i32>} : memref<24x512xf32, #tpu.memory_space<vmem>>, vector<8x256xf32>,
    %c0_229 = arith.constant 0 : index
    %c111_230 = arith.constant 111 : index
    %321 = vector.load %arg25[%c0_229, %c111_230] : memref<24x512xf32, #tpu.memory_space<vmem>>, vector<8x256xf32>
    %cst_231 = arith.constant 0.000000e+00 : f32
    %322 = vector.shape_cast %27 : vector<1x256xi1> to vector<1x256xi1>
    %323 = vector.broadcast %322 : vector<1x256xi1> to vector<8x256xi1>
    %324 = vector.broadcast %cst_231 : f32 to vector<8x256xf32>
    %325 = arith.select %323, %321, %324 : vector<8x256xi1>, vector<8x256xf32>
    %c0_232 = arith.constant 0 : index
    %c112_233 = arith.constant 112 : index
    %326 = vector.load %arg25[%c0_232, %c112_233] : memref<24x512xf32, #tpu.memory_space<vmem>>, vector<8x256xf32>
    %c0_234 = arith.constant 0 : index
    %c113_235 = arith.constant 113 : index
    %327 = vector.load %arg25[%c0_234, %c113_235] : memref<24x512xf32, #tpu.memory_space<vmem>>, vector<8x256xf32>
    %cst_236 = arith.constant 0.000000e+00 : f32
    %328 = vector.shape_cast %29 : vector<1x256xi1> to vector<1x256xi1>
    %329 = vector.broadcast %328 : vector<1x256xi1> to vector<8x256xi1>
    %330 = vector.broadcast %cst_236 : f32 to vector<8x256xf32>
    %331 = arith.select %329, %327, %330 : vector<8x256xi1>, vector<8x256xf32>
    %c0_237 = arith.constant 0 : index
    %c127_238 = arith.constant 127 : index
    %332 = vector.load %arg25[%c0_237, %c127_238] : memref<24x512xf32, #tpu.memory_space<vmem>>, vector<8x256xf32>
    %cst_239 = arith.constant 0.000000e+00 : f32
    %333 = vector.shape_cast %27 : vector<1x256xi1> to vector<1x256xi1>
    %334 = vector.broadcast %333 : vector<1x256xi1> to vector<8x256xi1>
    %335 = vector.broadcast %cst_239 : f32 to vector<8x256xf32>
    %336 = arith.select %334, %332, %335 : vector<8x256xi1>, vector<8x256xf32>
    %c0_240 = arith.constant 0 : index
    %c128_241 = arith.constant 128 : index
    %337 = vector.load %arg25[%c0_240, %c128_241] : memref<24x512xf32, #tpu.memory_space<vmem>>, vector<8x256xf32>
    %c0_242 = arith.constant 0 : index
    %c129_243 = arith.constant 129 : index
    %338 = vector.load %arg25[%c0_242, %c129_243] : memref<24x512xf32, #tpu.memory_space<vmem>>, vector<8x256xf32>
    %cst_244 = arith.constant 0.000000e+00 : f32
    %339 = vector.shape_cast %29 : vector<1x256xi1> to vector<1x256xi1>
    %340 = vector.broadcast %339 : vector<1x256xi1> to vector<8x256xi1>
    %341 = vector.broadcast %cst_244 : f32 to vector<8x256xf32>
    %342 = arith.select %340, %338, %341 : vector<8x256xi1>, vector<8x256xf32>
    %c0_245 = arith.constant 0 : index
    %c143_246 = arith.constant 143 : index
    %343 = vector.load %arg25[%c0_245, %c143_246] : memref<24x512xf32, #tpu.memory_space<vmem>>, vector<8x256xf32>
    %cst_247 = arith.constant 0.000000e+00 : f32
    %344 = vector.shape_cast %27 : vector<1x256xi1> to vector<1x256xi1>
    %345 = vector.broadcast %344 : vector<1x256xi1> to vector<8x256xi1>
    %346 = vector.broadcast %cst_247 : f32 to vector<8x256xf32>
    %347 = arith.select %345, %343, %346 : vector<8x256xi1>, vector<8x256xf32>
    %c0_248 = arith.constant 0 : index
    %c144_249 = arith.constant 144 : index
    %348 = vector.load %arg25[%c0_248, %c144_249] : memref<24x512xf32, #tpu.memory_space<vmem>>, vector<8x256xf32>
    %c0_250 = arith.constant 0 : index
    %c145_251 = arith.constant 145 : index
    %349 = vector.load %arg25[%c0_250, %c145_251] : memref<24x512xf32, #tpu.memory_space<vmem>>, vector<8x256xf32>
    %cst_252 = arith.constant 0.000000e+00 : f32
    %350 = vector.shape_cast %29 : vector<1x256xi1> to vector<1x256xi1>
    %351 = vector.broadcast %350 : vector<1x256xi1> to vector<8x256xi1>
    %352 = vector.broadcast %cst_252 : f32 to vector<8x256xf32>
    %353 = arith.select %351, %349, %352 : vector<8x256xi1>, vector<8x256xf32>
    %354 = tpu.concatenate %325, %326, %331, %336, %337, %342, %347, %348, %353 in 0 : vector<8x256xf32>, vector<8x256xf32>, vector<8x256xf32>, vector<8x256xf32>, vector<8x256xf32>, vector<8x256xf32>, vector<8x256xf32>, vector<8x256xf32>, vector<8x256xf32> -> vector<72x256xf32>
    %c0_253 = arith.constant 0 : index
    %c0_254 = arith.constant 0 : index
    %355 = vector.load %arg18[%c0_253, %c0_254] : memref<8x72xf32, #tpu.memory_space<vmem>>, vector<8x72xf32>
    %cst_255 = arith.constant dense<0.000000e+00> : vector<8x256xf32>
    %356 = tpu.matmul %355, %354, %cst_255 {dimension_numbers = #tpu.dot_dimension_numbers<[1], [0], [0], [1], [0, 0, 1, 1], [], []>} : vector<8x72xf32>, vector<72x256xf32>, vector<8x256xf32> -> vector<8x256xf32>
    %c0_256 = arith.constant 0 : index
    %c0_257 = arith.constant 0 : index
    %357 = vector.load %arg19[%c0_256, %c0_257] : memref<8x1xf32, #tpu.memory_space<vmem>>, vector<8x1xf32>
    %358 = vector.broadcast %357 : vector<8x1xf32> to vector<8x256xf32>
    %359 = arith.addf %356, %358 : vector<8x256xf32>
    %cst_258 = arith.constant 0.000000e+00 : f32
    %360 = vector.broadcast %cst_258 : f32 to vector<8x256xf32>
    %361 = arith.maximumf %359, %360 : vector<8x256xf32>
    %c0_259 = arith.constant 0 : index
    %c128_260 = arith.constant 128 : index
    %362 = vector.load %arg25[%c0_259, %c128_260] : memref<24x512xf32, #tpu.memory_space<vmem>>, vector<8x256xf32>
    tpu.vector_store %arg25[%c0_259, %c128_260], %361 {strides = array<i32>} : memref<24x512xf32, #tpu.memory_space<vmem>>, vector<8x256xf32>,
    %c0_261 = arith.constant 0 : index
    %c111_262 = arith.constant 111 : index
    %363 = vector.load %arg25[%c0_261, %c111_262] : memref<24x512xf32, #tpu.memory_space<vmem>>, vector<8x256xf32>
    %cst_263 = arith.constant 0.000000e+00 : f32
    %364 = vector.shape_cast %27 : vector<1x256xi1> to vector<1x256xi1>
    %365 = vector.broadcast %364 : vector<1x256xi1> to vector<8x256xi1>
    %366 = vector.broadcast %cst_263 : f32 to vector<8x256xf32>
    %367 = arith.select %365, %363, %366 : vector<8x256xi1>, vector<8x256xf32>
    %c0_264 = arith.constant 0 : index
    %c112_265 = arith.constant 112 : index
    %368 = vector.load %arg25[%c0_264, %c112_265] : memref<24x512xf32, #tpu.memory_space<vmem>>, vector<8x256xf32>
    %c0_266 = arith.constant 0 : index
    %c113_267 = arith.constant 113 : index
    %369 = vector.load %arg25[%c0_266, %c113_267] : memref<24x512xf32, #tpu.memory_space<vmem>>, vector<8x256xf32>
    %cst_268 = arith.constant 0.000000e+00 : f32
    %370 = vector.shape_cast %29 : vector<1x256xi1> to vector<1x256xi1>
    %371 = vector.broadcast %370 : vector<1x256xi1> to vector<8x256xi1>
    %372 = vector.broadcast %cst_268 : f32 to vector<8x256xf32>
    %373 = arith.select %371, %369, %372 : vector<8x256xi1>, vector<8x256xf32>
    %c0_269 = arith.constant 0 : index
    %c127_270 = arith.constant 127 : index
    %374 = vector.load %arg25[%c0_269, %c127_270] : memref<24x512xf32, #tpu.memory_space<vmem>>, vector<8x256xf32>
    %cst_271 = arith.constant 0.000000e+00 : f32
    %375 = vector.shape_cast %27 : vector<1x256xi1> to vector<1x256xi1>
    %376 = vector.broadcast %375 : vector<1x256xi1> to vector<8x256xi1>
    %377 = vector.broadcast %cst_271 : f32 to vector<8x256xf32>
    %378 = arith.select %376, %374, %377 : vector<8x256xi1>, vector<8x256xf32>
    %c0_272 = arith.constant 0 : index
    %c128_273 = arith.constant 128 : index
    %379 = vector.load %arg25[%c0_272, %c128_273] : memref<24x512xf32, #tpu.memory_space<vmem>>, vector<8x256xf32>
    %c0_274 = arith.constant 0 : index
    %c129_275 = arith.constant 129 : index
    %380 = vector.load %arg25[%c0_274, %c129_275] : memref<24x512xf32, #tpu.memory_space<vmem>>, vector<8x256xf32>
    %cst_276 = arith.constant 0.000000e+00 : f32
    %381 = vector.shape_cast %29 : vector<1x256xi1> to vector<1x256xi1>
    %382 = vector.broadcast %381 : vector<1x256xi1> to vector<8x256xi1>
    %383 = vector.broadcast %cst_276 : f32 to vector<8x256xf32>
    %384 = arith.select %382, %380, %383 : vector<8x256xi1>, vector<8x256xf32>
    %c0_277 = arith.constant 0 : index
    %c143_278 = arith.constant 143 : index
    %385 = vector.load %arg25[%c0_277, %c143_278] : memref<24x512xf32, #tpu.memory_space<vmem>>, vector<8x256xf32>
    %cst_279 = arith.constant 0.000000e+00 : f32
    %386 = vector.shape_cast %27 : vector<1x256xi1> to vector<1x256xi1>
    %387 = vector.broadcast %386 : vector<1x256xi1> to vector<8x256xi1>
    %388 = vector.broadcast %cst_279 : f32 to vector<8x256xf32>
    %389 = arith.select %387, %385, %388 : vector<8x256xi1>, vector<8x256xf32>
    %c0_280 = arith.constant 0 : index
    %c144_281 = arith.constant 144 : index
    %390 = vector.load %arg25[%c0_280, %c144_281] : memref<24x512xf32, #tpu.memory_space<vmem>>, vector<8x256xf32>
    %c0_282 = arith.constant 0 : index
    %c145_283 = arith.constant 145 : index
    %391 = vector.load %arg25[%c0_282, %c145_283] : memref<24x512xf32, #tpu.memory_space<vmem>>, vector<8x256xf32>
    %cst_284 = arith.constant 0.000000e+00 : f32
    %392 = vector.shape_cast %29 : vector<1x256xi1> to vector<1x256xi1>
    %393 = vector.broadcast %392 : vector<1x256xi1> to vector<8x256xi1>
    %394 = vector.broadcast %cst_284 : f32 to vector<8x256xf32>
    %395 = arith.select %393, %391, %394 : vector<8x256xi1>, vector<8x256xf32>
    %396 = tpu.concatenate %367, %368, %373, %378, %379, %384, %389, %390, %395 in 0 : vector<8x256xf32>, vector<8x256xf32>, vector<8x256xf32>, vector<8x256xf32>, vector<8x256xf32>, vector<8x256xf32>, vector<8x256xf32>, vector<8x256xf32>, vector<8x256xf32> -> vector<72x256xf32>
    %c0_285 = arith.constant 0 : index
    %c0_286 = arith.constant 0 : index
    %397 = vector.load %arg20[%c0_285, %c0_286] : memref<8x72xf32, #tpu.memory_space<vmem>>, vector<8x72xf32>
    %cst_287 = arith.constant dense<0.000000e+00> : vector<8x256xf32>
    %398 = tpu.matmul %397, %396, %cst_287 {dimension_numbers = #tpu.dot_dimension_numbers<[1], [0], [0], [1], [0, 0, 1, 1], [], []>} : vector<8x72xf32>, vector<72x256xf32>, vector<8x256xf32> -> vector<8x256xf32>
    %c0_288 = arith.constant 0 : index
    %c0_289 = arith.constant 0 : index
    %399 = vector.load %arg21[%c0_288, %c0_289] : memref<8x1xf32, #tpu.memory_space<vmem>>, vector<8x1xf32>
    %400 = vector.broadcast %399 : vector<8x1xf32> to vector<8x256xf32>
    %401 = arith.addf %398, %400 : vector<8x256xf32>
    %c0_290 = arith.constant 0 : index
    %c0_291 = arith.constant 0 : index
    %402 = vector.load %arg22[%c0_290, %c0_291] : memref<3x8xf32, #tpu.memory_space<vmem>>, vector<3x8xf32>
    %cst_292 = arith.constant dense<0.000000e+00> : vector<3x256xf32>
    %403 = tpu.matmul %402, %401, %cst_292 {dimension_numbers = #tpu.dot_dimension_numbers<[1], [0], [0], [1], [0, 0, 1, 1], [], []>} : vector<3x8xf32>, vector<8x256xf32>, vector<3x256xf32> -> vector<3x256xf32>
    %c0_293 = arith.constant 0 : index
    %c0_294 = arith.constant 0 : index
    %404 = vector.load %arg23[%c0_293, %c0_294] : memref<3x1xf32, #tpu.memory_space<vmem>>, vector<3x1xf32>
    %405 = vector.broadcast %404 : vector<3x1xf32> to vector<3x256xf32>
    %406 = arith.addf %403, %405 : vector<3x256xf32>
    %c0_295 = arith.constant 0 : index
    %c0_296 = arith.constant 0 : index
    %c0_297 = arith.constant 0 : index
    %407 = vector.load %arg24[%c0_295, %c0_296, %c0_297] : memref<1x3x256xf32, #tpu.memory_space<vmem>>, vector<1x3x256xf32>
    %408 = vector.shape_cast %407 : vector<1x3x256xf32> to vector<3x256xf32>
    %409 = vector.shape_cast %406 : vector<3x256xf32> to vector<1x3x256xf32>
    tpu.vector_store %arg24[%c0_295, %c0_296, %c0_297], %409 {strides = array<i32>} : memref<1x3x256xf32, #tpu.memory_space<vmem>>, vector<1x3x256xf32>,
    return
  }
  func.func @transform_0(%arg0: i32) -> (i32, i32, i32) {
    %c0_i32 = arith.constant 0 : i32
    %c0_i32_0 = arith.constant 0 : i32
    %c0_i32_1 = arith.constant 0 : i32
    return %arg0, %c0_i32, %c0_i32_0 : i32, i32, i32
  }
  func.func @transform_1(%arg0: i32) -> (i32, i32, i32) {
    %c0_i32 = arith.constant 0 : i32
    %c0_i32_0 = arith.constant 0 : i32
    %c0_i32_1 = arith.constant 0 : i32
    return %arg0, %c0_i32, %c0_i32_0 : i32, i32, i32
  }
  func.func @transform_2(%arg0: i32) -> (i32, i32) {
    %c0_i32 = arith.constant 0 : i32
    %c0_i32_0 = arith.constant 0 : i32
    %c0_i32_1 = arith.constant 0 : i32
    return %c0_i32, %c0_i32_0 : i32, i32
  }
  func.func @transform_3(%arg0: i32) -> (i32, i32) {
    %c0_i32 = arith.constant 0 : i32
    %c0_i32_0 = arith.constant 0 : i32
    %c0_i32_1 = arith.constant 0 : i32
    return %c0_i32, %c0_i32_0 : i32, i32
  }
  func.func @transform_4(%arg0: i32) -> (i32, i32) {
    %c0_i32 = arith.constant 0 : i32
    %c0_i32_0 = arith.constant 0 : i32
    %c0_i32_1 = arith.constant 0 : i32
    return %c0_i32, %c0_i32_0 : i32, i32
  }
  func.func @transform_5(%arg0: i32) -> (i32, i32) {
    %c0_i32 = arith.constant 0 : i32
    %c0_i32_0 = arith.constant 0 : i32
    %c0_i32_1 = arith.constant 0 : i32
    return %c0_i32, %c0_i32_0 : i32, i32
  }
  func.func @transform_6(%arg0: i32) -> (i32, i32) {
    %c0_i32 = arith.constant 0 : i32
    %c0_i32_0 = arith.constant 0 : i32
    %c0_i32_1 = arith.constant 0 : i32
    return %c0_i32, %c0_i32_0 : i32, i32
  }
  func.func @transform_7(%arg0: i32) -> (i32, i32) {
    %c0_i32 = arith.constant 0 : i32
    %c0_i32_0 = arith.constant 0 : i32
    %c0_i32_1 = arith.constant 0 : i32
    return %c0_i32, %c0_i32_0 : i32, i32
  }
  func.func @transform_8(%arg0: i32) -> (i32, i32) {
    %c0_i32 = arith.constant 0 : i32
    %c0_i32_0 = arith.constant 0 : i32
    %c0_i32_1 = arith.constant 0 : i32
    return %c0_i32, %c0_i32_0 : i32, i32
  }
  func.func @transform_9(%arg0: i32) -> (i32, i32) {
    %c0_i32 = arith.constant 0 : i32
    %c0_i32_0 = arith.constant 0 : i32
    %c0_i32_1 = arith.constant 0 : i32
    return %c0_i32, %c0_i32_0 : i32, i32
  }
  func.func @transform_10(%arg0: i32) -> (i32, i32) {
    %c0_i32 = arith.constant 0 : i32
    %c0_i32_0 = arith.constant 0 : i32
    %c0_i32_1 = arith.constant 0 : i32
    return %c0_i32, %c0_i32_0 : i32, i32
  }
  func.func @transform_11(%arg0: i32) -> (i32, i32) {
    %c0_i32 = arith.constant 0 : i32
    %c0_i32_0 = arith.constant 0 : i32
    %c0_i32_1 = arith.constant 0 : i32
    return %c0_i32, %c0_i32_0 : i32, i32
  }
  func.func @transform_12(%arg0: i32) -> (i32, i32) {
    %c0_i32 = arith.constant 0 : i32
    %c0_i32_0 = arith.constant 0 : i32
    %c0_i32_1 = arith.constant 0 : i32
    return %c0_i32, %c0_i32_0 : i32, i32
  }
  func.func @transform_13(%arg0: i32) -> (i32, i32) {
    %c0_i32 = arith.constant 0 : i32
    %c0_i32_0 = arith.constant 0 : i32
    %c0_i32_1 = arith.constant 0 : i32
    return %c0_i32, %c0_i32_0 : i32, i32
  }
  func.func @transform_14(%arg0: i32) -> (i32, i32) {
    %c0_i32 = arith.constant 0 : i32
    %c0_i32_0 = arith.constant 0 : i32
    %c0_i32_1 = arith.constant 0 : i32
    return %c0_i32, %c0_i32_0 : i32, i32
  }
  func.func @transform_15(%arg0: i32) -> (i32, i32) {
    %c0_i32 = arith.constant 0 : i32
    %c0_i32_0 = arith.constant 0 : i32
    %c0_i32_1 = arith.constant 0 : i32
    return %c0_i32, %c0_i32_0 : i32, i32
  }
  func.func @transform_16(%arg0: i32) -> (i32, i32) {
    %c0_i32 = arith.constant 0 : i32
    %c0_i32_0 = arith.constant 0 : i32
    %c0_i32_1 = arith.constant 0 : i32
    return %c0_i32, %c0_i32_0 : i32, i32
  }
  func.func @transform_17(%arg0: i32) -> (i32, i32) {
    %c0_i32 = arith.constant 0 : i32
    %c0_i32_0 = arith.constant 0 : i32
    %c0_i32_1 = arith.constant 0 : i32
    return %c0_i32, %c0_i32_0 : i32, i32
  }
  func.func @transform_18(%arg0: i32) -> (i32, i32) {
    %c0_i32 = arith.constant 0 : i32
    %c0_i32_0 = arith.constant 0 : i32
    %c0_i32_1 = arith.constant 0 : i32
    return %c0_i32, %c0_i32_0 : i32, i32
  }
  func.func @transform_19(%arg0: i32) -> (i32, i32) {
    %c0_i32 = arith.constant 0 : i32
    %c0_i32_0 = arith.constant 0 : i32
    %c0_i32_1 = arith.constant 0 : i32
    return %c0_i32, %c0_i32_0 : i32, i32
  }
  func.func @transform_20(%arg0: i32) -> (i32, i32) {
    %c0_i32 = arith.constant 0 : i32
    %c0_i32_0 = arith.constant 0 : i32
    %c0_i32_1 = arith.constant 0 : i32
    return %c0_i32, %c0_i32_0 : i32, i32
  }
  func.func @transform_21(%arg0: i32) -> (i32, i32) {
    %c0_i32 = arith.constant 0 : i32
    %c0_i32_0 = arith.constant 0 : i32
    %c0_i32_1 = arith.constant 0 : i32
    return %c0_i32, %c0_i32_0 : i32, i32
  }
  func.func @transform_22(%arg0: i32) -> (i32, i32) {
    %c0_i32 = arith.constant 0 : i32
    %c0_i32_0 = arith.constant 0 : i32
    %c0_i32_1 = arith.constant 0 : i32
    return %c0_i32, %c0_i32_0 : i32, i32
  }
  func.func @transform_23(%arg0: i32) -> (i32, i32, i32) {
    %c0_i32 = arith.constant 0 : i32
    %c0_i32_0 = arith.constant 0 : i32
    %c0_i32_1 = arith.constant 0 : i32
    return %arg0, %c0_i32, %c0_i32_0 : i32, i32, i32
  }
}

</mosaic_0001>

<bundles_post_ra>
// kernel: a_call__.1
= control target key start
LH: loop header
LB: loop body
LE: loop exit
PB: predicated region body
PF: predicated region fallthrough
CT: control target
= control target key end

     0   :  { %s4303_s0 = inlined_call_operand.vmem [shape: f32[2,16,64], index: 0, kind: input, shape index: {}]   ;;  %s4304_s1 = inlined_call_operand.vmem [shape: f32[2,8,256], index: 1, kind: input, shape index: {}]   ;;  %s4305_s2 = inlined_call_operand.vmem [shape: f32[64,256], index: 2, kind: input, shape index: {}]   ;;  %s4306_s3 = inlined_call_operand.vmem [shape: f32[8,216], index: 3, kind: input, shape index: {}]   ;;  %s4307_s4 = inlined_call_operand.vmem [shape: f32[8,1], index: 4, kind: input, shape index: {}]   ;;  %s4308_s5 = inlined_call_operand.vmem [shape: f32[8,72], index: 5, kind: input, shape index: {}]   ;;  %s4309_s6 = inlined_call_operand.vmem [shape: f32[8,1], index: 6, kind: input, shape index: {}]   ;;  %s4310_s7 = inlined_call_operand.vmem [shape: f32[8,72], index: 7, kind: input, shape index: {}]   ;;  %s4311_s8 = inlined_call_operand.vmem [shape: f32[8,1], index: 8, kind: input, shape index: {}]   ;;  %s4312_s9 = inlined_call_operand.vmem [shape: f32[8,72], index: 9, kind: input, shape index: {}]   ;;  %s4313_s10 = inlined_call_operand.vmem [shape: f32[8,1], index: 10, kind: input, shape index: {}]   ;;  %s4314_s11 = inlined_call_operand.vmem [shape: f32[8,72], index: 11, kind: input, shape index: {}]   ;;  %s4315_s12 = inlined_call_operand.vmem [shape: f32[8,1], index: 12, kind: input, shape index: {}]   ;;  %s4316_s13 = inlined_call_operand.vmem [shape: f32[8,72], index: 13, kind: input, shape index: {}]   ;;  %s4317_s14 = inlined_call_operand.vmem [shape: f32[8,1], index: 14, kind: input, shape index: {}]   ;;  %s4318_s15 = inlined_call_operand.vmem [shape: f32[8,72], index: 15, kind: input, shape index: {}]   ;;  %s4319_s16 = inlined_call_operand.vmem [shape: f32[8,1], index: 16, kind: input, shape index: {}]   ;;  %s4320_s17 = inlined_call_operand.vmem [shape: f32[8,72], index: 17, kind: input, shape index: {}]   ;;  %s4321_s18 = inlined_call_operand.vmem [shape: f32[8,1], index: 18, kind: input, shape index: {}]   ;;  %s4322_s19 = inlined_call_operand.vmem [shape: f32[8,72], index: 19, kind: input, shape index: {}]   ;;  %s4323_s20 = inlined_call_operand.vmem [shape: f32[8,1], index: 20, kind: input, shape index: {}]   ;;  %s4324_s21 = inlined_call_operand.vmem [shape: f32[3,8], index: 21, kind: input, shape index: {}]   ;;  %s4325_s22 = inlined_call_operand.vmem [shape: f32[3,1], index: 22, kind: input, shape index: {}]   ;;  %s4326_s23 = inlined_call_operand.vmem [shape: f32[2,3,256], index: 23, kind: output, shape index: {}]  }
   0x1   :  { %4332 = sst [smem:[#allocation4_spill]] %s4303_s0 }
   0x2   :  { %4333 = sst [smem:[#allocation5_spill]] %s4304_s1 }
   0x3   :  { %4334 = sst [smem:[#allocation6_spill]] %s4305_s2 }
   0x4   :  { %4335 = sst [smem:[#allocation7_spill]] %s4306_s3 }
   0x5   :  { %4336 = sst [smem:[#allocation8_spill]] %s4307_s4  ;;  %s3108_s4 = smov 0  }
   0x6   :  { %4337 = sst [smem:[#allocation9_spill]] %s4308_s5 }
   0x7   :  { %4338 = sst [smem:[#allocation10_spill]] %s4309_s6 }
   0x8   :  { %4339 = sst [smem:[#allocation11_spill]] %s4310_s7 }
   0x9 LB: > { %4340 = sst [smem:[#allocation3_spill]] %s2976_s4  ;;  %s2627_s30 = sadd.s32 4294967295, %s2976_s4   ;;  %s2976_s4 = sphi %s3108_s4, %s33_s4  }
   0xa   : > { %p2631_p0 = scmp.ge.s32.totalorder %s2976_s4, 1  ;;  %p647_p1 = scmp.lt.s32.totalorder %s2976_s4, 3 }
   0xc   : > { %p648_p2 = pnand %p2631_p0, %p647_p1 }
   0xd   : > { %s4341_s5 = sld [smem:[#allocation6_spill]] (!%p648_p2)  ;;  %p716_p3 = scmp.lt.s32.totalorder (!%p648_p2), %s2627_s30, 1 }
   0xe   : > { %651 = sbr.rel (%p648_p2) target bundleno = 2968 (0xb98), region = 112  ;;  %s4329_s24 = smov (!%p648_p2), 127  }
   0xf   : > { %s4342_s3 = sld [smem:[#allocation5_spill]] (!%p648_p2)  ;;  %s2980_s27 = smov (!%p648_p2), 1  }
  0x10   : > { %s2983_s7 = smov (!%p648_p2), 16   ;;  %s2984_s28 = smov (!%p648_p2), 113  }
  0x11   : > { %s2985_s29 = smov (!%p648_p2), 112   ;;  %s4353_s26 = sld [smem:[#allocation8_spill]] (!%p648_p2) }
  0x12   : > { %s4355_s1 = sld [smem:[#allocation10_spill]] (!%p648_p2) }
  0x13   : > { %v747_v0 = vld [vmem:[%s4341_s5 + $0x70] sm:$0xff]  ;;  %v748_v1 = vld [vmem:[%s4341_s5 + $0x78] sm:$0xff]  ;;  %v745_v2 = vld [vmem:[%s4341_s5 + $0x60] sm:$0xff]  ;;  %s4360_s30 = smov (!%p716_p3, %s2627_s30), 1  ;;  %v2978_v6 = vmov 0.0   ;;  %vm749_vm0 = vcmask 523264   ;;  %v816_v31 = vlaneseq }
  0x14   : > { %764 = vmatpush.msra.mxu0 %v747_v0  ;;  %787 = vmatpush.msra.mxu1 %v748_v1  ;;  %v746_v3 = vld [vmem:[%s4341_s5 + $0x68] sm:$0xff]  ;;  %v743_v4 = vld [vmem:[%s4341_s5 + $0x50] sm:$0xff]  ;;  %v744_v5 = vld [vmem:[%s4341_s5 + $0x58] sm:$0xff]  ;;  %s2796_s6 = sshll.u32 %s4360_s30, 4  ;;  %vm1100_vm1 = vcmask 908288   ;;  %vm1026_vm4 = vcmask 1039360  }
  0x15   : > { %1012 = vrot.lane.b32.xlu0 %v2978_v6, %s4329_s24  ;;  %v741_v7 = vld [vmem:[%s4341_s5 + $0x40] sm:$0xff]  ;;  %v742_v8 = vld [vmem:[%s4341_s5 + $0x48] sm:$0xff]  ;;  %v739_v9 = vld [vmem:[%s4341_s5 + $0x30] sm:$0xff]  ;;  %s725_s0 = scalar_lea.vmem %s4342_s3, %s2796_s6  ;;  %s2982_s24 = smov 15   ;;  %v3267_v32 = vand.u32 127, %v816_v31  ;;  %vm971_vm5 = vcmask 7168  }
  0x16   : > { %765 = vmatpush.msra.mxu0 %v745_v2  ;;  %788 = vmatpush.msra.mxu1 %v746_v3  ;;  %v740_v10 = vld [vmem:[%s4341_s5 + $0x38] sm:$0xff]  ;;  %v3154_v11 = vld [vmem:[%s725_s0] sm:$0xff]  ;;  %v3156_v12 = vld [vmem:[%s725_s0 + $0x8] sm:$0xff]  ;;  %s4343_s0 = sld [smem:[#allocation4_spill]]  ;;  %s2986_s3 = smov 17   ;;  %vm934_vm8 = vcmask 121856  }
  0x17   : > { %v737_v13 = vld [vmem:[%s4341_s5 + $0x20] sm:$0xff]  ;;  %v738_v14 = vld [vmem:[%s4341_s5 + $0x28] sm:$0xff]  ;;  %967 = vrot.lane.b32.xlu1 %v3154_v11, %s2980_s27  ;;  %969 = vrot.lane.b32.xlu2 %v3156_v12, %s2980_s27  ;;  %v2837_v21 = vpack.i.bf16 %v3156_v12, %v3154_v11  ;;  %v2832_v22 = vpack.i.bf16 0.0, %v3156_v12  ;;  %v3273_v36 = vadd.s32 128, %v3267_v32  ;;  %v823_v37 = vand.u32 15, %v3267_v32  ;;  %s4356_s4 = sld [smem:[#allocation9_spill]] }
  0x18   : > { %766 = vmatpush.msra.mxu0 %v743_v4  ;;  %789 = vmatpush.msra.mxu1 %v744_v5  ;;  %v735_v15 = vld [vmem:[%s4341_s5 + $0x10] sm:$0xff]  ;;  %v736_v16 = vld [vmem:[%s4341_s5 + $0x18] sm:$0xff]  ;;  %v733_v17 = vld [vmem:[%s4341_s5] sm:$0xff]  ;;  %vm1168_vm9 = vcmask 916480   ;;  %vm1137_vm10 = vcmask 130048   ;;  %vm1063_vm11 = vcmask 924672  }
  0x19   : > { %v734_v18 = vld [vmem:[%s4341_s5 + $0x8] sm:$0xff]  ;;  %v830_v38 = vand.u32 15, %v3273_v36  ;;  %vm3285_vm2 = vcmp.le.s32.totalorder %v823_v37, 14  ;;  %vm3402_vm7 = vcmp.ge.s32.totalorder %v823_v37, 1  ;;  %vm893_vm12 = vcmask 138240  }
  0x1a   : > { %767 = vmatpush.msra.mxu0 %v741_v7  ;;  %790 = vmatpush.msra.mxu1 %v742_v8  ;;  %vm1189_vm13 = vcmask 719872   ;;  %vm1384_vm14 = vcmask 588800   ;;  %vm2509_vm15 = vcmask 64512  }
  0x1b   : > { %vm3292_vm3 = vcmp.le.s32.totalorder %v830_v38, 14  ;;  %vm3393_vm6 = vcmp.ge.s32.totalorder %v830_v38, 1 }
  0x1c   : > { %768 = vmatpush.msra.mxu0 %v739_v9  ;;  %791 = vmatpush.msra.mxu1 %v740_v10  ;;  %s720_s25 = scalar_lea.vmem %s4343_s0, %s2796_s6  ;;  %s2981_s6 = smov 111  }
  0x1d   : > { %2818 = vrot.lane.b32.xlu0 %v2978_v6, %s2980_s27  ;;  %v731_v19 = vld [vmem:[%s720_s25] sm:$0xff]  ;;  %v732_v20 = vld [vmem:[%s720_s25 + $0x8] sm:$0xff]  ;;  %s4344_s0 = smov 127   ;;  %s4354_s25 = sld [smem:[#allocation7_spill]] }
  0x1e   : > { %769 = vmatpush.msra.mxu0 %v737_v13  ;;  %792 = vmatpush.msra.mxu1 %v738_v14 }
  0x1f   : > { %1096 = vrot.lane.b32.xlu1 %v3156_v12, %s2981_s6  ;;  %2823 = vrot.lane.b32.xlu2 %v2978_v6, %s2981_s6 }
  0x20   : > { %770 = vmatpush.msra.mxu0 %v735_v15  ;;  %793 = vmatpush.msra.mxu1 %v736_v16 }
  0x22   : > { %771 = vmatpush.msra.mxu0 %v733_v17  ;;  %794 = vmatpush.msra.mxu1 %v734_v18 }
  0x23   : > { %2638 = vmatmul.msk.f32.vlgmr.msra.gmra.mxu0 %vm749_vm0, %v731_v19  ;;  %2640 = vmatmul.msk.f32.vlgmr.msra.gmra.mxu1 %vm749_vm0, %v731_v19 }
  0x25   : > { %930 = vrot.lane.b32.xlu0 %v3154_v11, %s2982_s24 }
  0x27   : > { %932 = vrot.lane.b32.xlu1 %v3156_v12, %s2982_s24  ;;  %953 = vrot.lane.b32.xlu2 %v2978_v6, %s2980_s27 }
  0x2b   : > { %2639 = vmatmul.msk.f32.gmra.mxu0 %vm749_vm0, %v732_v20  ;;  %2641 = vmatmul.msk.f32.gmra.mxu1 %vm749_vm0, %v732_v20  ;;  %vm2556_vm0 = vcmask 1043456  }
  0x2d   : > { %2838 = vrot.lane.b32.xlu0 %v2837_v21, %s2983_s7 }
  0x2f   : > { %1086 = vrot.lane.b32.xlu1 %v2978_v6, %s2981_s6  ;;  %1094 = vrot.lane.b32.xlu2 %v3154_v11, %s2981_s6 }
  0x35   : > { %1059 = vrot.lane.b32.xlu0 %v3156_v12, %s2984_s28 }
  0x37   : > { %2833 = vrot.lane.b32.xlu1 %v2832_v22, %s2985_s29  ;;  %2828 = vrot.lane.b32.xlu2 %v2978_v6, %s2982_s24 }
  0x3d   : > { %2848 = vrot.lane.b32.xlu0 %v2978_v6, %s2983_s7 }
  0x3f   : > { %2843 = vrot.lane.b32.xlu1 %v2978_v6, %s2984_s28  ;;  %916 = vrot.lane.b32.xlu2 %v2978_v6, %s2982_s24 }
  0x45   : > { %1057 = vrot.lane.b32.xlu0 %v3154_v11, %s2984_s28 }
  0x47   : > { %889 = vrot.lane.b32.xlu1 %v3154_v11, %s2986_s3  ;;  %891 = vrot.lane.b32.xlu2 %v3156_v12, %s2986_s3 }
  0x4d   : > { %2858 = vrot.lane.b32.xlu0 %v2978_v6, %s4344_s0 }
  0x4f   : > { %1119 = vrot.lane.b32.xlu1 %v2978_v6, %s2983_s7  ;;  %1049 = vrot.lane.b32.xlu2 %v2978_v6, %s2984_s28 }
  0x57   : > { %2853 = vrot.lane.b32.xlu1 %v2978_v6, %s2986_s3  ;;  %1022 = vrot.lane.b32.xlu2 %v3156_v12, %s4344_s0 }
  0x71   : > { %v3238_v25 = vpop.permute.xlu2 %969 }
  0x79   : > { %v3248_v26 = vpop.permute.xlu2 %2823 }
  0x7a   : > { %v2825_v34 = vunpack.i.l.bf16 %v3248_v26 }
  0x81   : > { %v3257_v28 = vpop.permute.xlu2 %953 }
  0x87   : > { %v1013_v44 = vpop.permute.xlu0 %1012 }
  0x89   : > { %v3260_v30 = vpop.permute.xlu1 %967  ;;  %v1095_v35 = vpop.permute.xlu2 %1094 }
  0x8a   : > { %v977_v19 = vsel %vm971_vm5, %v3260_v30, %v3238_v25  ;;  %v2826_v25 = vunpack.i.h.bf16 %v3248_v26 }
  0x8f   : > { %v3309_v48 = vpop.permute.xlu0 %2818 }
  0x90   : > { %v2820_v15 = vunpack.i.l.bf16 %v3309_v48  ;;  %v2821_v20 = vunpack.i.h.bf16 %v3309_v48 }
  0x91   : > { %v1097_v39 = vpop.permute.xlu1 %1096  ;;  %v3303_v46 = vpop.permute.xlu2 %2828 }
  0x92   : > { %v1105_v41 = vsel %vm1100_vm1, %v1095_v35, %v1097_v39  ;;  %v1106_v43 = vsel %vm1100_vm1, %v1097_v39, %v2825_v34  ;;  %v976_v21 = vsel %vm971_vm5, %v2820_v15, %v3260_v30  ;;  %v2830_v22 = vunpack.i.l.bf16 %v3303_v46 }
  0x93   : > { %2652 = vmatpush.msk.msra.mxu3 %vm3285_vm2, %v1105_v41  ;;  %2671 = vmatpush.msk.msrb.mxu1 %vm3292_vm3, %v1106_v43  ;;  %v2831_v48 = vunpack.i.h.bf16 %v3303_v46 }
  0x97   : > { %v3319_v52 = vpop.permute.xlu0 %930 }
  0x98   : > { %v939_v30 = vsel %vm934_vm8, %v2830_v22, %v3319_v52 }
  0x99   : > { %v3311_v49 = vpop.permute.xlu1 %932  ;;  %v3317_v50 = vpop.permute.xlu2 %916 }
  0x9f   : > { %v3335_v56 = vpop.permute.xlu0 %2838 }
  0xa0   : > { %v3230_v23 = vpop.f32.mrf.mxu0  ;;  %v3232_v24 = vpop.f32.mrf.mxu1 }
  0xa1   : > { %957 = vrot.lane.b32.xlu2 %v3232_v24, %s2980_s27  ;;  %1010 = vrot.lane.b32.xlu0 %v3232_v24, %s4344_s0  ;;  %v2867_v27 = vpack.i.bf16 %v3232_v24, %v3230_v23  ;;  %v2862_v29 = vpack.i.bf16 0.0, %v3232_v24  ;;  %v3326_v53 = vpop.permute.xlu1 %1086  ;;  %v3328_v54 = vpop.permute.xlu2 %891 }
  0xa2   : > { %1008 = vrot.lane.b32.xlu1 %v3230_v23, %s4344_s0 }
  0xa7   : > { %v3346_v59 = vpop.permute.xlu0 %1059 }
  0xa8   : > { %v3269_v33 = vpop.f32.mrf.mxu0  ;;  %v799_v45 = vpop.f32.mrf.mxu1 }
  0xa9   : > { %1084 = vrot.lane.b32.xlu0 %v3232_v24, %s2981_s6  ;;  %1082 = vrot.lane.b32.xlu2 %v3230_v23, %s2981_s6  ;;  %v2882_v47 = vpack.i.bf16 %v3269_v33, %v3154_v11  ;;  %v2872_v51 = vpack.i.bf16 0.0, %v799_v45  ;;  %v2877_v55 = vpack.i.bf16 %v799_v45, %v3269_v33  ;;  %v3337_v57 = vpop.permute.xlu1 %2833  ;;  %v3339_v58 = vpop.permute.xlu2 %1049 }
  0xaa   : > { %955 = vrot.lane.b32.xlu1 %v3230_v23, %s2980_s27  ;;  %v2836_v31 = vunpack.i.h.bf16 %v3337_v57  ;;  %v2835_v32 = vunpack.i.l.bf16 %v3337_v57 }
  0xac   : > { %v1174_v34 = vsel %vm1168_vm9, %v2835_v32, %v2836_v31 }
  0xaf   : > { %v3355_v62 = vpop.permute.xlu0 %2848 }
  0xb0   : > { %v2851_v31 = vunpack.i.h.bf16 %v3355_v62 }
  0xb1   : > { %2868 = vrot.lane.b32.xlu2 %v2867_v27, %s2983_s7  ;;  %918 = vrot.lane.b32.xlu0 %v3230_v23, %s2982_s24  ;;  %v3348_v60 = vpop.permute.xlu1 %2843  ;;  %v3351_v61 = vpop.permute.xlu2 %1022 }
  0xb2   : > { %920 = vrot.lane.b32.xlu1 %v3232_v24, %s2982_s24 }
  0xb7   : > { %v3363_v1 = vpop.permute.xlu0 %1057 }
  0xb9   : > { %877 = vrot.lane.b32.xlu2 %v3230_v23, %s2986_s3  ;;  %879 = vrot.lane.b32.xlu0 %v3232_v24, %s2986_s3  ;;  %v3357_v63 = vpop.permute.xlu1 %889 }
  0xba   : > { %2863 = vrot.lane.b32.xlu1 %v2862_v29, %s2985_s29 }
  0xbf   : > { %v3371_v4 = vpop.permute.xlu0 %2858 }
  0xc1   : > { %1045 = vrot.lane.b32.xlu0 %v3230_v23, %s2984_s28  ;;  %961 = vrot.lane.b32.xlu2 %v3269_v33, %s2980_s27  ;;  %v3367_v2 = vpop.permute.xlu1 %1119 }
  0xc2   : > { %1150 = vrot.lane.b32.xlu1 %v3230_v23, %s2985_s29 }
  0xc9   : > { %963 = vrot.lane.b32.xlu0 %v799_v45, %s2980_s27  ;;  %1090 = vrot.lane.b32.xlu2 %v799_v45, %s2981_s6  ;;  %v3377_v7 = vpop.permute.xlu1 %2853 }
  0xca   : > { %1047 = vrot.lane.b32.xlu1 %v3232_v24, %s2984_s28 }
  0xd1   : > { %924 = vrot.lane.b32.xlu0 %v3269_v33, %s2982_s24  ;;  %2883 = vrot.lane.b32.xlu2 %v2882_v47, %s2985_s29  ;;  %v940_v47 = vsel %vm934_vm8, %v3319_v52, %v3311_v49 }
  0xd2   : > { %926 = vrot.lane.b32.xlu1 %v799_v45, %s2982_s24 }
  0xd9   : > { %1088 = vrot.lane.b32.xlu0 %v3269_v33, %s2981_s6  ;;  %883 = vrot.lane.b32.xlu2 %v3269_v33, %s2986_s3 }
  0xda   : > { %2873 = vrot.lane.b32.xlu1 %v2872_v51, %s2985_s29 }
  0xe1   : > { %2878 = vrot.lane.b32.xlu0 %v2877_v55, %s2983_s7  ;;  %1016 = vrot.lane.b32.xlu2 %v799_v45, %s4344_s0  ;;  %v2850_v55 = vunpack.i.l.bf16 %v3355_v62 }
  0xe2   : > { %1051 = vrot.lane.b32.xlu1 %v3269_v33, %s2984_s28 }
  0xe9   : > { %1053 = vrot.lane.b32.xlu0 %v799_v45, %s2984_s28  ;;  %1020 = vrot.lane.b32.xlu2 %v3154_v11, %s4344_s0 }
  0xea   : > { %875 = vrot.lane.b32.xlu1 %v2978_v6, %s2986_s3 }
  0xf1   : > { %885 = vrot.lane.b32.xlu0 %v799_v45, %s2986_s3  ;;  %1325 = vrot.lane.b32.xlu2 %v2978_v6, %s4344_s0 }
  0xf9   : > { %1014 = vrot.lane.b32.xlu0 %v3269_v33, %s4344_s0 }
  0xfb   : > { %v3361_v0 = vpop.permute.xlu2 %957 }
 0x101   : > { %1349 = vrot.lane.b32.xlu0 %v2978_v6, %s2981_s6 }
 0x103   : > { %v3369_v3 = vpop.permute.xlu2 %1082 }
 0x109   : > { %1337 = vrot.lane.b32.xlu0 %v2978_v6, %s2984_s28 }
 0x10b   : > { %v3375_v5 = vpop.permute.xlu2 %2868 }
 0x10c   : > { %v2871_v62 = vunpack.i.h.bf16 %v3375_v5 }
 0x113   : > { %v1011_v8 = vpop.permute.xlu0 %1010  ;;  %v3379_v9 = vpop.permute.xlu2 %877 }
 0x114   : > { %v1009_v10 = vpop.permute.xlu1 %1008  ;;  %v1028_v13 = vsel %vm1026_vm4, %v1011_v8, %v1013_v44 }
 0x115   : > { %v1027_v14 = vsel %vm1026_vm4, %v1009_v10, %v1011_v8  ;;  %2661 = vmatpush.msk.msrb.mxu0 %vm3292_vm3, %v1028_v13  ;;  %v2841_v8 = vunpack.i.h.bf16 %v3335_v56 }
 0x116   : > { %2642 = vmatpush.msk.msra.mxu2 %vm3285_vm2, %v1027_v14 }
 0x117   : > { %1234 = vmatpush.msrb.mxu0 %v3156_v12 }
 0x118   : > { %1194 = vmatpush.msra.mxu2 %v3154_v11 }
 0x119   : > { %1235 = vmatpush.msrb.mxu0 %v799_v45 }
 0x11a   : > { %1195 = vmatpush.msra.mxu2 %v3269_v33 }
 0x11b   : > { %v3397_v17 = vpop.permute.xlu0 %1084  ;;  %1236 = vmatpush.msrb.mxu0 %v3232_v24  ;;  %v962_v18 = vpop.permute.xlu2 %961 }
 0x11c   : > { %v956_v12 = vpop.permute.xlu1 %955  ;;  %1196 = vmatpush.msra.mxu2 %v3230_v23  ;;  %v974_v24 = vsel %vm971_vm5, %v2821_v20, %v962_v18  ;;  %v1102_v26 = vsel %vm1100_vm1, %v3397_v17, %v3326_v53  ;;  %v2840_v53 = vunpack.i.l.bf16 %v3335_v56  ;;  %v1101_v22 = vsel %vm1100_vm1, %v3369_v3, %v3397_v17 }
 0x11d   : > { %2662 = vmatpush.msk.msrb.mxu0 %vm3393_vm6, %v977_v19  ;;  %v972_v23 = vsel %vm971_vm5, %v3257_v28, %v956_v12  ;;  %v973_v44 = vsel %vm971_vm5, %v956_v12, %v3361_v0 }
 0x11e   : > { %2643 = vmatpush.msk.msra.mxu2 %vm3402_vm7, %v976_v21  ;;  %v1142_v56 = vsel %vm1137_vm10, %v2850_v55, %v2840_v53  ;;  %v1143_v13 = vsel %vm1137_vm10, %v2840_v53, %v2841_v8  ;;  %v2856_v53 = vunpack.i.h.bf16 %v3377_v7  ;;  %v899_v55 = vsel %vm893_vm12, %v3357_v63, %v3328_v54  ;;  %v1181_v54 = vld [vmem:[%s4354_s25] sm:$0xff] }
 0x120   : > { %2644 = vmatpush.msk.msra.mxu2 %vm3402_vm7, %v974_v24  ;;  %v1183_v24 = vld [vmem:[%s4353_s26] sm:$0xff] }
 0x122   : > { %2645 = vmatpush.msk.msra.mxu2 %vm3402_vm7, %v972_v23  ;;  %v2845_v23 = vunpack.i.l.bf16 %v3348_v60 }
 0x123   : > { %v919_v27 = vpop.permute.xlu0 %918  ;;  %v1091_v29 = vpop.permute.xlu2 %1090 }
 0x124   : > { %v921_v33 = vpop.permute.xlu1 %920  ;;  %2646 = vmatpush.msk.msra.mxu2 %vm3285_vm2, %v939_v30  ;;  %v1104_v28 = vsel %vm1100_vm1, %v1091_v29, %v2826_v25  ;;  %v935_v46 = vsel %vm934_vm8, %v3317_v50, %v919_v27 }
 0x125   : > { %2672 = vmatpush.msk.msrb.mxu1 %vm3292_vm3, %v1104_v28  ;;  %v936_v52 = vsel %vm934_vm8, %v919_v27, %v921_v33  ;;  %v2987_v27 = vmov 0  }
 0x126   : > { %2887 = vset.pattern.permute.xlu1 %v2987_v27  ;;  %2898 = vset.pattern.permute.xlu0 %v2987_v27 }
 0x127   : > { %2673 = vmatpush.msk.msrb.mxu1 %vm3292_vm3, %v1102_v26  ;;  %1186 = vperm.xlu1 %2887, %v1183_v24   ;;  %v1069_v26 = vsel %vm1063_vm11, %v3346_v59, %v2845_v23 }
 0x128   : > { %2919 = vset.pattern.permute.xlu2 %v2987_v27 }
 0x129   : > { %1261 = vmatpush.msrb.mxu1 %v1174_v34 }
 0x12b   : > { %v3441_v35 = vpop.permute.xlu0 %879  ;;  %v2884_v45 = vpop.permute.xlu2 %2883 }
 0x12c   : > { %v3443_v36 = vpop.permute.xlu1 %2863  ;;  %v2885_v15 = vunpack.i.l.bf16 %v2884_v45 }
 0x12d   : > { %v2866_v12 = vunpack.i.h.bf16 %v3443_v36  ;;  %v2865_v19 = vunpack.i.l.bf16 %v3443_v36 }
 0x12e   : > { %v1173_v30 = vsel %vm1168_vm9, %v2885_v15, %v2835_v32  ;;  %v2870_v32 = vunpack.i.l.bf16 %v3375_v5 }
 0x12f   : > { %v1170_v3 = vsel %vm1168_vm9, %v2865_v19, %v2866_v12 }
 0x130   : > { %v1138_v5 = vsel %vm1137_vm10, %v3367_v2, %v2870_v32 }
 0x133   : > { %v3445_v37 = vpop.permute.xlu0 %1045  ;;  %v3481_v10 = vpop.permute.xlu2 %883 }
 0x134   : > { %v3447_v38 = vpop.permute.xlu1 %1150 }
 0x13b   : > { %v964_v39 = vpop.permute.xlu0 %963  ;;  %v3503_v33 = vpop.permute.xlu2 %1016 }
 0x13c   : > { %v3449_v41 = vpop.permute.xlu1 %1047  ;;  %v975_v43 = vsel %vm971_vm5, %v962_v18, %v964_v39 }
 0x13d   : > { %2663 = vmatpush.msk.msrb.mxu0 %vm3393_vm6, %v975_v43  ;;  %v1169_v43 = vsel %vm1168_vm9, %v3447_v38, %v2865_v19  ;;  %v1139_v38 = vsel %vm1137_vm10, %v2870_v32, %v2871_v62 }
 0x13f   : > { %2664 = vmatpush.msk.msrb.mxu0 %vm3393_vm6, %v973_v44  ;;  %v2855_v44 = vunpack.i.l.bf16 %v3377_v7 }
 0x141   : > { %2665 = vmatpush.msk.msrb.mxu0 %vm3292_vm3, %v940_v47  ;;  %v1068_v47 = vsel %vm1063_vm11, %v3363_v1, %v3346_v59  ;;  %v898_v59 = vsel %vm893_vm12, %v2855_v44, %v3357_v63 }
 0x143   : > { %v925_v51 = vpop.permute.xlu0 %924  ;;  %v1021_v8 = vpop.permute.xlu2 %1020 }
 0x144   : > { %v927_v57 = vpop.permute.xlu1 %926  ;;  %v937_v0 = vsel %vm934_vm8, %v2831_v48, %v925_v51 }
 0x145   : > { %2647 = vmatpush.msk.msra.mxu2 %vm3285_vm2, %v937_v0  ;;  %v938_v49 = vsel %vm934_vm8, %v925_v51, %v927_v57  ;;  %v2846_v51 = vunpack.i.h.bf16 %v3348_v60  ;;  %v896_v60 = vsel %vm893_vm12, %v2856_v53, %v3481_v10  ;;  %v2860_v0 = vunpack.i.l.bf16 %v3371_v4  ;;  %v1378_v53 = vld [vmem:[%s4355_s1] sm:$0xff]  ;;  %s4357_s1 = sld [smem:[#allocation11_spill]] }
 0x146   : > { %2666 = vmatpush.msk.msrb.mxu0 %vm3292_vm3, %v938_v49  ;;  %v1064_v49 = vsel %vm1063_vm11, %v3445_v37, %v3449_v41 }
 0x147   : > { %2648 = vmatpush.msk.msra.mxu2 %vm3285_vm2, %v935_v46  ;;  %v1065_v46 = vsel %vm1063_vm11, %v3449_v41, %v3339_v58  ;;  %v1032_v37 = vsel %vm1026_vm4, %v3351_v61, %v2860_v0  ;;  %v1182_v58 = vld [vmem:[%s4354_s25 + $0x8] sm:$0xff] }
 0x148   : > { %2667 = vmatpush.msk.msrb.mxu0 %vm3292_vm3, %v936_v52  ;;  %v1031_v52 = vsel %vm1026_vm4, %v1021_v8, %v3351_v61  ;;  %v895_v61 = vsel %vm893_vm12, %v3379_v9, %v3441_v35 }
 0x149   : > { %1203 = vmatpush.msra.mxu2 %v1142_v56  ;;  %v2861_v56 = vunpack.i.h.bf16 %v3371_v4 }
 0x14a   : > { %1243 = vmatpush.msrb.mxu0 %v1143_v13 }
 0x14b   : > { %v1089_v14 = vpop.permute.xlu0 %1088  ;;  %v1030_v13 = vsel %vm1026_vm4, %v3503_v33, %v2861_v56  ;;  %v1326_v27 = vpop.permute.xlu2 %1325 }
 0x14c   : > { %v2874_v18 = vpop.permute.xlu1 %2873  ;;  %v1103_v50 = vsel %vm1100_vm1, %v1089_v14, %v1091_v29  ;;  %v2886_v29 = vunpack.i.h.bf16 %v2884_v45 }
 0x14d   : > { %v2876_v20 = vunpack.i.h.bf16 %v2874_v18  ;;  %v2875_v21 = vunpack.i.l.bf16 %v2874_v18  ;;  %2653 = vmatpush.msk.msra.mxu3 %vm3285_vm2, %v1103_v50 }
 0x14f   : > { %2654 = vmatpush.msk.msra.mxu3 %vm3285_vm2, %v1101_v22  ;;  %v1172_v25 = vsel %vm1168_vm9, %v2875_v21, %v2876_v20  ;;  %v1171_v17 = vsel %vm1168_vm9, %v2886_v29, %v2875_v21 }
 0x150   : > { %1262 = vmatpush.msrb.mxu1 %v1172_v25 }
 0x151   : > { %1221 = vmatpush.msra.mxu3 %v1173_v30 }
 0x152   : > { %1263 = vmatpush.msrb.mxu1 %v1170_v3 }
 0x153   : > { %v2879_v28 = vpop.permute.xlu0 %2878  ;;  %1222 = vmatpush.msra.mxu3 %v1171_v17 }
 0x154   : > { %v1052_v34 = vpop.permute.xlu1 %1051  ;;  %v2881_v36 = vunpack.i.h.bf16 %v2879_v28  ;;  %v2880_v39 = vunpack.i.l.bf16 %v2879_v28  ;;  %2674 = vmatpush.msk.msrb.mxu1 %vm3393_vm6, %v1069_v26 }
 0x155   : > { %1223 = vmatpush.msra.mxu3 %v1169_v43 }
 0x156   : > { %v1140_v45 = vsel %vm1137_vm10, %v2851_v31, %v2880_v39  ;;  %v1141_v48 = vsel %vm1137_vm10, %v2880_v39, %v2881_v36 }
 0x157   : > { %1204 = vmatpush.msra.mxu2 %v1140_v45  ;;  %2655 = vmatpush.msk.msra.mxu3 %vm3402_vm7, %v1068_v47 }
 0x158   : > { %1244 = vmatpush.msrb.mxu0 %v1141_v48 }
 0x159   : > { %1205 = vmatpush.msra.mxu2 %v1138_v5 }
 0x15a   : > { %1245 = vmatpush.msrb.mxu0 %v1139_v38 }
 0x15b   : > { %v1054_v1 = vpop.permute.xlu0 %1053  ;;  %2649 = vmatpush.msk.msra.mxu2 %vm3402_vm7, %v898_v59 }
 0x15c   : > { %v876_v2 = vpop.permute.xlu1 %875  ;;  %2668 = vmatpush.msk.msrb.mxu0 %vm3393_vm6, %v899_v55  ;;  %v1066_v7 = vsel %vm1063_vm11, %v1052_v34, %v1054_v1  ;;  %v1067_v57 = vsel %vm1063_vm11, %v1054_v1, %v2846_v51 }
 0x15d   : > { %2650 = vmatpush.msk.msra.mxu2 %vm3402_vm7, %v896_v60  ;;  %2656 = vmatpush.msk.msra.mxu3 %vm3402_vm7, %v1066_v7  ;;  %v894_v63 = vsel %vm893_vm12, %v876_v2, %v3379_v9 }
 0x15e   : > { %2675 = vmatpush.msk.msrb.mxu1 %vm3393_vm6, %v1067_v57 }
 0x15f   : > { %2651 = vmatpush.msk.msra.mxu2 %vm3402_vm7, %v894_v63  ;;  %2657 = vmatpush.msk.msra.mxu3 %vm3402_vm7, %v1064_v49 }
 0x160   : > { %2676 = vmatpush.msk.msrb.mxu1 %vm3393_vm6, %v1065_v46  ;;  %1209 = vmatmul.f32.vlgmr.msra.gmra.mxu2 %v1181_v54 }
 0x161   : > { %2658 = vmatpush.msk.msra.mxu3 %vm3285_vm2, %v1031_v52 }
 0x162   : > { %2677 = vmatpush.msk.msrb.mxu1 %vm3292_vm3, %v1032_v37 }
 0x163   : > { %v886_v41 = vpop.permute.xlu0 %885 }
 0x164   : > { %2678 = vmatpush.msk.msrb.mxu1 %vm3292_vm3, %v1030_v13  ;;  %v897_v4 = vsel %vm893_vm12, %v3481_v10, %v886_v41 }
 0x165   : > { %2669 = vmatpush.msk.msrb.mxu0 %vm3393_vm6, %v897_v4  ;;  %2679 = vmatmul.msk.f32.vlgmr.msrb.gmra.mxu1 %vm1189_vm13, %v1182_v58 }
 0x167   : > { %2670 = vmatpush.msk.msrb.mxu0 %vm3393_vm6, %v895_v61 }
 0x168   : > { %1249 = vmatmul.f32.vlgmr.msrb.gmra.mxu0 %v1181_v54  ;;  %v1377_v54 = vld [vmem:[%s4356_s4] sm:$0xff] }
 0x16b   : > { %v1015_v14 = vpop.permute.xlu0 %1014 }
 0x16c   : > { %v1029_v15 = vsel %vm1026_vm4, %v1015_v14, %v3503_v33 }
 0x16d   : > { %2659 = vmatpush.msk.msra.mxu3 %vm3285_vm2, %v1029_v15 }
 0x16e   : > { %2660 = vmatmul.msk.f32.vlgmr.msra.gmra.mxu3 %vm1189_vm13, %v1182_v58 }
 0x173   : > { %v1350_v29 = vpop.permute.xlu0 %1349 }
 0x17b   : > { %v1338_v28 = vpop.permute.xlu0 %1337 }
 0x199   : > { %v1187_v10 = vpop.permute.xlu1 %1186 }
 0x1e2   : > { %v1270_v50 = vpop.f32.mrf.mxu1 }
 0x1e3   : > { %v1210_v35 = vpop.f32.mrf.mxu2 }
 0x1e4   : > { %v1211_v21 = vadd.f32 %v1210_v35, %v1187_v10  ;;  %v1533_v35 = vld [vmem:[%s4311_s8] sm:$0xff] }
 0x1e5   : > { %v1250_v18 = vpop.f32.mrf.mxu0 }
 0x1e6   : > { %v1251_v12 = vadd.f32 %v1250_v18, %v1187_v10 }
 0x1e8   : > { %v1271_v19 = vadd.f32 %v1270_v50, %v1251_v12 }
 0x1ea   : > { %v1274_v20 = vmax.f32 %v1271_v19, 0.0 }
 0x1ec   : > { %1287 = vrot.lane.b32.xlu0 %v1274_v20, %s2986_s3  ;;  %1347 = vrot.lane.b32.xlu2 %v1274_v20, %s2981_s6  ;;  %v2888_v9 = vpack.i.bf16 0.0, %v1274_v20 }
 0x1ee   : > { %2889 = vrot.lane.b32.xlu1 %v2888_v9, %s2985_s29 }
 0x1f1   : > { %v1230_v22 = vpop.f32.mrf.mxu3 }
 0x1f2   : > { %v1231_v24 = vadd.f32 %v1230_v22, %v1211_v21 }
 0x1f4   : > { %v3595_v23 = vmax.f32 %v1231_v24, 0.0  ;;  %1335 = vrot.lane.b32.xlu2 %v1274_v20, %s2984_s28 }
 0x1f6   : > { %1323 = vrot.lane.b32.xlu1 %v1274_v20, %s4344_s0  ;;  %1309 = vrot.lane.b32.xlu0 %v3595_v23, %s2980_s27  ;;  %v2893_v25 = vpack.i.bf16 %v1274_v20, %v3595_v23 }
 0x1fc   : > { %1345 = vrot.lane.b32.xlu2 %v3595_v23, %s2981_s6 }
 0x1fe   : > { %1311 = vrot.lane.b32.xlu1 %v1274_v20, %s2980_s27  ;;  %1297 = vrot.lane.b32.xlu0 %v3595_v23, %s2982_s24 }
 0x204   : > { %1367 = vrot.lane.b32.xlu2 %v3595_v23, %s2985_s29 }
 0x206   : > { %1299 = vrot.lane.b32.xlu1 %v1274_v20, %s2982_s24  ;;  %1333 = vrot.lane.b32.xlu0 %v3595_v23, %s2984_s28 }
 0x20c   : > { %1285 = vrot.lane.b32.xlu2 %v3595_v23, %s2986_s3 }
 0x20e   : > { %2894 = vrot.lane.b32.xlu1 %v2893_v25, %s2983_s7  ;;  %1295 = vrot.lane.b32.xlu0 %v2978_v6, %s2982_s24 }
 0x214   : > { %1307 = vrot.lane.b32.xlu2 %v2978_v6, %s2980_s27 }
 0x216   : > { %1321 = vrot.lane.b32.xlu1 %v3595_v23, %s4344_s0  ;;  %1381 = vperm.xlu0 %2898, %v1378_v53  }
 0x21c   : > { %1283 = vrot.lane.b32.xlu2 %v2978_v6, %s2986_s3 }
 0x21e   : > { %1357 = vrot.lane.b32.xlu1 %v2978_v6, %s2983_s7  ;;  %1492 = vrot.lane.b32.xlu0 %v2978_v6, %s2984_s28 }
 0x224   : > { %1504 = vrot.lane.b32.xlu2 %v2978_v6, %s2981_s6 }
 0x22c   : > { %1480 = vrot.lane.b32.xlu2 %v2978_v6, %s4344_s0 }
 0x246   : > { %v1348_v30 = vpop.permute.xlu2 %1347 }
 0x247   : > { %v1352_v3 = vsel %vm1100_vm1, %v1348_v30, %v1350_v29 }
 0x248   : > { %2687 = vmatpush.msk.msrb.mxu2 %vm3292_vm3, %v1352_v3 }
 0x24e   : > { %v1336_v17 = vpop.permute.xlu2 %1335 }
 0x24f   : > { %v1340_v44 = vsel %vm1063_vm11, %v1336_v17, %v1338_v28 }
 0x256   : > { %v1346_v31 = vpop.permute.xlu2 %1345 }
 0x257   : > { %v1351_v33 = vsel %vm1100_vm1, %v1346_v31, %v1348_v30 }
 0x258   : > { %2680 = vmatpush.msk.msrb.mxu3 %vm3285_vm2, %v1351_v33 }
 0x25e   : > { %v1288_v26 = vpop.permute.xlu0 %1287  ;;  %v1368_v39 = vpop.permute.xlu2 %1367 }
 0x260   : > { %v2890_v32 = vpop.permute.xlu1 %2889 }
 0x261   : > { %v2892_v34 = vunpack.i.h.bf16 %v2890_v32  ;;  %v2891_v36 = vunpack.i.l.bf16 %v2890_v32 }
 0x263   : > { %v1373_v43 = vsel %vm1168_vm9, %v1368_v39, %v2891_v36  ;;  %v1374_v62 = vsel %vm1168_vm9, %v2891_v36, %v2892_v34 }
 0x264   : > { %1396 = vmatpush.msrb.mxu3 %v1373_v43  ;;  %1416 = vmatpush.msrb.mxu2 %v1374_v62 }
 0x266   : > { %2688 = vmatpush.msk.msrb.mxu2 %vm3393_vm6, %v1340_v44  ;;  %v1286_v60 = vpop.permute.xlu2 %1285 }
 0x267   : > { %v1290_v63 = vsel %vm893_vm12, %v1286_v60, %v1288_v26 }
 0x268   : > { %v1324_v45 = vpop.permute.xlu1 %1323  ;;  %v1310_v47 = vpop.permute.xlu0 %1309 }
 0x269   : > { %v1328_v48 = vsel %vm1026_vm4, %v1324_v45, %v1326_v27 }
 0x26a   : > { %2689 = vmatpush.msk.msrb.mxu2 %vm3292_vm3, %v1328_v48 }
 0x26c   : > { %1419 = vmatpush.msrb.mxu2 %v1274_v20 }
 0x26e   : > { %v1308_v49 = vpop.permute.xlu2 %1307 }
 0x26f   : > { %v1313_v37 = vsel %vm971_vm5, %v1308_v49, %v1310_v47 }
 0x270   : > { %v1312_v5 = vpop.permute.xlu1 %1311  ;;  %v1298_v38 = vpop.permute.xlu0 %1297 }
 0x271   : > { %v1314_v51 = vsel %vm971_vm5, %v1310_v47, %v1312_v5 }
 0x272   : > { %2690 = vmatpush.msk.msrb.mxu2 %vm3393_vm6, %v1314_v51  ;;  %v1532_v51 = vld [vmem:[%s4357_s1] sm:$0xff] }
 0x276   : > { %v1284_v41 = vpop.permute.xlu2 %1283 }
 0x277   : > { %v1289_v61 = vsel %vm893_vm12, %v1284_v41, %v1286_v60 }
 0x278   : > { %v1300_v59 = vpop.permute.xlu1 %1299  ;;  %v1334_v1 = vpop.permute.xlu0 %1333 }
 0x279   : > { %v1339_v55 = vsel %vm1063_vm11, %v1334_v1, %v1336_v17  ;;  %v1302_v2 = vsel %vm934_vm8, %v1298_v38, %v1300_v59 }
 0x27a   : > { %2681 = vmatpush.msk.msrb.mxu3 %vm3402_vm7, %v1339_v55  ;;  %2691 = vmatpush.msk.msrb.mxu2 %vm3292_vm3, %v1302_v2 }
 0x27e   : > { %v1505_v21 = vpop.permute.xlu2 %1504 }
 0x280   : > { %v2895_v7 = vpop.permute.xlu1 %2894  ;;  %v1296_v56 = vpop.permute.xlu0 %1295 }
 0x281   : > { %v2897_v57 = vunpack.i.h.bf16 %v2895_v7  ;;  %v2896_v0 = vunpack.i.l.bf16 %v2895_v7  ;;  %v1301_v58 = vsel %vm934_vm8, %v1296_v56, %v1298_v38 }
 0x283   : > { %v1364_v8 = vsel %vm1137_vm10, %v2896_v0, %v2897_v57 }
 0x284   : > { %1422 = vmatpush.msrb.mxu2 %v1364_v8 }
 0x286   : > { %2692 = vmatpush.msk.msrb.mxu2 %vm3393_vm6, %v1290_v63  ;;  %v1481_v22 = vpop.permute.xlu2 %1480 }
 0x287   : > { %2693 = vmatmul.msk.f32.vlgmr.msrb.gmra.mxu2 %vm1384_vm14, %v1377_v54 }
 0x288   : > { %v1322_v46 = vpop.permute.xlu1 %1321  ;;  %v1382_v14 = vpop.permute.xlu0 %1381 }
 0x289   : > { %v1327_v52 = vsel %vm1026_vm4, %v1322_v46, %v1324_v45 }
 0x28a   : > { %2682 = vmatpush.msk.msrb.mxu3 %vm3285_vm2, %v1327_v52 }
 0x28c   : > { %1399 = vmatpush.msrb.mxu3 %v3595_v23 }
 0x28e   : > { %2683 = vmatpush.msk.msrb.mxu3 %vm3402_vm7, %v1313_v37 }
 0x290   : > { %v1358_v13 = vpop.permute.xlu1 %1357  ;;  %2684 = vmatpush.msk.msrb.mxu3 %vm3285_vm2, %v1301_v58  ;;  %v1493_v25 = vpop.permute.xlu0 %1492 }
 0x291   : > { %v1363_v4 = vsel %vm1137_vm10, %v1358_v13, %v2896_v0 }
 0x292   : > { %1402 = vmatpush.msrb.mxu3 %v1363_v4 }
 0x294   : > { %2685 = vmatpush.msk.msrb.mxu3 %vm3402_vm7, %v1289_v61 }
 0x295   : > { %2686 = vmatmul.msk.f32.vlgmr.msrb.gmra.mxu3 %vm1384_vm14, %v1377_v54 }
 0x30a   : > { %v1425_v15 = vpop.f32.mrf.mxu2 }
 0x30b   : > { %v1426_v10 = vadd.f32 %v1425_v15, %v1382_v14 }
 0x30d   : > { %v1429_v18 = vmax.f32 %v1426_v10, 0.0 }
 0x30f   : > { %1454 = vrot.lane.b32.xlu0 %v1429_v18, %s2982_s24  ;;  %1490 = vrot.lane.b32.xlu2 %v1429_v18, %s2984_s28  ;;  %v2899_v50 = vpack.i.bf16 0.0, %v1429_v18 }
 0x310   : > { %1502 = vrot.lane.b32.xlu1 %v1429_v18, %s2981_s6 }
 0x318   : > { %2900 = vrot.lane.b32.xlu1 %v2899_v50, %s2985_s29  ;;  %v1405_v12 = vpop.f32.mrf.mxu3 }
 0x319   : > { %v1406_v19 = vadd.f32 %v1405_v12, %v1382_v14 }
 0x31b   : > { %v3684_v20 = vmax.f32 %v1406_v19, 0.0 }
 0x31d   : > { %1452 = vrot.lane.b32.xlu2 %v3684_v20, %s2982_s24  ;;  %1464 = vrot.lane.b32.xlu0 %v3684_v20, %s2980_s27  ;;  %v2904_v9 = vpack.i.bf16 %v1429_v18, %v3684_v20 }
 0x320   : > { %1478 = vrot.lane.b32.xlu1 %v1429_v18, %s4344_s0 }
 0x325   : > { %1440 = vrot.lane.b32.xlu2 %v3684_v20, %s2986_s3  ;;  %1442 = vrot.lane.b32.xlu0 %v1429_v18, %s2986_s3 }
 0x328   : > { %1466 = vrot.lane.b32.xlu1 %v1429_v18, %s2980_s27 }
 0x32d   : > { %1522 = vrot.lane.b32.xlu2 %v3684_v20, %s2985_s29  ;;  %1488 = vrot.lane.b32.xlu0 %v3684_v20, %s2984_s28 }
 0x330   : > { %2905 = vrot.lane.b32.xlu1 %v2904_v9, %s2983_s7 }
 0x335   : > { %1462 = vrot.lane.b32.xlu2 %v2978_v6, %s2980_s27  ;;  %1450 = vrot.lane.b32.xlu0 %v2978_v6, %s2982_s24 }
 0x338   : > { %1500 = vrot.lane.b32.xlu1 %v3684_v20, %s2981_s6 }
 0x33d   : > { %1438 = vrot.lane.b32.xlu2 %v2978_v6, %s2986_s3  ;;  %1536 = vperm.xlu0 %2898, %v1533_v35  }
 0x340   : > { %1476 = vrot.lane.b32.xlu1 %v3684_v20, %s4344_s0 }
 0x345   : > { %1656 = vrot.lane.b32.xlu2 %v2978_v6, %s2981_s6 }
 0x348   : > { %1512 = vrot.lane.b32.xlu1 %v2978_v6, %s2983_s7 }
 0x34d   : > { %1644 = vrot.lane.b32.xlu2 %v2978_v6, %s2984_s28 }
 0x350   : > { %1632 = vrot.lane.b32.xlu1 %v2978_v6, %s4344_s0 }
 0x369   : > { %v1491_v27 = vpop.permute.xlu2 %1490 }
 0x36a   : > { %v1495_v31 = vsel %vm1063_vm11, %v1491_v27, %v1493_v25 }
 0x377   : > { %v1453_v28 = vpop.permute.xlu2 %1452 }
 0x37f   : > { %v1441_v43 = vpop.permute.xlu2 %1440 }
 0x381   : > { %v1455_v33 = vpop.permute.xlu0 %1454 }
 0x382   : > { %v1503_v24 = vpop.permute.xlu1 %1502  ;;  %v1457_v62 = vsel %vm934_vm8, %v1453_v28, %v1455_v33 }
 0x383   : > { %v1507_v23 = vsel %vm1100_vm1, %v1503_v24, %v1505_v21 }
 0x384   : > { %2701 = vmatpush.msk.msra.mxu3 %vm3292_vm3, %v1507_v23 }
 0x387   : > { %v1523_v38 = vpop.permute.xlu2 %1522 }
 0x38a   : > { %v2901_v29 = vpop.permute.xlu1 %2900 }
 0x38b   : > { %v2903_v30 = vunpack.i.h.bf16 %v2901_v29  ;;  %v2902_v3 = vunpack.i.l.bf16 %v2901_v29 }
 0x38d   : > { %v1529_v17 = vsel %vm1168_vm9, %v2902_v3, %v2903_v30  ;;  %v1528_v2 = vsel %vm1168_vm9, %v1523_v38, %v2902_v3 }
 0x38e   : > { %1570 = vmatpush.msra.mxu3 %v1529_v17 }
 0x38f   : > { %v1465_v34 = vpop.permute.xlu0 %1464  ;;  %v1463_v7 = vpop.permute.xlu2 %1462 }
 0x390   : > { %2702 = vmatpush.msk.msra.mxu3 %vm3393_vm6, %v1495_v31  ;;  %v1468_v54 = vsel %vm971_vm5, %v1463_v7, %v1465_v34  ;;  %v1685_v31 = vld [vmem:[%s4313_s10] sm:$0xff] }
 0x392   : > { %v1479_v26 = vpop.permute.xlu1 %1478 }
 0x393   : > { %v1483_v32 = vsel %vm1026_vm4, %v1479_v26, %v1481_v22 }
 0x394   : > { %2703 = vmatpush.msk.msra.mxu3 %vm3292_vm3, %v1483_v32 }
 0x396   : > { %1573 = vmatpush.msra.mxu3 %v1429_v18 }
 0x397   : > { %v1443_v44 = vpop.permute.xlu0 %1442  ;;  %v1439_v49 = vpop.permute.xlu2 %1438 }
 0x398   : > { %v1445_v53 = vsel %vm893_vm12, %v1441_v43, %v1443_v44  ;;  %v1444_v56 = vsel %vm893_vm12, %v1439_v49, %v1441_v43 }
 0x39a   : > { %v1467_v36 = vpop.permute.xlu1 %1466 }
 0x39b   : > { %v1469_v39 = vsel %vm971_vm5, %v1465_v34, %v1467_v36 }
 0x39c   : > { %2704 = vmatpush.msk.msra.mxu3 %vm3393_vm6, %v1469_v39  ;;  %v1684_v39 = vld [vmem:[%s4312_s9] sm:$0xff] }
 0x39e   : > { %2705 = vmatpush.msk.msra.mxu3 %vm3292_vm3, %v1457_v62 }
 0x39f   : > { %v1489_v55 = vpop.permute.xlu0 %1488  ;;  %v1657_v15 = vpop.permute.xlu2 %1656 }
 0x3a0   : > { %v1494_v60 = vsel %vm1063_vm11, %v1489_v55, %v1491_v27 }
 0x3a2   : > { %v2906_v45 = vpop.permute.xlu1 %2905 }
 0x3a3   : > { %v2908_v47 = vunpack.i.h.bf16 %v2906_v45  ;;  %v2907_v48 = vunpack.i.l.bf16 %v2906_v45 }
 0x3a5   : > { %v1519_v5 = vsel %vm1137_vm10, %v2907_v48, %v2908_v47 }
 0x3a6   : > { %1576 = vmatpush.msra.mxu3 %v1519_v5 }
 0x3a7   : > { %v1451_v8 = vpop.permute.xlu0 %1450  ;;  %v1645_v18 = vpop.permute.xlu2 %1644 }
 0x3a8   : > { %2706 = vmatpush.msk.msra.mxu3 %vm3393_vm6, %v1445_v53  ;;  %v1456_v63 = vsel %vm934_vm8, %v1451_v8, %v1453_v28 }
 0x3a9   : > { %2707 = vmatmul.msk.f32.vlgmr.msra.gmra.mxu3 %vm1384_vm14, %v1532_v51 }
 0x3aa   : > { %v1501_v59 = vpop.permute.xlu1 %1500 }
 0x3ab   : > { %v1506_v1 = vsel %vm1100_vm1, %v1501_v59, %v1503_v24 }
 0x3ac   : > { %2694 = vmatpush.msk.msra.mxu1 %vm3285_vm2, %v1506_v1 }
 0x3ae   : > { %1550 = vmatpush.msra.mxu1 %v1528_v2 }
 0x3af   : > { %v1537_v37 = vpop.permute.xlu0 %1536 }
 0x3b0   : > { %2695 = vmatpush.msk.msra.mxu1 %vm3402_vm7, %v1494_v60 }
 0x3b2   : > { %v1477_v57 = vpop.permute.xlu1 %1476 }
 0x3b3   : > { %v1482_v0 = vsel %vm1026_vm4, %v1477_v57, %v1479_v26 }
 0x3b4   : > { %2696 = vmatpush.msk.msra.mxu1 %vm3285_vm2, %v1482_v0 }
 0x3b6   : > { %1553 = vmatpush.msra.mxu1 %v3684_v20 }
 0x3b8   : > { %2697 = vmatpush.msk.msra.mxu1 %vm3402_vm7, %v1468_v54 }
 0x3ba   : > { %v1513_v46 = vpop.permute.xlu1 %1512  ;;  %2698 = vmatpush.msk.msra.mxu1 %vm3285_vm2, %v1456_v63 }
 0x3bb   : > { %v1518_v52 = vsel %vm1137_vm10, %v1513_v46, %v2907_v48 }
 0x3bc   : > { %1556 = vmatpush.msra.mxu1 %v1518_v52 }
 0x3be   : > { %2699 = vmatpush.msk.msra.mxu1 %vm3402_vm7, %v1444_v56 }
 0x3bf   : > { %2700 = vmatmul.msk.f32.vlgmr.msra.gmra.mxu1 %vm1384_vm14, %v1532_v51 }
 0x3c2   : > { %v1633_v10 = vpop.permute.xlu1 %1632 }
 0x42c   : > { %v1579_v58 = vpop.f32.mrf.mxu3 }
 0x42d   : > { %v1580_v41 = vadd.f32 %v1579_v58, %v1537_v37  ;;  %v1839_v58 = vld [vmem:[%s4315_s12] sm:$0xff] }
 0x42f   : > { %1654 = vrot.lane.b32.xlu1 %v1580_v41, %s2981_s6  ;;  %v2909_v13 = vpack.i.bf16 0.0, %v1580_v41 }
 0x431   : > { %2910 = vrot.lane.b32.xlu0 %v2909_v13, %s2985_s29 }
 0x437   : > { %1642 = vrot.lane.b32.xlu1 %v1580_v41, %s2984_s28 }
 0x439   : > { %1630 = vrot.lane.b32.xlu0 %v1580_v41, %s4344_s0 }
 0x43c   : > { %v1559_v4 = vpop.f32.mrf.mxu1 }
 0x43d   : > { %v3772_v61 = vadd.f32 %v1559_v4, %v1537_v37 }
 0x43f   : > { %1604 = vrot.lane.b32.xlu1 %v3772_v61, %s2982_s24  ;;  %1616 = vrot.lane.b32.xlu2 %v3772_v61, %s2980_s27  ;;  %v2914_v14 = vpack.i.bf16 %v1580_v41, %v3772_v61 }
 0x441   : > { %1618 = vrot.lane.b32.xlu0 %v1580_v41, %s2980_s27 }
 0x447   : > { %1592 = vrot.lane.b32.xlu1 %v3772_v61, %s2986_s3  ;;  %1606 = vrot.lane.b32.xlu2 %v1580_v41, %s2982_s24 }
 0x449   : > { %2915 = vrot.lane.b32.xlu0 %v2914_v14, %s2983_s7 }
 0x44f   : > { %1674 = vrot.lane.b32.xlu1 %v3772_v61, %s2985_s29  ;;  %1594 = vrot.lane.b32.xlu2 %v1580_v41, %s2986_s3 }
 0x451   : > { %1652 = vrot.lane.b32.xlu0 %v3772_v61, %s2981_s6 }
 0x457   : > { %1614 = vrot.lane.b32.xlu1 %v2978_v6, %s2980_s27  ;;  %1640 = vrot.lane.b32.xlu2 %v3772_v61, %s2984_s28 }
 0x459   : > { %1628 = vrot.lane.b32.xlu0 %v3772_v61, %s4344_s0 }
 0x45f   : > { %1590 = vrot.lane.b32.xlu1 %v2978_v6, %s2986_s3  ;;  %1602 = vrot.lane.b32.xlu2 %v2978_v6, %s2982_s24 }
 0x461   : > { %1664 = vrot.lane.b32.xlu0 %v2978_v6, %s2983_s7 }
 0x467   : > { %1810 = vrot.lane.b32.xlu1 %v2978_v6, %s2981_s6  ;;  %1688 = vperm.xlu2 %2919, %v1685_v31  }
 0x469   : > { %1786 = vrot.lane.b32.xlu0 %v2978_v6, %s4344_s0 }
 0x46f   : > { %1798 = vrot.lane.b32.xlu1 %v2978_v6, %s2984_s28 }
 0x499   : > { %v1617_v21 = vpop.permute.xlu2 %1616 }
 0x4a1   : > { %v1655_v50 = vpop.permute.xlu1 %1654  ;;  %v1607_v27 = vpop.permute.xlu2 %1606 }
 0x4a2   : > { %v1659_v12 = vsel %vm1100_vm1, %v1655_v50, %v1657_v15 }
 0x4a3   : > { %v2911_v19 = vpop.permute.xlu0 %2910  ;;  %2715 = vmatpush.msk.msra.mxu2 %vm3292_vm3, %v1659_v12 }
 0x4a4   : > { %v2913_v20 = vunpack.i.h.bf16 %v2911_v19  ;;  %v2912_v9 = vunpack.i.l.bf16 %v2911_v19 }
 0x4a6   : > { %v1681_v35 = vsel %vm1168_vm9, %v2912_v9, %v2913_v20 }
 0x4a7   : > { %1722 = vmatpush.msra.mxu2 %v1681_v35 }
 0x4a9   : > { %v1643_v22 = vpop.permute.xlu1 %1642  ;;  %v1595_v28 = vpop.permute.xlu2 %1594 }
 0x4aa   : > { %v1647_v24 = vsel %vm1063_vm11, %v1643_v22, %v1645_v18 }
 0x4ab   : > { %v1631_v23 = vpop.permute.xlu0 %1630  ;;  %2716 = vmatpush.msk.msra.mxu2 %vm3393_vm6, %v1647_v24 }
 0x4ac   : > { %v1635_v25 = vsel %vm1026_vm4, %v1631_v23, %v1633_v10 }
 0x4ad   : > { %2717 = vmatpush.msk.msra.mxu2 %vm3292_vm3, %v1635_v25 }
 0x4af   : > { %1725 = vmatpush.msra.mxu2 %v1580_v41 }
 0x4b1   : > { %v1605_v29 = vpop.permute.xlu1 %1604  ;;  %v1641_v47 = vpop.permute.xlu2 %1640 }
 0x4b2   : > { %v1609_v17 = vsel %vm934_vm8, %v1605_v29, %v1607_v27  ;;  %v1646_v5 = vsel %vm1063_vm11, %v1641_v47, %v1643_v22 }
 0x4b3   : > { %v1619_v30 = vpop.permute.xlu0 %1618 }
 0x4b4   : > { %v1621_v3 = vsel %vm971_vm5, %v1617_v21, %v1619_v30 }
 0x4b5   : > { %2718 = vmatpush.msk.msra.mxu2 %vm3393_vm6, %v1621_v3 }
 0x4b7   : > { %2719 = vmatpush.msk.msra.mxu2 %vm3292_vm3, %v1609_v17 }
 0x4b9   : > { %v1593_v33 = vpop.permute.xlu1 %1592  ;;  %v1603_v59 = vpop.permute.xlu2 %1602 }
 0x4ba   : > { %v1597_v43 = vsel %vm893_vm12, %v1593_v33, %v1595_v28  ;;  %v1608_v55 = vsel %vm934_vm8, %v1603_v59, %v1605_v29 }
 0x4bb   : > { %v2916_v26 = vpop.permute.xlu0 %2915 }
 0x4bc   : > { %v2918_v32 = vunpack.i.h.bf16 %v2916_v26  ;;  %v2917_v34 = vunpack.i.l.bf16 %v2916_v26  ;;  %v1838_v26 = vld [vmem:[%s4314_s11] sm:$0xff] }
 0x4be   : > { %v1671_v36 = vsel %vm1137_vm10, %v2917_v34, %v2918_v32 }
 0x4bf   : > { %1728 = vmatpush.msra.mxu2 %v1671_v36 }
 0x4c1   : > { %v1675_v62 = vpop.permute.xlu1 %1674  ;;  %2720 = vmatpush.msk.msra.mxu2 %vm3393_vm6, %v1597_v43  ;;  %v1689_v0 = vpop.permute.xlu2 %1688 }
 0x4c2   : > { %2721 = vmatmul.msk.f32.vlgmr.msra.gmra.mxu2 %vm1384_vm14, %v1684_v39  ;;  %v1680_v48 = vsel %vm1168_vm9, %v1675_v62, %v2912_v9 }
 0x4c3   : > { %v1653_v44 = vpop.permute.xlu0 %1652 }
 0x4c4   : > { %v1658_v45 = vsel %vm1100_vm1, %v1653_v44, %v1655_v50 }
 0x4c5   : > { %2708 = vmatpush.msk.msra.mxu0 %vm3285_vm2, %v1658_v45 }
 0x4c7   : > { %1702 = vmatpush.msra.mxu0 %v1680_v48 }
 0x4c9   : > { %v1615_v38 = vpop.permute.xlu1 %1614  ;;  %2709 = vmatpush.msk.msra.mxu0 %vm3402_vm7, %v1646_v5 }
 0x4ca   : > { %v1620_v1 = vsel %vm971_vm5, %v1615_v38, %v1617_v21 }
 0x4cb   : > { %v1629_v51 = vpop.permute.xlu0 %1628 }
 0x4cc   : > { %v1634_v53 = vsel %vm1026_vm4, %v1629_v51, %v1631_v23 }
 0x4cd   : > { %2710 = vmatpush.msk.msra.mxu0 %vm3285_vm2, %v1634_v53 }
 0x4cf   : > { %1705 = vmatpush.msra.mxu0 %v3772_v61 }
 0x4d1   : > { %2711 = vmatpush.msk.msra.mxu0 %vm3402_vm7, %v1620_v1  ;;  %v1591_v2 = vpop.permute.xlu1 %1590 }
 0x4d2   : > { %v1596_v57 = vsel %vm893_vm12, %v1591_v2, %v1593_v33 }
 0x4d3   : > { %v1665_v60 = vpop.permute.xlu0 %1664  ;;  %2712 = vmatpush.msk.msra.mxu0 %vm3285_vm2, %v1608_v55 }
 0x4d4   : > { %v1670_v7 = vsel %vm1137_vm10, %v1665_v60, %v2917_v34 }
 0x4d5   : > { %1708 = vmatpush.msra.mxu0 %v1670_v7 }
 0x4d7   : > { %2713 = vmatpush.msk.msra.mxu0 %vm3402_vm7, %v1596_v57 }
 0x4d8   : > { %2714 = vmatmul.msk.f32.vlgmr.msra.gmra.mxu0 %vm1384_vm14, %v1684_v39 }
 0x4d9   : > { %v1811_v13 = vpop.permute.xlu1 %1810 }
 0x4db   : > { %v1787_v14 = vpop.permute.xlu0 %1786 }
 0x4e1   : > { %v1799_v61 = vpop.permute.xlu1 %1798 }
 0x545   : > { %v1731_v8 = vpop.f32.mrf.mxu2 }
 0x546   : > { %v1732_v54 = vadd.f32 %v1731_v8, %v1689_v0 }
 0x548   : > { %v1735_v63 = vmax.f32 %v1732_v54, 0.0 }
 0x54a   : > { %v2920_v49 = vpack.i.bf16 0.0, %v1735_v63 }
 0x54c   : > { %2921 = vrot.lane.b32.xlu2 %v2920_v49, %s2985_s29 }
 0x555   : > { %v1711_v46 = vpop.f32.mrf.mxu0 }
 0x556   : > { %v1712_v52 = vadd.f32 %v1711_v46, %v1689_v0 }
 0x558   : > { %v3857_v56 = vmax.f32 %v1712_v52, 0.0 }
 0x55a   : > { %1806 = vrot.lane.b32.xlu2 %v3857_v56, %s2981_s6  ;;  %1758 = vrot.lane.b32.xlu0 %v3857_v56, %s2982_s24  ;;  %v2925_v37 = vpack.i.bf16 %v1735_v63, %v3857_v56 }
 0x55b   : > { %1770 = vrot.lane.b32.xlu1 %v3857_v56, %s2980_s27 }
 0x562   : > { %1784 = vrot.lane.b32.xlu2 %v1735_v63, %s4344_s0  ;;  %1808 = vrot.lane.b32.xlu0 %v1735_v63, %s2981_s6 }
 0x563   : > { %1760 = vrot.lane.b32.xlu1 %v1735_v63, %s2982_s24 }
 0x56a   : > { %1772 = vrot.lane.b32.xlu2 %v1735_v63, %s2980_s27  ;;  %1796 = vrot.lane.b32.xlu0 %v1735_v63, %s2984_s28 }
 0x56b   : > { %1748 = vrot.lane.b32.xlu1 %v1735_v63, %s2986_s3 }
 0x572   : > { %2926 = vrot.lane.b32.xlu2 %v2925_v37, %s2983_s7  ;;  %1746 = vrot.lane.b32.xlu0 %v3857_v56, %s2986_s3 }
 0x573   : > { %1794 = vrot.lane.b32.xlu1 %v3857_v56, %s2984_s28 }
 0x57a   : > { %1782 = vrot.lane.b32.xlu2 %v3857_v56, %s4344_s0  ;;  %1828 = vrot.lane.b32.xlu0 %v3857_v56, %s2985_s29 }
 0x57b   : > { %1756 = vrot.lane.b32.xlu1 %v2978_v6, %s2982_s24 }
 0x582   : > { %1818 = vrot.lane.b32.xlu2 %v2978_v6, %s2983_s7  ;;  %1768 = vrot.lane.b32.xlu0 %v2978_v6, %s2980_s27 }
 0x583   : > { %1842 = vperm.xlu1 %2887, %v1839_v58  }
 0x58a   : > { %1744 = vrot.lane.b32.xlu0 %v2978_v6, %s2986_s3  ;;  %1940 = vrot.lane.b32.xlu2 %v2978_v6, %s4344_s0 }
 0x592   : > { %1964 = vrot.lane.b32.xlu0 %v2978_v6, %s2981_s6 }
 0x59a   : > { %1952 = vrot.lane.b32.xlu0 %v2978_v6, %s2984_s28 }
 0x5a6   : > { %v2922_v41 = vpop.permute.xlu2 %2921 }
 0x5a7   : > { %v2924_v50 = vunpack.i.h.bf16 %v2922_v41  ;;  %v2923_v12 = vunpack.i.l.bf16 %v2922_v41 }
 0x5a9   : > { %v1835_v22 = vsel %vm1168_vm9, %v2923_v12, %v2924_v50 }
 0x5b4   : > { %v1807_v4 = vpop.permute.xlu2 %1806 }
 0x5bc   : > { %v1785_v15 = vpop.permute.xlu2 %1784 }
 0x5bd   : > { %v1789_v25 = vsel %vm1026_vm4, %v1785_v15, %v1787_v14 }
 0x5c4   : > { %v1773_v35 = vpop.permute.xlu2 %1772 }
 0x5cc   : > { %v1759_v10 = vpop.permute.xlu0 %1758  ;;  %v2927_v27 = vpop.permute.xlu2 %2926 }
 0x5cd   : > { %v1771_v18 = vpop.permute.xlu1 %1770  ;;  %v2929_v30 = vunpack.i.h.bf16 %v2927_v27  ;;  %v2928_v3 = vunpack.i.l.bf16 %v2927_v27 }
 0x5ce   : > { %v1775_v17 = vsel %vm971_vm5, %v1771_v18, %v1773_v35 }
 0x5cf   : > { %v1825_v28 = vsel %vm1137_vm10, %v2928_v3, %v2929_v30 }
 0x5d4   : > { %v1809_v19 = vpop.permute.xlu0 %1808  ;;  %v1783_v36 = vpop.permute.xlu2 %1782 }
 0x5d5   : > { %v1812_v20 = vsel %vm1100_vm1, %v1807_v4, %v1809_v19  ;;  %v1813_v9 = vsel %vm1100_vm1, %v1809_v19, %v1811_v13  ;;  %v1761_v21 = vpop.permute.xlu1 %1760  ;;  %v1788_v44 = vsel %vm1026_vm4, %v1783_v36, %v1785_v15 }
 0x5d6   : > { %2722 = vmatpush.msk.msrb.mxu1 %vm3285_vm2, %v1812_v20  ;;  %2729 = vmatpush.msk.msrb.mxu3 %vm3292_vm3, %v1813_v9  ;;  %v1763_v33 = vsel %vm934_vm8, %v1759_v10, %v1761_v21 }
 0x5d8   : > { %1876 = vmatpush.msrb.mxu3 %v1835_v22 }
 0x5dc   : > { %v1797_v24 = vpop.permute.xlu0 %1796  ;;  %v1819_v5 = vpop.permute.xlu2 %1818 }
 0x5dd   : > { %v1801_v23 = vsel %vm1063_vm11, %v1797_v24, %v1799_v61  ;;  %v1749_v29 = vpop.permute.xlu1 %1748  ;;  %v1824_v51 = vsel %vm1137_vm10, %v1819_v5, %v2928_v3 }
 0x5de   : > { %2730 = vmatpush.msk.msrb.mxu3 %vm3393_vm6, %v1801_v23 }
 0x5e0   : > { %2731 = vmatpush.msk.msrb.mxu3 %vm3292_vm3, %v1789_v25 }
 0x5e2   : > { %1879 = vmatpush.msrb.mxu3 %v1735_v63  ;;  %v1993_v63 = vld [vmem:[%s4317_s14] sm:$0xff] }
 0x5e4   : > { %v1747_v31 = vpop.permute.xlu0 %1746  ;;  %2732 = vmatpush.msk.msrb.mxu3 %vm3393_vm6, %v1775_v17  ;;  %v1941_v49 = vpop.permute.xlu2 %1940 }
 0x5e5   : > { %v1751_v32 = vsel %vm893_vm12, %v1747_v31, %v1749_v29  ;;  %v1795_v34 = vpop.permute.xlu1 %1794 }
 0x5e6   : > { %2733 = vmatpush.msk.msrb.mxu3 %vm3292_vm3, %v1763_v33  ;;  %v1800_v62 = vsel %vm1063_vm11, %v1795_v34, %v1797_v24  ;;  %v1992_v33 = vld [vmem:[%s4316_s13] sm:$0xff] }
 0x5e8   : > { %1882 = vmatpush.msrb.mxu3 %v1825_v28 }
 0x5ea   : > { %2734 = vmatpush.msk.msrb.mxu3 %vm3393_vm6, %v1751_v32 }
 0x5eb   : > { %2735 = vmatmul.msk.f32.vlgmr.msrb.gmra.mxu3 %vm1384_vm14, %v1838_v26 }
 0x5ec   : > { %v1829_v39 = vpop.permute.xlu0 %1828 }
 0x5ed   : > { %v1834_v43 = vsel %vm1168_vm9, %v1829_v39, %v2923_v12  ;;  %v1757_v45 = vpop.permute.xlu1 %1756 }
 0x5ee   : > { %1856 = vmatpush.msrb.mxu1 %v1834_v43  ;;  %v1762_v38 = vsel %vm934_vm8, %v1757_v45, %v1759_v10 }
 0x5f0   : > { %2723 = vmatpush.msk.msrb.mxu1 %vm3402_vm7, %v1800_v62 }
 0x5f2   : > { %2724 = vmatpush.msk.msrb.mxu1 %vm3285_vm2, %v1788_v44 }
 0x5f4   : > { %v1769_v47 = vpop.permute.xlu0 %1768  ;;  %1859 = vmatpush.msrb.mxu1 %v3857_v56 }
 0x5f5   : > { %v1774_v48 = vsel %vm971_vm5, %v1769_v47, %v1771_v18  ;;  %v1843_v1 = vpop.permute.xlu1 %1842 }
 0x5f6   : > { %2725 = vmatpush.msk.msrb.mxu1 %vm3402_vm7, %v1774_v48 }
 0x5f8   : > { %2726 = vmatpush.msk.msrb.mxu1 %vm3285_vm2, %v1762_v38 }
 0x5fa   : > { %1862 = vmatpush.msrb.mxu1 %v1824_v51 }
 0x5fc   : > { %v1745_v53 = vpop.permute.xlu0 %1744 }
 0x5fd   : > { %v1750_v59 = vsel %vm893_vm12, %v1745_v53, %v1747_v31 }
 0x5fe   : > { %2727 = vmatpush.msk.msrb.mxu1 %vm3402_vm7, %v1750_v59 }
 0x5ff   : > { %2728 = vmatmul.msk.f32.vlgmr.msrb.gmra.mxu1 %vm1384_vm14, %v1838_v26 }
 0x604   : > { %v1965_v52 = vpop.permute.xlu0 %1964 }
 0x60c   : > { %v1953_v4 = vpop.permute.xlu0 %1952 }
 0x66e   : > { %v1885_v55 = vpop.f32.mrf.mxu3 }
 0x66f   : > { %v1886_v2 = vadd.f32 %v1885_v55, %v1843_v1  ;;  %v2145_v55 = vld [vmem:[%s4319_s16] sm:$0xff] }
 0x671   : > { %v1889_v60 = vmax.f32 %v1886_v2, 0.0 }
 0x673   : > { %v2930_v7 = vpack.i.bf16 0.0, %v1889_v60 }
 0x675   : > { %2931 = vrot.lane.b32.xlu1 %v2930_v7, %s2985_s29 }
 0x67c   : > { %v1865_v57 = vpop.f32.mrf.mxu1 }
 0x67d   : > { %v1866_v0 = vadd.f32 %v1865_v57, %v1843_v1 }
 0x67f   : > { %v3945_v8 = vmax.f32 %v1866_v0, 0.0 }
 0x681   : > { %1960 = vrot.lane.b32.xlu1 %v3945_v8, %s2981_s6  ;;  %1912 = vrot.lane.b32.xlu2 %v3945_v8, %s2982_s24  ;;  %v2935_v54 = vpack.i.bf16 %v1889_v60, %v3945_v8 }
 0x682   : > { %1924 = vrot.lane.b32.xlu0 %v3945_v8, %s2980_s27 }
 0x689   : > { %1938 = vrot.lane.b32.xlu1 %v1889_v60, %s4344_s0  ;;  %1962 = vrot.lane.b32.xlu2 %v1889_v60, %s2981_s6 }
 0x68a   : > { %1914 = vrot.lane.b32.xlu0 %v1889_v60, %s2982_s24 }
 0x691   : > { %1926 = vrot.lane.b32.xlu1 %v1889_v60, %s2980_s27  ;;  %1950 = vrot.lane.b32.xlu2 %v1889_v60, %s2984_s28 }
 0x692   : > { %1902 = vrot.lane.b32.xlu0 %v1889_v60, %s2986_s3 }
 0x699   : > { %2936 = vrot.lane.b32.xlu1 %v2935_v54, %s2983_s7  ;;  %1900 = vrot.lane.b32.xlu2 %v3945_v8, %s2986_s3 }
 0x69a   : > { %1948 = vrot.lane.b32.xlu0 %v3945_v8, %s2984_s28 }
 0x6a1   : > { %1936 = vrot.lane.b32.xlu1 %v3945_v8, %s4344_s0  ;;  %1982 = vrot.lane.b32.xlu2 %v3945_v8, %s2985_s29 }
 0x6a2   : > { %1910 = vrot.lane.b32.xlu0 %v2978_v6, %s2982_s24 }
 0x6a9   : > { %1972 = vrot.lane.b32.xlu1 %v2978_v6, %s2983_s7  ;;  %1922 = vrot.lane.b32.xlu2 %v2978_v6, %s2980_s27 }
 0x6aa   : > { %1996 = vperm.xlu0 %2898, %v1993_v63  }
 0x6b1   : > { %1898 = vrot.lane.b32.xlu2 %v2978_v6, %s2986_s3  ;;  %2092 = vrot.lane.b32.xlu1 %v2978_v6, %s4344_s0 }
 0x6b9   : > { %2116 = vrot.lane.b32.xlu2 %v2978_v6, %s2981_s6 }
 0x6c1   : > { %2104 = vrot.lane.b32.xlu2 %v2978_v6, %s2984_s28 }
 0x6db   : > { %v1913_v46 = vpop.permute.xlu2 %1912 }
 0x6e3   : > { %v1963_v56 = vpop.permute.xlu2 %1962 }
 0x6e4   : > { %v1967_v37 = vsel %vm1100_vm1, %v1963_v56, %v1965_v52 }
 0x6e5   : > { %2743 = vmatpush.msk.msrb.mxu2 %vm3292_vm3, %v1967_v37 }
 0x6e7   : > { %v2932_v58 = vpop.permute.xlu1 %2931 }
 0x6e8   : > { %v2934_v41 = vunpack.i.h.bf16 %v2932_v58  ;;  %v2933_v13 = vunpack.i.l.bf16 %v2932_v58 }
 0x6ea   : > { %v1989_v61 = vsel %vm1168_vm9, %v2933_v13, %v2934_v41 }
 0x6eb   : > { %2030 = vmatpush.msrb.mxu2 %v1989_v61  ;;  %v1951_v14 = vpop.permute.xlu2 %1950 }
 0x6ec   : > { %v1955_v15 = vsel %vm1063_vm11, %v1951_v14, %v1953_v4 }
 0x6ed   : > { %2744 = vmatpush.msk.msrb.mxu2 %vm3393_vm6, %v1955_v15 }
 0x6f3   : > { %v1961_v10 = vpop.permute.xlu1 %1960  ;;  %v1901_v18 = vpop.permute.xlu2 %1900 }
 0x6f4   : > { %v1966_v50 = vsel %vm1100_vm1, %v1961_v10, %v1963_v56  ;;  %v1925_v12 = vpop.permute.xlu0 %1924 }
 0x6f5   : > { %2736 = vmatpush.msk.msrb.mxu0 %vm3285_vm2, %v1966_v50 }
 0x6fb   : > { %v1939_v19 = vpop.permute.xlu1 %1938  ;;  %v1983_v20 = vpop.permute.xlu2 %1982 }
 0x6fc   : > { %v1943_v9 = vsel %vm1026_vm4, %v1939_v19, %v1941_v49  ;;  %v1915_v35 = vpop.permute.xlu0 %1914  ;;  %v1988_v21 = vsel %vm1168_vm9, %v1983_v20, %v2933_v13 }
 0x6fd   : > { %2010 = vmatpush.msrb.mxu0 %v1988_v21  ;;  %2745 = vmatpush.msk.msrb.mxu2 %vm3292_vm3, %v1943_v9  ;;  %v1917_v25 = vsel %vm934_vm8, %v1913_v46, %v1915_v35  ;;  %v2144_v21 = vld [vmem:[%s4318_s15] sm:$0xff] }
 0x6ff   : > { %2033 = vmatpush.msrb.mxu2 %v1889_v60 }
 0x703   : > { %v1927_v22 = vpop.permute.xlu1 %1926  ;;  %v1923_v26 = vpop.permute.xlu2 %1922 }
 0x704   : > { %v1929_v24 = vsel %vm971_vm5, %v1925_v12, %v1927_v22  ;;  %v1903_v23 = vpop.permute.xlu0 %1902  ;;  %v1928_v39 = vsel %vm971_vm5, %v1923_v26, %v1925_v12 }
 0x705   : > { %2746 = vmatpush.msk.msrb.mxu2 %vm3393_vm6, %v1929_v24  ;;  %v1905_v28 = vsel %vm893_vm12, %v1901_v18, %v1903_v23 }
 0x707   : > { %2747 = vmatpush.msk.msrb.mxu2 %vm3292_vm3, %v1917_v25 }
 0x70b   : > { %v2937_v27 = vpop.permute.xlu1 %2936  ;;  %v1899_v62 = vpop.permute.xlu2 %1898 }
 0x70c   : > { %v2939_v29 = vunpack.i.h.bf16 %v2937_v27  ;;  %v2938_v30 = vunpack.i.l.bf16 %v2937_v27  ;;  %v1949_v3 = vpop.permute.xlu0 %1948  ;;  %v1904_v47 = vsel %vm893_vm12, %v1899_v62, %v1901_v18 }
 0x70d   : > { %v1954_v17 = vsel %vm1063_vm11, %v1949_v3, %v1951_v14 }
 0x70e   : > { %2737 = vmatpush.msk.msrb.mxu0 %vm3402_vm7, %v1954_v17  ;;  %v1979_v31 = vsel %vm1137_vm10, %v2938_v30, %v2939_v29 }
 0x70f   : > { %2036 = vmatpush.msrb.mxu2 %v1979_v31 }
 0x711   : > { %2748 = vmatpush.msk.msrb.mxu2 %vm3393_vm6, %v1905_v28 }
 0x712   : > { %2749 = vmatmul.msk.f32.vlgmr.msrb.gmra.mxu2 %vm1384_vm14, %v1992_v33 }
 0x713   : > { %v1937_v32 = vpop.permute.xlu1 %1936  ;;  %v2117_v2 = vpop.permute.xlu2 %2116 }
 0x714   : > { %v1942_v34 = vsel %vm1026_vm4, %v1937_v32, %v1939_v19  ;;  %v1911_v36 = vpop.permute.xlu0 %1910 }
 0x715   : > { %2738 = vmatpush.msk.msrb.mxu0 %vm3285_vm2, %v1942_v34  ;;  %v1916_v43 = vsel %vm934_vm8, %v1911_v36, %v1913_v46 }
 0x717   : > { %2013 = vmatpush.msrb.mxu0 %v3945_v8 }
 0x719   : > { %2739 = vmatpush.msk.msrb.mxu0 %vm3402_vm7, %v1928_v39 }
 0x71b   : > { %v1973_v44 = vpop.permute.xlu1 %1972  ;;  %2740 = vmatpush.msk.msrb.mxu0 %vm3285_vm2, %v1916_v43  ;;  %v2105_v60 = vpop.permute.xlu2 %2104 }
 0x71c   : > { %v1978_v45 = vsel %vm1137_vm10, %v1973_v44, %v2938_v30  ;;  %v1997_v48 = vpop.permute.xlu0 %1996 }
 0x71d   : > { %2016 = vmatpush.msrb.mxu0 %v1978_v45 }
 0x71f   : > { %2741 = vmatpush.msk.msrb.mxu0 %vm3402_vm7, %v1904_v47 }
 0x720   : > { %2742 = vmatmul.msk.f32.vlgmr.msrb.gmra.mxu0 %vm1384_vm14, %v1992_v33 }
 0x723   : > { %v2093_v7 = vpop.permute.xlu1 %2092 }
 0x795   : > { %v2039_v5 = vpop.f32.mrf.mxu2 }
 0x796   : > { %v2040_v38 = vadd.f32 %v2039_v5, %v1997_v48  ;;  %v2299_v5 = vld [vmem:[%s4321_s18] sm:$0xff] }
 0x798   : > { %v2940_v51 = vpack.i.bf16 0.0, %v2040_v38 }
 0x79a   : > { %2941 = vrot.lane.b32.xlu0 %v2940_v51, %s2985_s29 }
 0x79d   : > { %v2019_v53 = vpop.f32.mrf.mxu0 }
 0x79e   : > { %v4033_v59 = vadd.f32 %v2019_v53, %v1997_v48 }
 0x7a0   : > { %2064 = vrot.lane.b32.xlu1 %v4033_v59, %s2982_s24  ;;  %2076 = vrot.lane.b32.xlu2 %v4033_v59, %s2980_s27  ;;  %v2945_v1 = vpack.i.bf16 %v2040_v38, %v4033_v59 }
 0x7a2   : > { %2112 = vrot.lane.b32.xlu0 %v4033_v59, %s2981_s6 }
 0x7a8   : > { %2114 = vrot.lane.b32.xlu1 %v2040_v38, %s2981_s6  ;;  %2066 = vrot.lane.b32.xlu2 %v2040_v38, %s2982_s24 }
 0x7aa   : > { %2090 = vrot.lane.b32.xlu0 %v2040_v38, %s4344_s0 }
 0x7b0   : > { %2102 = vrot.lane.b32.xlu1 %v2040_v38, %s2984_s28  ;;  %2054 = vrot.lane.b32.xlu2 %v2040_v38, %s2986_s3 }
 0x7b2   : > { %2078 = vrot.lane.b32.xlu0 %v2040_v38, %s2980_s27 }
 0x7b8   : > { %2052 = vrot.lane.b32.xlu1 %v4033_v59, %s2986_s3  ;;  %2100 = vrot.lane.b32.xlu2 %v4033_v59, %s2984_s28 }
 0x7ba   : > { %2946 = vrot.lane.b32.xlu0 %v2945_v1, %s2983_s7 }
 0x7c0   : > { %2134 = vrot.lane.b32.xlu1 %v4033_v59, %s2985_s29  ;;  %2062 = vrot.lane.b32.xlu2 %v2978_v6, %s2982_s24 }
 0x7c2   : > { %2088 = vrot.lane.b32.xlu0 %v4033_v59, %s4344_s0 }
 0x7c8   : > { %2074 = vrot.lane.b32.xlu1 %v2978_v6, %s2980_s27  ;;  %2148 = vperm.xlu2 %2919, %v2145_v55  }
 0x7ca   : > { %2124 = vrot.lane.b32.xlu0 %v2978_v6, %s2983_s7 }
 0x7d0   : > { %2050 = vrot.lane.b32.xlu1 %v2978_v6, %s2986_s3 }
 0x7d2   : > { %2246 = vrot.lane.b32.xlu0 %v2978_v6, %s4344_s0 }
 0x7d8   : > { %2270 = vrot.lane.b32.xlu1 %v2978_v6, %s2981_s6 }
 0x7e0   : > { %2258 = vrot.lane.b32.xlu1 %v2978_v6, %s2984_s28 }
 0x7fa   : > { %v2077_v0 = vpop.permute.xlu2 %2076 }
 0x802   : > { %v2067_v37 = vpop.permute.xlu2 %2066 }
 0x80a   : > { %v2055_v15 = vpop.permute.xlu2 %2054 }
 0x80c   : > { %v2942_v57 = vpop.permute.xlu0 %2941 }
 0x80d   : > { %v2944_v63 = vunpack.i.h.bf16 %v2942_v57  ;;  %v2943_v49 = vunpack.i.l.bf16 %v2942_v57 }
 0x80f   : > { %v2141_v41 = vsel %vm1168_vm9, %v2943_v49, %v2944_v63 }
 0x812   : > { %v2065_v8 = vpop.permute.xlu1 %2064  ;;  %v2101_v35 = vpop.permute.xlu2 %2100 }
 0x813   : > { %v2069_v50 = vsel %vm934_vm8, %v2065_v8, %v2067_v37 }
 0x814   : > { %v2113_v54 = vpop.permute.xlu0 %2112 }
 0x81a   : > { %v2115_v46 = vpop.permute.xlu1 %2114  ;;  %v2063_v30 = vpop.permute.xlu2 %2062 }
 0x81b   : > { %v2118_v52 = vsel %vm1100_vm1, %v2113_v54, %v2115_v46  ;;  %v2119_v56 = vsel %vm1100_vm1, %v2115_v46, %v2117_v2  ;;  %v2068_v33 = vsel %vm934_vm8, %v2063_v30, %v2065_v8 }
 0x81c   : > { %v2091_v58 = vpop.permute.xlu0 %2090  ;;  %2750 = vmatpush.msk.msra.mxu1 %vm3285_vm2, %v2118_v52  ;;  %2757 = vmatpush.msk.msra.mxu3 %vm3292_vm3, %v2119_v56 }
 0x81d   : > { %v2095_v14 = vsel %vm1026_vm4, %v2091_v58, %v2093_v7 }
 0x81e   : > { %2182 = vmatpush.msra.mxu3 %v2141_v41 }
 0x822   : > { %v2103_v13 = vpop.permute.xlu1 %2102  ;;  %v2149_v34 = vpop.permute.xlu2 %2148 }
 0x823   : > { %v2107_v4 = vsel %vm1063_vm11, %v2103_v13, %v2105_v60  ;;  %v2106_v27 = vsel %vm1063_vm11, %v2101_v35, %v2103_v13 }
 0x824   : > { %v2079_v61 = vpop.permute.xlu0 %2078  ;;  %2758 = vmatpush.msk.msra.mxu3 %vm3393_vm6, %v2107_v4 }
 0x825   : > { %v2081_v10 = vsel %vm971_vm5, %v2077_v0, %v2079_v61 }
 0x826   : > { %2759 = vmatpush.msk.msra.mxu3 %vm3292_vm3, %v2095_v14 }
 0x828   : > { %2185 = vmatpush.msra.mxu3 %v2040_v38 }
 0x82a   : > { %v2053_v18 = vpop.permute.xlu1 %2052  ;;  %2760 = vmatpush.msk.msra.mxu3 %vm3393_vm6, %v2081_v10 }
 0x82b   : > { %v2057_v22 = vsel %vm893_vm12, %v2053_v18, %v2055_v15 }
 0x82c   : > { %v2947_v12 = vpop.permute.xlu0 %2946  ;;  %2761 = vmatpush.msk.msra.mxu3 %vm3292_vm3, %v2069_v50 }
 0x82d   : > { %v2949_v19 = vunpack.i.h.bf16 %v2947_v12  ;;  %v2948_v20 = vunpack.i.l.bf16 %v2947_v12 }
 0x82f   : > { %v2131_v9 = vsel %vm1137_vm10, %v2948_v20, %v2949_v19 }
 0x830   : > { %2188 = vmatpush.msra.mxu3 %v2131_v9 }
 0x832   : > { %v2135_v24 = vpop.permute.xlu1 %2134  ;;  %2762 = vmatpush.msk.msra.mxu3 %vm3393_vm6, %v2057_v22 }
 0x833   : > { %2763 = vmatmul.msk.f32.vlgmr.msra.gmra.mxu3 %vm1384_vm14, %v2144_v21  ;;  %v2140_v23 = vsel %vm1168_vm9, %v2135_v24, %v2943_v49 }
 0x834   : > { %v2089_v25 = vpop.permute.xlu0 %2088  ;;  %2162 = vmatpush.msra.mxu1 %v2140_v23 }
 0x835   : > { %v2094_v29 = vsel %vm1026_vm4, %v2089_v25, %v2091_v58 }
 0x836   : > { %2751 = vmatpush.msk.msra.mxu1 %vm3402_vm7, %v2106_v27 }
 0x838   : > { %2752 = vmatpush.msk.msra.mxu1 %vm3285_vm2, %v2094_v29 }
 0x83a   : > { %v2075_v3 = vpop.permute.xlu1 %2074  ;;  %2165 = vmatpush.msra.mxu1 %v4033_v59 }
 0x83b   : > { %v2080_v17 = vsel %vm971_vm5, %v2075_v3, %v2077_v0 }
 0x83c   : > { %v2125_v31 = vpop.permute.xlu0 %2124  ;;  %2753 = vmatpush.msk.msra.mxu1 %vm3402_vm7, %v2080_v17 }
 0x83d   : > { %v2130_v28 = vsel %vm1137_vm10, %v2125_v31, %v2948_v20 }
 0x83e   : > { %2754 = vmatpush.msk.msra.mxu1 %vm3285_vm2, %v2068_v33 }
 0x840   : > { %2168 = vmatpush.msra.mxu1 %v2130_v28 }
 0x842   : > { %v2051_v26 = vpop.permute.xlu1 %2050 }
 0x843   : > { %v2056_v32 = vsel %vm893_vm12, %v2051_v26, %v2053_v18  ;;  %v2298_v18 = vld [vmem:[%s4320_s17] sm:$0xff] }
 0x844   : > { %2755 = vmatpush.msk.msra.mxu1 %vm3402_vm7, %v2056_v32  ;;  %v2247_v1 = vpop.permute.xlu0 %2246 }
 0x845   : > { %2756 = vmatmul.msk.f32.vlgmr.msra.gmra.mxu1 %vm1384_vm14, %v2144_v21 }
 0x84a   : > { %v2271_v38 = vpop.permute.xlu1 %2270 }
 0x852   : > { %v2259_v59 = vpop.permute.xlu1 %2258 }
 0x8b6   : > { %v2191_v36 = vpop.f32.mrf.mxu3 }
 0x8b7   : > { %v2192_v39 = vadd.f32 %v2191_v36, %v2149_v34 }
 0x8b9   : > { %v2195_v43 = vmax.f32 %v2192_v39, 0.0 }
 0x8bb   : > { %v2950_v62 = vpack.i.bf16 0.0, %v2195_v43 }
 0x8bd   : > { %2951 = vrot.lane.b32.xlu2 %v2950_v62, %s2985_s29  ;;  %v2503_v62 = vld [vmem:[%s4325_s22] sm:$0x7] }
 0x8c2   : > { %v2171_v44 = vpop.f32.mrf.mxu1 }
 0x8c3   : > { %v2172_v45 = vadd.f32 %v2171_v44, %v2149_v34 }
 0x8c5   : > { %v4121_v47 = vmax.f32 %v2172_v45, 0.0 }
 0x8c7   : > { %2266 = vrot.lane.b32.xlu2 %v4121_v47, %s2981_s6  ;;  %2218 = vrot.lane.b32.xlu0 %v4121_v47, %s2982_s24  ;;  %v2955_v48 = vpack.i.bf16 %v2195_v43, %v4121_v47 }
 0x8c8   : > { %2230 = vrot.lane.b32.xlu1 %v4121_v47, %s2980_s27 }
 0x8cf   : > { %2244 = vrot.lane.b32.xlu2 %v2195_v43, %s4344_s0  ;;  %2268 = vrot.lane.b32.xlu0 %v2195_v43, %s2981_s6 }
 0x8d0   : > { %2220 = vrot.lane.b32.xlu1 %v2195_v43, %s2982_s24 }
 0x8d7   : > { %2232 = vrot.lane.b32.xlu2 %v2195_v43, %s2980_s27  ;;  %2256 = vrot.lane.b32.xlu0 %v2195_v43, %s2984_s28 }
 0x8d8   : > { %2208 = vrot.lane.b32.xlu1 %v2195_v43, %s2986_s3 }
 0x8df   : > { %2956 = vrot.lane.b32.xlu2 %v2955_v48, %s2983_s7  ;;  %2206 = vrot.lane.b32.xlu0 %v4121_v47, %s2986_s3 }
 0x8e0   : > { %2254 = vrot.lane.b32.xlu1 %v4121_v47, %s2984_s28 }
 0x8e7   : > { %2242 = vrot.lane.b32.xlu2 %v4121_v47, %s4344_s0  ;;  %2288 = vrot.lane.b32.xlu0 %v4121_v47, %s2985_s29 }
 0x8e8   : > { %2216 = vrot.lane.b32.xlu1 %v2978_v6, %s2982_s24 }
 0x8ef   : > { %2278 = vrot.lane.b32.xlu2 %v2978_v6, %s2983_s7  ;;  %2228 = vrot.lane.b32.xlu0 %v2978_v6, %s2980_s27 }
 0x8f0   : > { %2302 = vperm.xlu1 %2887, %v2299_v5  }
 0x8f7   : > { %2204 = vrot.lane.b32.xlu0 %v2978_v6, %s2986_s3  ;;  %2400 = vrot.lane.b32.xlu2 %v2978_v6, %s4344_s0 }
 0x8ff   : > { %2424 = vrot.lane.b32.xlu0 %v2978_v6, %s2981_s6 }
 0x907   : > { %2412 = vrot.lane.b32.xlu0 %v2978_v6, %s2984_s28 }
 0x917   : > { %v2952_v51 = vpop.permute.xlu2 %2951 }
 0x918   : > { %v2954_v7 = vunpack.i.h.bf16 %v2952_v51  ;;  %v2953_v57 = vunpack.i.l.bf16 %v2952_v51 }
 0x91a   : > { %v2295_v46 = vsel %vm1168_vm9, %v2953_v57, %v2954_v7 }
 0x921   : > { %v2267_v53 = vpop.permute.xlu2 %2266 }
 0x929   : > { %v2245_v55 = vpop.permute.xlu2 %2244 }
 0x92a   : > { %v2249_v37 = vsel %vm1026_vm4, %v2245_v55, %v2247_v1 }
 0x931   : > { %v2233_v63 = vpop.permute.xlu2 %2232 }
 0x939   : > { %v2219_v2 = vpop.permute.xlu0 %2218  ;;  %v2957_v58 = vpop.permute.xlu2 %2956 }
 0x93a   : > { %v2231_v60 = vpop.permute.xlu1 %2230  ;;  %v2959_v13 = vunpack.i.h.bf16 %v2957_v58  ;;  %v2958_v4 = vunpack.i.l.bf16 %v2957_v58 }
 0x93b   : > { %v2235_v61 = vsel %vm971_vm5, %v2231_v60, %v2233_v63 }
 0x93c   : > { %v2285_v10 = vsel %vm1137_vm10, %v2958_v4, %v2959_v13 }
 0x941   : > { %v2269_v0 = vpop.permute.xlu0 %2268  ;;  %v2243_v19 = vpop.permute.xlu2 %2242 }
 0x942   : > { %v2272_v8 = vsel %vm1100_vm1, %v2267_v53, %v2269_v0  ;;  %v2273_v54 = vsel %vm1100_vm1, %v2269_v0, %v2271_v38  ;;  %v2221_v49 = vpop.permute.xlu1 %2220  ;;  %v2248_v21 = vsel %vm1026_vm4, %v2243_v19, %v2245_v55 }
 0x943   : > { %2764 = vmatpush.msk.msra.mxu0 %vm3285_vm2, %v2272_v8  ;;  %2771 = vmatpush.msk.msra.mxu2 %vm3292_vm3, %v2273_v54  ;;  %v2223_v15 = vsel %vm934_vm8, %v2219_v2, %v2221_v49 }
 0x945   : > { %2336 = vmatpush.msra.mxu2 %v2295_v46 }
 0x949   : > { %v2257_v52 = vpop.permute.xlu0 %2256  ;;  %v2279_v25 = vpop.permute.xlu2 %2278 }
 0x94a   : > { %v2261_v56 = vsel %vm1063_vm11, %v2257_v52, %v2259_v59  ;;  %v2209_v41 = vpop.permute.xlu1 %2208  ;;  %v2284_v29 = vsel %vm1137_vm10, %v2279_v25, %v2958_v4  ;;  %v2502_v25 = vld [vmem:[%s4324_s21] sm:$0x7] }
 0x94b   : > { %2772 = vmatpush.msk.msra.mxu2 %vm3393_vm6, %v2261_v56 }
 0x94d   : > { %2773 = vmatpush.msk.msra.mxu2 %vm3292_vm3, %v2249_v37 }
 0x94f   : > { %2339 = vmatpush.msra.mxu2 %v2195_v43  ;;  %v2453_v43 = vld [vmem:[%s4323_s20] sm:$0xff] }
 0x951   : > { %v2207_v14 = vpop.permute.xlu0 %2206  ;;  %2774 = vmatpush.msk.msra.mxu2 %vm3393_vm6, %v2235_v61  ;;  %v2401_v44 = vpop.permute.xlu2 %2400 }
 0x952   : > { %v2211_v50 = vsel %vm893_vm12, %v2207_v14, %v2209_v41  ;;  %v2255_v12 = vpop.permute.xlu1 %2254 }
 0x953   : > { %2775 = vmatpush.msk.msra.mxu2 %vm3292_vm3, %v2223_v15  ;;  %v2260_v35 = vsel %vm1063_vm11, %v2255_v12, %v2257_v52  ;;  %v2452_v15 = vld [vmem:[%s4322_s19] sm:$0xff] }
 0x955   : > { %2342 = vmatpush.msra.mxu2 %v2285_v10 }
 0x957   : > { %2776 = vmatpush.msk.msra.mxu2 %vm3393_vm6, %v2211_v50 }
 0x958   : > { %2777 = vmatmul.msk.f32.vlgmr.msra.gmra.mxu2 %vm1384_vm14, %v2298_v18 }
 0x959   : > { %v2289_v20 = vpop.permute.xlu0 %2288 }
 0x95a   : > { %v2294_v9 = vsel %vm1168_vm9, %v2289_v20, %v2953_v57  ;;  %v2217_v22 = vpop.permute.xlu1 %2216 }
 0x95b   : > { %2316 = vmatpush.msra.mxu0 %v2294_v9  ;;  %v2222_v27 = vsel %vm934_vm8, %v2217_v22, %v2219_v2 }
 0x95d   : > { %2765 = vmatpush.msk.msra.mxu0 %vm3402_vm7, %v2260_v35 }
 0x95f   : > { %2766 = vmatpush.msk.msra.mxu0 %vm3285_vm2, %v2248_v21 }
 0x961   : > { %v2229_v24 = vpop.permute.xlu0 %2228  ;;  %2319 = vmatpush.msra.mxu0 %v4121_v47 }
 0x962   : > { %v2234_v23 = vsel %vm971_vm5, %v2229_v24, %v2231_v60  ;;  %v2303_v17 = vpop.permute.xlu1 %2302 }
 0x963   : > { %2767 = vmatpush.msk.msra.mxu0 %vm3402_vm7, %v2234_v23 }
 0x965   : > { %2768 = vmatpush.msk.msra.mxu0 %vm3285_vm2, %v2222_v27 }
 0x967   : > { %2322 = vmatpush.msra.mxu0 %v2284_v29 }
 0x969   : > { %v2205_v30 = vpop.permute.xlu0 %2204 }
 0x96a   : > { %v2210_v3 = vsel %vm893_vm12, %v2205_v30, %v2207_v14 }
 0x96b   : > { %2769 = vmatpush.msk.msra.mxu0 %vm3402_vm7, %v2210_v3 }
 0x96c   : > { %2770 = vmatmul.msk.f32.vlgmr.msra.gmra.mxu0 %vm1384_vm14, %v2298_v18 }
 0x971   : > { %v2425_v47 = vpop.permute.xlu0 %2424 }
 0x979   : > { %v2413_v38 = vpop.permute.xlu0 %2412 }
 0x9db   : > { %v2345_v31 = vpop.f32.mrf.mxu2 }
 0x9dc   : > { %v2346_v26 = vadd.f32 %v2345_v31, %v2303_v17 }
 0x9de   : > { %v2349_v34 = vmax.f32 %v2346_v26, 0.0 }
 0x9e0   : > { %v2960_v36 = vpack.i.bf16 0.0, %v2349_v34 }
 0x9e9   : > { %v2325_v33 = vpop.f32.mrf.mxu0 }
 0x9ea   : > { %v2326_v28 = vadd.f32 %v2325_v33, %v2303_v17 }
 0x9ec   : > { %v4208_v32 = vmax.f32 %v2326_v28, 0.0 }
 0x9ee   : > { %2420 = vrot.lane.b32.xlu1 %v4208_v32, %s2981_s6  ;;  %2372 = vrot.lane.b32.xlu2 %v4208_v32, %s2982_s24  ;;  %v2965_v39 = vpack.i.bf16 %v2349_v34, %v4208_v32 }
 0x9ef   : > { %2384 = vrot.lane.b32.xlu0 %v4208_v32, %s2980_s27 }
 0x9f6   : > { %2961 = vrot.lane.b32.xlu1 %v2960_v36, %s2985_s29  ;;  %2422 = vrot.lane.b32.xlu2 %v2349_v34, %s2981_s6 }
 0x9f7   : > { %2360 = vrot.lane.b32.xlu0 %v4208_v32, %s2986_s3 }
 0x9fe   : > { %2398 = vrot.lane.b32.xlu1 %v2349_v34, %s4344_s0  ;;  %2410 = vrot.lane.b32.xlu2 %v2349_v34, %s2984_s28 }
 0x9ff   : > { %2374 = vrot.lane.b32.xlu0 %v2349_v34, %s2982_s24 }
 0xa06   : > { %2386 = vrot.lane.b32.xlu1 %v2349_v34, %s2980_s27  ;;  %2442 = vrot.lane.b32.xlu2 %v4208_v32, %s2985_s29 }
 0xa07   : > { %2408 = vrot.lane.b32.xlu0 %v4208_v32, %s2984_s28 }
 0xa0e   : > { %2362 = vrot.lane.b32.xlu1 %v2349_v34, %s2986_s3  ;;  %2966 = vrot.lane.b32.xlu2 %v2965_v39, %s2983_s7 }
 0xa0f   : > { %2370 = vrot.lane.b32.xlu0 %v2978_v6, %s2982_s24 }
 0xa16   : > { %2396 = vrot.lane.b32.xlu1 %v4208_v32, %s4344_s0  ;;  %2382 = vrot.lane.b32.xlu2 %v2978_v6, %s2980_s27  ;;  %s2798_s0 = sshll.u32 %s4360_s30, 3 }
 0xa17   : > { %2456 = vperm.xlu0 %2898, %v2453_v43   ;;  %s730_s1 = scalar_lea.vmem %s4326_s23, %s2798_s0 }
 0xa1e   : > { %2432 = vrot.lane.b32.xlu1 %v2978_v6, %s2983_s7  ;;  %2358 = vrot.lane.b32.xlu2 %v2978_v6, %s2986_s3 }
 0xa26   : > { %2506 = vperm.xlu1 %2887, %v2503_v62  }
 0xa48   : > { %v2373_v45 = vpop.permute.xlu2 %2372 }
 0xa50   : > { %v2423_v48 = vpop.permute.xlu2 %2422 }
 0xa51   : > { %v2427_v5 = vsel %vm1100_vm1, %v2423_v48, %v2425_v47 }
 0xa52   : > { %2785 = vmatpush.msk.msrb.mxu3 %vm3292_vm3, %v2427_v5 }
 0xa58   : > { %v2411_v51 = vpop.permute.xlu2 %2410 }
 0xa59   : > { %v2415_v8 = vsel %vm1063_vm11, %v2411_v51, %v2413_v38 }
 0xa60   : > { %v2421_v53 = vpop.permute.xlu1 %2420  ;;  %v2443_v7 = vpop.permute.xlu2 %2442 }
 0xa61   : > { %v2426_v59 = vsel %vm1100_vm1, %v2421_v53, %v2423_v48  ;;  %v2385_v6 = vpop.permute.xlu0 %2384 }
 0xa62   : > { %2778 = vmatpush.msk.msrb.mxu1 %vm3285_vm2, %v2426_v59 }
 0xa68   : > { %v2962_v1 = vpop.permute.xlu1 %2961  ;;  %v2967_v46 = vpop.permute.xlu2 %2966 }
 0xa69   : > { %v2964_v55 = vunpack.i.h.bf16 %v2962_v1  ;;  %v2963_v2 = vunpack.i.l.bf16 %v2962_v1  ;;  %v2361_v60 = vpop.permute.xlu0 %2360  ;;  %v2969_v56 = vunpack.i.h.bf16 %v2967_v46  ;;  %v2968_v37 = vunpack.i.l.bf16 %v2967_v46 }
 0xa6b   : > { %v2448_v57 = vsel %vm1168_vm9, %v2443_v7, %v2963_v2  ;;  %v2449_v0 = vsel %vm1168_vm9, %v2963_v2, %v2964_v55  ;;  %v2439_v61 = vsel %vm1137_vm10, %v2968_v37, %v2969_v56 }
 0xa6c   : > { %2470 = vmatpush.msrb.mxu1 %v2448_v57  ;;  %2490 = vmatpush.msrb.mxu3 %v2449_v0 }
 0xa6e   : > { %2786 = vmatpush.msk.msrb.mxu3 %vm3393_vm6, %v2415_v8 }
 0xa70   : > { %v2399_v54 = vpop.permute.xlu1 %2398  ;;  %v2383_v18 = vpop.permute.xlu2 %2382 }
 0xa71   : > { %v2403_v63 = vsel %vm1026_vm4, %v2399_v54, %v2401_v44  ;;  %v2375_v49 = vpop.permute.xlu0 %2374  ;;  %v2388_v19 = vsel %vm971_vm5, %v2383_v18, %v2385_v6 }
 0xa72   : > { %2787 = vmatpush.msk.msrb.mxu3 %vm3292_vm3, %v2403_v63  ;;  %v2377_v4 = vsel %vm934_vm8, %v2373_v45, %v2375_v49 }
 0xa74   : > { %2493 = vmatpush.msrb.mxu3 %v2349_v34 }
 0xa78   : > { %v2387_v52 = vpop.permute.xlu1 %2386  ;;  %v2359_v20 = vpop.permute.xlu2 %2358 }
 0xa79   : > { %v2389_v58 = vsel %vm971_vm5, %v2385_v6, %v2387_v52  ;;  %v2409_v41 = vpop.permute.xlu0 %2408  ;;  %v2364_v21 = vsel %vm893_vm12, %v2359_v20, %v2361_v60 }
 0xa7a   : > { %v2414_v13 = vsel %vm1063_vm11, %v2409_v41, %v2411_v51  ;;  %2788 = vmatpush.msk.msrb.mxu3 %vm3393_vm6, %v2389_v58 }
 0xa7b   : > { %2779 = vmatpush.msk.msrb.mxu1 %vm3402_vm7, %v2414_v13 }
 0xa7c   : > { %2789 = vmatpush.msk.msrb.mxu3 %vm3292_vm3, %v2377_v4 }
 0xa7e   : > { %2496 = vmatpush.msrb.mxu3 %v2439_v61 }
 0xa80   : > { %v2363_v14 = vpop.permute.xlu1 %2362 }
 0xa81   : > { %v2365_v10 = vsel %vm893_vm12, %v2361_v60, %v2363_v14  ;;  %v2371_v12 = vpop.permute.xlu0 %2370 }
 0xa82   : > { %2790 = vmatpush.msk.msrb.mxu3 %vm3393_vm6, %v2365_v10  ;;  %v2376_v16 = vsel %vm934_vm8, %v2371_v12, %v2373_v45 }
 0xa83   : > { %2791 = vmatmul.msk.f32.vlgmr.msrb.gmra.mxu3 %vm1384_vm14, %v2452_v15 }
 0xa88   : > { %v2397_v50 = vpop.permute.xlu1 %2396 }
 0xa89   : > { %v2402_v42 = vsel %vm1026_vm4, %v2397_v50, %v2399_v54  ;;  %v2457_v22 = vpop.permute.xlu0 %2456 }
 0xa8a   : > { %2780 = vmatpush.msk.msrb.mxu1 %vm3285_vm2, %v2402_v42 }
 0xa8c   : > { %2473 = vmatpush.msrb.mxu1 %v4208_v32 }
 0xa8e   : > { %2781 = vmatpush.msk.msrb.mxu1 %vm3402_vm7, %v2388_v19 }
 0xa90   : > { %v2433_v9 = vpop.permute.xlu1 %2432  ;;  %2782 = vmatpush.msk.msrb.mxu1 %vm3285_vm2, %v2376_v16 }
 0xa91   : > { %v2438_v35 = vsel %vm1137_vm10, %v2433_v9, %v2968_v37 }
 0xa92   : > { %2476 = vmatpush.msrb.mxu1 %v2438_v35 }
 0xa94   : > { %2783 = vmatpush.msk.msrb.mxu1 %vm3402_vm7, %v2364_v21 }
 0xa95   : > { %2784 = vmatmul.msk.f32.vlgmr.msrb.gmra.mxu1 %vm1384_vm14, %v2452_v15 }
 0xa98   : > { %v2507_v11 = vpop.permute.xlu1 %2506 }
 0xb06   : > { %v2499_v24 = vpop.f32.mrf.mxu3 }
 0xb07   : > { %v2500_v23 = vadd.f32 %v2499_v24, %v2457_v22 }
 0xb09   : > { %2548 = vmatpush.msrb.mxu2 %v2500_v23 }
 0xb0a   : > { %2793 = vmatmul.msk.f32.vlgmr.msrb.gmra.mxu2 %vm2509_vm15, %v2502_v25 }
 0xb12   : > { %v2479_v40 = vpop.f32.mrf.mxu1 }
 0xb13   : > { %v2480_v27 = vadd.f32 %v2479_v40, %v2457_v22 }
 0xb15   : > { %2528 = vmatpush.msrb.mxu0 %v2480_v27 }
 0xb16   : > { %2792 = vmatmul.msk.f32.vlgmr.msrb.gmra.mxu0 %vm2509_vm15, %v2502_v25 }
 0xb8d   : > { %v2550_v29 = vpop.f32.mrf.mxu2 }
 0xb8e   : > { %v2551_v30 = vadd.f32 %v2550_v29, %v2507_v11 }
 0xb90   : > { %v2555_v17 = vrot.slane %v2551_v30, 4 }
 0xb93   : > { %v2530_v3 = vpop.f32.mrf.mxu0 }
 0xb94   : > { %v2531_v31 = vadd.f32 %v2530_v3, %v2507_v11 }
 0xb96   : > { %v2557_v33 = vsel %vm2556_vm0, %v2531_v31, %v2555_v17 }
 0xb97   : > { %2559 = vst [vmem:[%s730_s1] sm:$0x77] %v2557_v33 }
 0xb98 PF: > { %s4358_s6 = sld [smem:[#allocation3_spill]] }
 0xb9e   : > { %s33_s4 = sadd.s32 1, %s4358_s6  }
 0xb9f   : > { %p30_p4 = scmp.ge.s32.totalorder %s33_s4, 4  }
 0xba1   :  { %32 = sbr.rel (!%p30_p4) target bundleno = 9 (0x9), region = 145 }

</bundles_post_ra>
